<compile_context>
chip_gen: v7x
topology: tpu7x:2x2x1
jax: 0.10.0
libtpu: 0.0.40
codegen_flags: <defaults>
</compile_context>

<pallas_src>
import functools

import jax
import jax.numpy as jnp
from jax import lax
from jax.experimental import pallas as pl
from jax.experimental.pallas import tpu as pltpu

EPS = 1e-5


# ------------------------------------------------------------------------------------
# helpers
# ------------------------------------------------------------------------------------
def _compiler_params():
    """Both grid axes are independent -> parallel (megacore on v7x); VMEM cap ~60%."""
    try:
        vmem_limit = int(pltpu.get_tpu_info().vmem_capacity_bytes * 0.6)
    except Exception:
        vmem_limit = None
    return pltpu.CompilerParams(
        dimension_semantics=("parallel", "parallel"),
        vmem_limit_bytes=vmem_limit,
    )


def _choose_tile_h(N, H, W, c_in, c_out):
    """Largest row tile fitting a conservative VMEM budget (whole image when it fits),
    keeping >= 2 grid steps so both v7x TensorCores get balanced work."""
    try:
        vmem = pltpu.get_tpu_info().vmem_capacity_bytes
    except Exception:
        vmem = 64 * 1024 * 1024
    # per-row working set: bf16 in/out tiles (double buffered) + f32 accumulator + slack
    row_bytes = W * (2 * c_in + 2 * c_out) * 2 * 2 + W * c_out * 4 * 2
    max_rows = max(8, int(vmem * 0.25) // max(row_bytes, 1))
    best = None
    for t in range(2, H + 1, 2):
        if H % t:
            continue
        if t != H and t % 8:
            continue
        if t <= max_rows:
            best = t
    if best is None:
        best = 8 if H % 8 == 0 else H
    if N * (H // best) < 2:  # keep the grid splittable across two TensorCores (v7x)
        for t in range(best - 2, 1, -2):
            if H % t == 0 and (t == H or t % 8 == 0) and N * (H // t) >= 2:
                best = t
                break
    return best


def _band_weights(w_hwio, W):
    """(3,3,c_in,c_out) HWIO weights -> (3, W*c_in, W*c_out) band matrices.

    M[kh][w_in*c_in+ci, w_out*c_out+co] = w[kh, w_in-w_out+1, ci, co] for |w_in-w_out|<=1
    so that the kh-row contribution of the conv is one lane-dense matmul
    x_row(1, W*c_in) @ M[kh]; W zero-padding falls out (out-of-range taps have no entry).
    """
    mats = 0.0
    for kw in range(3):
        sel = jnp.eye(W, dtype=jnp.float32, k=-(kw - 1))  # [w_in, w_out]
        mats = mats + jnp.einsum("ab,kio->kaibo", sel, w_hwio[:, kw, :, :])
    _, _, c_in, c_out = w_hwio.shape
    return mats.reshape(3, W * c_in, W * c_out)


def _tile_lanes(v, W):
    """(1, C) per-channel vector -> (1, W*C) matching the w*C + c lane layout."""
    return jnp.tile(v.reshape(-1), W).reshape(1, -1)


# ------------------------------------------------------------------------------------
# conv (+ optional folded input BN/ReLU) + per-tile BN partial stats
# ------------------------------------------------------------------------------------
def _conv_bn_stats_kernel(x_blk_ref, x_hbm_ref, w_ref, scale_ref, shift_ref,
                          y_ref, stats_ref, halo_ref, sem, *,
                          tile_h, num_i, apply_input_affine):
    """One (batch, row-block) tile of:
       [optional BN affine + ReLU on the input] -> 3x3 same-conv as three lane-dense
       bf16 MXU matmuls (one per kernel row) -> per-tile BN partial row-sums.

    x_blk_ref : (1, tile_h, K)      VMEM  interior rows, K = W*c_in (auto-pipelined)
    x_hbm_ref : (N, H, K)           ANY   same array, source for the 2 halo rows
    w_ref     : (3, K, n_out)       VMEM  bf16 band matrices, n_out = W*c_out
    scale/shift: (1, K)             VMEM  input BN affine (ignored if unused)
    y_ref     : (1, tile_h, n_out)  VMEM  conv output (bf16)
    stats_ref : (1, 1, 2, n_out)    VMEM  per-tile [row-sum, row-sum-of-squares]
    halo_ref  : (2, K)              VMEM  scratch for the two halo rows
    sem       : DMA semaphores (2,)
    """
    n = pl.program_id(0)
    i = pl.program_id(1)
    r0 = i * tile_h
    K = x_blk_ref.shape[-1]
    n_out = y_ref.shape[-1]
    multi_tile = num_i > 1

    if multi_tile:
        # Async halo fetches (overlap with the matmuls below); zero rows outside image.
        @pl.when(i > 0)
        def _():
            pltpu.make_async_copy(x_hbm_ref.at[n, pl.ds(r0 - 1, 1)],
                                  halo_ref.at[pl.ds(0, 1)], sem.at[0]).start()

        @pl.when(i == 0)
        def _():
            halo_ref[0:1, :] = jnp.zeros((1, K), halo_ref.dtype)

        @pl.when(i < num_i - 1)
        def _():
            pltpu.make_async_copy(x_hbm_ref.at[n, pl.ds(r0 + tile_h, 1)],
                                  halo_ref.at[pl.ds(1, 1)], sem.at[1]).start()

        @pl.when(i == num_i - 1)
        def _():
            halo_ref[1:2, :] = jnp.zeros((1, K), halo_ref.dtype)

    def affine_relu_bf16(v):
        if not apply_input_affine:
            return v  # already bf16
        return jnp.maximum(v.astype(jnp.float32) * scale_ref[...]
                           + shift_ref[...], 0.0).astype(jnp.bfloat16)

    # --- main compute on the interior rows (does not need the halos) ---
    xb = affine_relu_bf16(x_blk_ref[0])                            # (tile_h, K) bf16
    z0 = jnp.dot(xb, w_ref[0], preferred_element_type=jnp.float32)  # kh = 0 terms
    z1 = jnp.dot(xb, w_ref[1], preferred_element_type=jnp.float32)  # kh = 1 terms
    z2 = jnp.dot(xb, w_ref[2], preferred_element_type=jnp.float32)  # kh = 2 terms

    if multi_tile:
        @pl.when(i > 0)
        def _():
            pltpu.make_async_copy(x_hbm_ref.at[n, pl.ds(r0 - 1, 1)],
                                  halo_ref.at[pl.ds(0, 1)], sem.at[0]).wait()

        @pl.when(i < num_i - 1)
        def _():
            pltpu.make_async_copy(x_hbm_ref.at[n, pl.ds(r0 + tile_h, 1)],
                                  halo_ref.at[pl.ds(1, 1)], sem.at[1]).wait()

        hb = affine_relu_bf16(halo_ref[...])                        # (2, K)
        top_c = jnp.dot(hb[0:1], w_ref[0], preferred_element_type=jnp.float32)
        bot_c = jnp.dot(hb[1:2], w_ref[2], preferred_element_type=jnp.float32)
        top_c = jnp.where(i > 0, top_c, 0.0)            # zero-pad above the image
        bot_c = jnp.where(i < num_i - 1, bot_c, 0.0)    # zero-pad below the image
    else:
        top_c = jnp.zeros((1, n_out), jnp.float32)
        bot_c = jnp.zeros((1, n_out), jnp.float32)

    # Output row h = z1[h] + z0[h-1] + z2[h+1]  (halo rows fill the two edge slots).
    acc = (z1
           + jnp.concatenate([top_c, z0[:tile_h - 1]], axis=0)
           + jnp.concatenate([z2[1:], bot_c], axis=0))             # (tile_h, n_out) f32

    # per-tile BN partials (f32 row-sums, lane-dense)
    s = jnp.sum(acc, axis=0, keepdims=True)
    ss = jnp.sum(acc * acc, axis=0, keepdims=True)
    stats_ref[...] = jnp.concatenate([s, ss], axis=0)[None, None]

    y_ref[...] = acc[None].astype(y_ref.dtype)


def _conv_stage(x_flat, w_band, scale, shift, *, apply_input_affine, tile_h, cparams):
    """x_flat: (N, H, W*c_in) bf16.  Returns (y (N,H,W*c_out) bf16, stats)."""
    N, H, K = x_flat.shape
    n_out = w_band.shape[-1]
    num_i = H // tile_h
    kernel = functools.partial(_conv_bn_stats_kernel, tile_h=tile_h, num_i=num_i,
                               apply_input_affine=apply_input_affine)
    return pl.pallas_call(
        kernel,
        grid=(N, num_i),
        in_specs=[
            pl.BlockSpec((1, tile_h, K), lambda n, i: (n, i, 0)),    # interior rows
            pl.BlockSpec(memory_space=pl.ANY),                       # halo source (HBM)
            pl.BlockSpec((3, K, n_out), lambda n, i: (0, 0, 0)),     # band weights
            pl.BlockSpec((1, K), lambda n, i: (0, 0)),               # input BN scale
            pl.BlockSpec((1, K), lambda n, i: (0, 0)),               # input BN shift
        ],
        out_specs=(
            pl.BlockSpec((1, tile_h, n_out), lambda n, i: (n, i, 0)),
            pl.BlockSpec((1, 1, 2, n_out), lambda n, i: (n, i, 0, 0)),
        ),
        out_shape=(
            jax.ShapeDtypeStruct((N, H, n_out), jnp.bfloat16),
            jax.ShapeDtypeStruct((N, num_i, 2, n_out), jnp.float32),
        ),
        scratch_shapes=[pltpu.VMEM((2, K), x_flat.dtype),
                        pltpu.SemaphoreType.DMA((2,))],
        compiler_params=cparams,
    )(x_flat, x_flat, w_band, scale, shift)


# ------------------------------------------------------------------------------------
# final BN + ReLU + 2x2 max-pool (dual store)
# ------------------------------------------------------------------------------------
def _bn_relu_pool_kernel(yf_ref, y4_ref, scale_f_ref, shift_f_ref,
                         scale_c_ref, shift_c_ref, full_ref, pool_ref, *,
                         tile_h, W, C):
    # Lane-dense path: BN + ReLU on the flat (tile_h, W*C) view, store `full`.
    af = jnp.maximum(yf_ref[0].astype(jnp.float32) * scale_f_ref[...]
                     + shift_f_ref[...], 0.0)                        # (tile_h, W*C)
    full_ref[...] = af[None].astype(full_ref.dtype)

    # Channel-last path: recompute the (cheap) affine on the (tile_h, W, C) view and
    # 2x2 max-pool with minor-dim-preserving reshapes only.
    sc = scale_c_ref[...].reshape(1, 1, C)
    sh = shift_c_ref[...].reshape(1, 1, C)
    a4 = jnp.maximum(y4_ref[0].astype(jnp.float32) * sc + sh, 0.0)   # (tile_h, W, C)
    aw = jnp.max(a4.reshape(tile_h, W // 2, 2, C), axis=2)           # pool along W
    p = jnp.max(aw.reshape(tile_h // 2, 2, W // 2, C), axis=1)       # pool along H
    pool_ref[...] = p[None].astype(pool_ref.dtype)


def _bn_relu_pool_stage(y_flat, scale_c, shift_c, *, tile_h, W, C, cparams):
    N, H, n_lanes = y_flat.shape
    num_i = H // tile_h
    y_4d = y_flat.reshape(N, H, W, C)          # free view of the same buffer
    scale_f = _tile_lanes(scale_c, W)
    shift_f = _tile_lanes(shift_c, W)
    kernel = functools.partial(_bn_relu_pool_kernel, tile_h=tile_h, W=W, C=C)
    return pl.pallas_call(
        kernel,
        grid=(N, num_i),
        in_specs=[
            pl.BlockSpec((1, tile_h, n_lanes), lambda n, i: (n, i, 0)),
            pl.BlockSpec((1, tile_h, W, C), lambda n, i: (n, i, 0, 0)),
            pl.BlockSpec((1, n_lanes), lambda n, i: (0, 0)),
            pl.BlockSpec((1, n_lanes), lambda n, i: (0, 0)),
            pl.BlockSpec((1, C), lambda n, i: (0, 0)),
            pl.BlockSpec((1, C), lambda n, i: (0, 0)),
        ],
        out_specs=(
            pl.BlockSpec((1, tile_h, n_lanes), lambda n, i: (n, i, 0)),
            pl.BlockSpec((1, tile_h // 2, W // 2, C), lambda n, i: (n, i, 0, 0)),
        ),
        out_shape=(
            jax.ShapeDtypeStruct((N, H, n_lanes), jnp.float32),      # full activation
            jax.ShapeDtypeStruct((N, H // 2, W // 2, C), jnp.float32),
        ),
        compiler_params=cparams,
    )(y_flat, y_4d, scale_f, shift_f, scale_c, shift_c)


# ------------------------------------------------------------------------------------
# wrapper
# ------------------------------------------------------------------------------------
def _bn_scale_shift(stats, gamma, beta, count, W, C):
    """Fold per-tile (row-sum, row-sum-of-squares) partials into the global training-mode
    BN affine (biased variance, eps=1e-5): y*scale + shift.  Returns (1, C) vectors."""
    s_ss = jnp.sum(stats, axis=(0, 1))                   # (2, W*C)
    per_c = jnp.sum(s_ss.reshape(2, W, C), axis=1)       # (2, C)
    mean = per_c[0] / count
    var = per_c[1] / count - mean * mean
    scale = gamma.reshape(-1) * lax.rsqrt(var + EPS)
    shift = beta.reshape(-1) - mean * scale
    return scale.reshape(1, C), shift.reshape(1, C)


def down_block_forward_nhwc(x_nhwc, params, tile_h=None):
    """DownBlock forward in NHWC. Returns (pooled, full) like the PyTorch module."""
    N, H, W, c_in = x_nhwc.shape
    c_out = params["w1"].shape[-1]
    if tile_h is None:
        tile_h = _choose_tile_h(N, H, W, c_in, c_out)
    assert H % tile_h == 0 and tile_h % 2 == 0 and W % 2 == 0
    assert tile_h == H or tile_h % 8 == 0
    cparams = _compiler_params()
    count = N * H * W

    # Lane-dense flattened activations; bf16 interlayer storage.
    x_flat = x_nhwc.astype(jnp.bfloat16).reshape(N, H, W * c_in)
    w1 = _band_weights(params["w1"], W).astype(jnp.bfloat16)
    w2 = _band_weights(params["w2"], W).astype(jnp.bfloat16)
    one = jnp.ones((1, W * c_in), jnp.float32)
    zero = jnp.zeros((1, W * c_in), jnp.float32)

    # conv1 + per-tile BN1 partial stats
    y1, st1 = _conv_stage(x_flat, w1, one, zero,
                          apply_input_affine=False, tile_h=tile_h, cparams=cparams)
    sc1, sh1 = _bn_scale_shift(st1, params["g1"], params["b1"], count, W, c_out)

    # BN1 + ReLU (folded into the input affine) + conv2 + per-tile BN2 partial stats
    y2, st2 = _conv_stage(y1, w2, _tile_lanes(sc1, W), _tile_lanes(sh1, W),
                          apply_input_affine=True, tile_h=tile_h, cparams=cparams)
    sc2, sh2 = _bn_scale_shift(st2, params["g2"], params["b2"], count, W, c_out)

    # BN2 + ReLU + 2x2 max pool, dual store
    full_flat, pooled = _bn_relu_pool_stage(y2, sc2, sh2, tile_h=tile_h, W=W, C=c_out,
                                            cparams=cparams)
    return pooled, full_flat.reshape(N, H, W, c_out)


@functools.partial(jax.jit, static_argnames=("tile_h",))
def down_block_forward(x_nchw, params, tile_h=None):
    """PyTorch-layout wrapper (NCHW in / NCHW out) around the NHWC implementation."""
    x = jnp.transpose(x_nchw, (0, 2, 3, 1))
    pooled, full = down_block_forward_nhwc(x, params, tile_h=tile_h)
    return jnp.transpose(pooled, (0, 3, 1, 2)), jnp.transpose(full, (0, 3, 1, 2))


# ------------------------------------------------------------------------------------
# params / pure-JAX reference
# ------------------------------------------------------------------------------------
def init_block_params(key, in_channels, out_channels):
    k1, k2 = jax.random.split(key)

    def xavier(k, cin, cout):
        fan_in, fan_out = cin * 9, cout * 9
        bound = (6.0 / (fan_in + fan_out)) ** 0.5
        return jax.random.uniform(k, (3, 3, cin, cout), jnp.float32,
                                  minval=-bound, maxval=bound)       # HWIO

    return {
        "w1": xavier(k1, in_channels, out_channels),
        "w2": xavier(k2, out_channels, out_channels),
        "g1": jnp.ones((1, out_channels), jnp.float32),
        "b1": jnp.zeros((1, out_channels), jnp.float32),
        "g2": jnp.ones((1, out_channels), jnp.float32),
        "b2": jnp.zeros((1, out_channels), jnp.float32),
    }


def down_block_reference(x_nchw, params):
    """Pure-JAX reference (training-mode BN, biased variance, no conv bias). Mirrors the
    kernel's precision: bf16 matmul operands / f32 accumulation, bf16 interlayer storage,
    BN statistics computed from the unrounded f32 conv outputs."""
    x = jnp.transpose(x_nchw, (0, 2, 3, 1)).astype(jnp.float32)

    def conv(x, w):
        return lax.conv_general_dilated(
            x.astype(jnp.bfloat16), w.astype(jnp.bfloat16),
            window_strides=(1, 1), padding=((1, 1), (1, 1)),
            dimension_numbers=("NHWC", "HWIO", "NHWC"),
            preferred_element_type=jnp.float32)

    def bn_relu(y, g, b):
        yq = y.astype(jnp.bfloat16).astype(jnp.float32)   # mirror bf16 interlayer store
        mean = jnp.mean(y, axis=(0, 1, 2), keepdims=True)
        var = jnp.mean((y - mean) ** 2, axis=(0, 1, 2), keepdims=True)
        out = (yq - mean) * lax.rsqrt(var + EPS) * g.reshape(1, 1, 1, -1) \
            + b.reshape(1, 1, 1, -1)
        return jnp.maximum(out, 0.0)

    h = bn_relu(conv(x, params["w1"]), params["g1"], params["b1"])
    h = bn_relu(conv(h, params["w2"]), params["g2"], params["b2"])
    pooled = lax.reduce_window(h, -jnp.inf, lax.max,
                               (1, 2, 2, 1), (1, 2, 2, 1), "VALID")
    return jnp.transpose(pooled, (0, 3, 1, 2)), jnp.transpose(h, (0, 3, 1, 2))


# ------------------------------------------------------------------------------------
# main
# ------------------------------------------------------------------------------------
if __name__ == "__main__":
    key = jax.random.PRNGKey(0)
    k_x, k_p = jax.random.split(key)

    N, C_IN, C_OUT, H, W = 2, 4, 8, 16, 16
    x = jax.random.normal(k_x, (N, C_IN, H, W), jnp.float32)
    params = init_block_params(k_p, C_IN, C_OUT)

    pooled, full = down_block_forward(x, params)
    pooled, full = jax.block_until_ready((pooled, full))

    ref_pooled, ref_full = down_block_reference(x, params)
    assert full.shape == (N, C_OUT, H, W), full.shape
    assert pooled.shape == (N, C_OUT, H // 2, W // 2), pooled.shape
    # bf16 matmul operands / interlayer storage => tolerance above pure-f32 roundoff; a
    # band-matrix, halo or per-tile-BN bug would produce O(1e-1..1) errors and be caught.
    assert jnp.allclose(full, ref_full, atol=1e-2, rtol=1e-2), \
        float(jnp.max(jnp.abs(full - ref_full)))
    assert jnp.allclose(pooled, ref_pooled, atol=1e-2, rtol=1e-2), \
        float(jnp.max(jnp.abs(pooled - ref_pooled)))

    print("KERNEL_OK")
</pallas_src>

<mosaic_0001>
module attributes {stable_mosaic.version = 11 : i64} {
  func.func @_conv_bn_stats_kernel(%arg0: i32, %arg1: i32, %arg2: memref<1x16x64xbf16, #tpu.memory_space<vmem>>, %arg3: memref<2x16x64xbf16, #tpu.memory_space<any>>, %arg4: memref<3x64x128xbf16, #tpu.memory_space<vmem>>, %arg5: memref<1x64xf32, #tpu.memory_space<vmem>>, %arg6: memref<1x64xf32, #tpu.memory_space<vmem>>, %arg7: memref<1x16x128xbf16, #tpu.memory_space<vmem>>, %arg8: memref<1x1x2x128xf32, #tpu.memory_space<vmem>>, %arg9: memref<2x64xbf16, #tpu.memory_space<vmem>>, %arg10: memref<2x!tpu.dma_semaphore, #tpu.memory_space<semaphore_mem>>) attributes {dimension_semantics = [#tpu.dimension_semantics<parallel>, #tpu.dimension_semantics<parallel>], iteration_bounds = array<i64: 2, 1>, scalar_prefetch = 0 : i64, scratch_operands = 2 : i64, tpu.core_type = #tpu.core_type<tc>, window_params = [{transform_indices = @transform_0, window_bounds = array<i64: 1, 16, 64>}, {}, {pipeline_mode = #tpu.pipeline_mode<synchronous>, transform_indices = @transform_2, window_bounds = array<i64: 3, 64, 128>}, {pipeline_mode = #tpu.pipeline_mode<synchronous>, transform_indices = @transform_3, window_bounds = array<i64: 1, 64>}, {pipeline_mode = #tpu.pipeline_mode<synchronous>, transform_indices = @transform_4, window_bounds = array<i64: 1, 64>}, {transform_indices = @transform_5, window_bounds = array<i64: 1, 16, 128>}, {transform_indices = @transform_6, window_bounds = array<i64: 1, 1, 2, 128>}]} {
    %c0 = arith.constant 0 : index
    %c0_0 = arith.constant 0 : index
    %c0_1 = arith.constant 0 : index
    %0 = vector.load %arg2[%c0, %c0_0, %c0_1] : memref<1x16x64xbf16, #tpu.memory_space<vmem>>, vector<1x16x64xbf16>
    %1 = vector.shape_cast %0 : vector<1x16x64xbf16> to vector<16x64xbf16>
    %c0_2 = arith.constant 0 : index
    %c0_3 = arith.constant 0 : index
    %c0_4 = arith.constant 0 : index
    %2 = vector.load %arg4[%c0_2, %c0_3, %c0_4] : memref<3x64x128xbf16, #tpu.memory_space<vmem>>, vector<1x64x128xbf16>
    %3 = vector.shape_cast %2 : vector<1x64x128xbf16> to vector<64x128xbf16>
    %cst = arith.constant dense<0.000000e+00> : vector<16x128xf32>
    %4 = tpu.matmul %1, %3, %cst {dimension_numbers = #tpu.dot_dimension_numbers<[1], [0], [0], [1], [0, 0, 1, 1], [], []>} : vector<16x64xbf16>, vector<64x128xbf16>, vector<16x128xf32> -> vector<16x128xf32>
    %c1 = arith.constant 1 : index
    %c0_5 = arith.constant 0 : index
    %c0_6 = arith.constant 0 : index
    %5 = vector.load %arg4[%c1, %c0_5, %c0_6] : memref<3x64x128xbf16, #tpu.memory_space<vmem>>, vector<1x64x128xbf16>
    %6 = vector.shape_cast %5 : vector<1x64x128xbf16> to vector<64x128xbf16>
    %cst_7 = arith.constant dense<0.000000e+00> : vector<16x128xf32>
    %7 = tpu.matmul %1, %6, %cst_7 {dimension_numbers = #tpu.dot_dimension_numbers<[1], [0], [0], [1], [0, 0, 1, 1], [], []>} : vector<16x64xbf16>, vector<64x128xbf16>, vector<16x128xf32> -> vector<16x128xf32>
    %c2 = arith.constant 2 : index
    %c0_8 = arith.constant 0 : index
    %c0_9 = arith.constant 0 : index
    %8 = vector.load %arg4[%c2, %c0_8, %c0_9] : memref<3x64x128xbf16, #tpu.memory_space<vmem>>, vector<1x64x128xbf16>
    %9 = vector.shape_cast %8 : vector<1x64x128xbf16> to vector<64x128xbf16>
    %cst_10 = arith.constant dense<0.000000e+00> : vector<16x128xf32>
    %10 = tpu.matmul %1, %9, %cst_10 {dimension_numbers = #tpu.dot_dimension_numbers<[1], [0], [0], [1], [0, 0, 1, 1], [], []>} : vector<16x64xbf16>, vector<64x128xbf16>, vector<16x128xf32> -> vector<16x128xf32>
    %cst_11 = arith.constant 0.000000e+00 : f32
    %11 = vector.broadcast %cst_11 : f32 to vector<1x128xf32>
    %cst_12 = arith.constant 0.000000e+00 : f32
    %12 = vector.broadcast %cst_12 : f32 to vector<1x128xf32>
    %13 = vector.extract_strided_slice %4 {offsets = [0, 0], sizes = [15, 128], strides = [1, 1]} : vector<16x128xf32> to vector<15x128xf32>
    %14 = tpu.concatenate %11, %13 in 0 : vector<1x128xf32>, vector<15x128xf32> -> vector<16x128xf32>
    %15 = arith.addf %7, %14 : vector<16x128xf32>
    %16 = vector.extract_strided_slice %10 {offsets = [1, 0], sizes = [15, 128], strides = [1, 1]} : vector<16x128xf32> to vector<15x128xf32>
    %17 = tpu.concatenate %16, %12 in 0 : vector<15x128xf32>, vector<1x128xf32> -> vector<16x128xf32>
    %18 = arith.addf %15, %17 : vector<16x128xf32>
    %cst_13 = arith.constant dense<0.000000e+00> : vector<128xf32>
    %19 = vector.multi_reduction <add>, %18, %cst_13 [0] : vector<16x128xf32> to vector<128xf32>
    %20 = vector.shape_cast %19 : vector<128xf32> to vector<1x128xf32>
    %21 = arith.mulf %18, %18 : vector<16x128xf32>
    %cst_14 = arith.constant dense<0.000000e+00> : vector<128xf32>
    %22 = vector.multi_reduction <add>, %21, %cst_14 [0] : vector<16x128xf32> to vector<128xf32>
    %23 = vector.shape_cast %22 : vector<128xf32> to vector<1x128xf32>
    %24 = tpu.concatenate %20, %23 in 0 : vector<1x128xf32>, vector<1x128xf32> -> vector<2x128xf32>
    %25 = vector.shape_cast %24 : vector<2x128xf32> to vector<1x1x2x128xf32>
    %c0_15 = arith.constant 0 : index
    %c0_16 = arith.constant 0 : index
    %c0_17 = arith.constant 0 : index
    %c0_18 = arith.constant 0 : index
    %26 = vector.load %arg8[%c0_15, %c0_16, %c0_17, %c0_18] : memref<1x1x2x128xf32, #tpu.memory_space<vmem>>, vector<1x1x2x128xf32>
    tpu.vector_store %arg8[%c0_15, %c0_16, %c0_17, %c0_18], %25 {strides = array<i32>} : memref<1x1x2x128xf32, #tpu.memory_space<vmem>>, vector<1x1x2x128xf32>,
    %27 = vector.shape_cast %18 : vector<16x128xf32> to vector<1x16x128xf32>
    %28 = arith.truncf %27 : vector<1x16x128xf32> to vector<1x16x128xbf16>
    %c0_19 = arith.constant 0 : index
    %c0_20 = arith.constant 0 : index
    %c0_21 = arith.constant 0 : index
    %29 = vector.load %arg7[%c0_19, %c0_20, %c0_21] : memref<1x16x128xbf16, #tpu.memory_space<vmem>>, vector<1x16x128xbf16>
    tpu.vector_store %arg7[%c0_19, %c0_20, %c0_21], %28 {strides = array<i32>} : memref<1x16x128xbf16, #tpu.memory_space<vmem>>, vector<1x16x128xbf16>,
    return
  }
  func.func @transform_0(%arg0: i32, %arg1: i32) -> (i32, i32, i32) {
    %c0_i32 = arith.constant 0 : i32
    %c0_i32_0 = arith.constant 0 : i32
    return %arg0, %arg1, %c0_i32 : i32, i32, i32
  }
  func.func @transform_2(%arg0: i32, %arg1: i32) -> (i32, i32, i32) {
    %c0_i32 = arith.constant 0 : i32
    %c0_i32_0 = arith.constant 0 : i32
    %c0_i32_1 = arith.constant 0 : i32
    %c0_i32_2 = arith.constant 0 : i32
    return %c0_i32, %c0_i32_0, %c0_i32_1 : i32, i32, i32
  }
  func.func @transform_3(%arg0: i32, %arg1: i32) -> (i32, i32) {
    %c0_i32 = arith.constant 0 : i32
    %c0_i32_0 = arith.constant 0 : i32
    %c0_i32_1 = arith.constant 0 : i32
    return %c0_i32, %c0_i32_0 : i32, i32
  }
  func.func @transform_4(%arg0: i32, %arg1: i32) -> (i32, i32) {
    %c0_i32 = arith.constant 0 : i32
    %c0_i32_0 = arith.constant 0 : i32
    %c0_i32_1 = arith.constant 0 : i32
    return %c0_i32, %c0_i32_0 : i32, i32
  }
  func.func @transform_5(%arg0: i32, %arg1: i32) -> (i32, i32, i32) {
    %c0_i32 = arith.constant 0 : i32
    %c0_i32_0 = arith.constant 0 : i32
    return %arg0, %arg1, %c0_i32 : i32, i32, i32
  }
  func.func @transform_6(%arg0: i32, %arg1: i32) -> (i32, i32, i32, i32) {
    %c0_i32 = arith.constant 0 : i32
    %c0_i32_0 = arith.constant 0 : i32
    %c0_i32_1 = arith.constant 0 : i32
    return %arg0, %arg1, %c0_i32, %c0_i32_0 : i32, i32, i32, i32
  }
}

module attributes {stable_mosaic.version = 11 : i64} {
  func.func @_conv_bn_stats_kernel(%arg0: i32, %arg1: i32, %arg2: memref<1x16x128xbf16, #tpu.memory_space<vmem>>, %arg3: memref<2x16x128xbf16, #tpu.memory_space<any>>, %arg4: memref<3x128x128xbf16, #tpu.memory_space<vmem>>, %arg5: memref<1x128xf32, #tpu.memory_space<vmem>>, %arg6: memref<1x128xf32, #tpu.memory_space<vmem>>, %arg7: memref<1x16x128xbf16, #tpu.memory_space<vmem>>, %arg8: memref<1x1x2x128xf32, #tpu.memory_space<vmem>>, %arg9: memref<2x128xbf16, #tpu.memory_space<vmem>>, %arg10: memref<2x!tpu.dma_semaphore, #tpu.memory_space<semaphore_mem>>) attributes {dimension_semantics = [#tpu.dimension_semantics<parallel>, #tpu.dimension_semantics<parallel>], iteration_bounds = array<i64: 2, 1>, scalar_prefetch = 0 : i64, scratch_operands = 2 : i64, tpu.core_type = #tpu.core_type<tc>, window_params = [{transform_indices = @transform_0, window_bounds = array<i64: 1, 16, 128>}, {}, {pipeline_mode = #tpu.pipeline_mode<synchronous>, transform_indices = @transform_2, window_bounds = array<i64: 3, 128, 128>}, {pipeline_mode = #tpu.pipeline_mode<synchronous>, transform_indices = @transform_3, window_bounds = array<i64: 1, 128>}, {pipeline_mode = #tpu.pipeline_mode<synchronous>, transform_indices = @transform_4, window_bounds = array<i64: 1, 128>}, {transform_indices = @transform_5, window_bounds = array<i64: 1, 16, 128>}, {transform_indices = @transform_6, window_bounds = array<i64: 1, 1, 2, 128>}]} {
    %c0 = arith.constant 0 : index
    %c0_0 = arith.constant 0 : index
    %c0_1 = arith.constant 0 : index
    %0 = vector.load %arg2[%c0, %c0_0, %c0_1] : memref<1x16x128xbf16, #tpu.memory_space<vmem>>, vector<1x16x128xbf16>
    %1 = vector.shape_cast %0 : vector<1x16x128xbf16> to vector<16x128xbf16>
    %2 = arith.extf %1 : vector<16x128xbf16> to vector<16x128xf32>
    %c0_2 = arith.constant 0 : index
    %c0_3 = arith.constant 0 : index
    %3 = vector.load %arg5[%c0_2, %c0_3] : memref<1x128xf32, #tpu.memory_space<vmem>>, vector<1x128xf32>
    %4 = vector.broadcast %3 : vector<1x128xf32> to vector<16x128xf32>
    %5 = arith.mulf %2, %4 : vector<16x128xf32>
    %c0_4 = arith.constant 0 : index
    %c0_5 = arith.constant 0 : index
    %6 = vector.load %arg6[%c0_4, %c0_5] : memref<1x128xf32, #tpu.memory_space<vmem>>, vector<1x128xf32>
    %7 = vector.broadcast %6 : vector<1x128xf32> to vector<16x128xf32>
    %8 = arith.addf %5, %7 : vector<16x128xf32>
    %cst = arith.constant 0.000000e+00 : f32
    %9 = vector.broadcast %cst : f32 to vector<16x128xf32>
    %10 = arith.maximumf %8, %9 : vector<16x128xf32>
    %11 = arith.truncf %10 : vector<16x128xf32> to vector<16x128xbf16>
    %c0_6 = arith.constant 0 : index
    %c0_7 = arith.constant 0 : index
    %c0_8 = arith.constant 0 : index
    %12 = vector.load %arg4[%c0_6, %c0_7, %c0_8] : memref<3x128x128xbf16, #tpu.memory_space<vmem>>, vector<1x128x128xbf16>
    %13 = vector.shape_cast %12 : vector<1x128x128xbf16> to vector<128x128xbf16>
    %cst_9 = arith.constant dense<0.000000e+00> : vector<16x128xf32>
    %14 = tpu.matmul %11, %13, %cst_9 {dimension_numbers = #tpu.dot_dimension_numbers<[1], [0], [0], [1], [0, 0, 1, 1], [], []>} : vector<16x128xbf16>, vector<128x128xbf16>, vector<16x128xf32> -> vector<16x128xf32>
    %c1 = arith.constant 1 : index
    %c0_10 = arith.constant 0 : index
    %c0_11 = arith.constant 0 : index
    %15 = vector.load %arg4[%c1, %c0_10, %c0_11] : memref<3x128x128xbf16, #tpu.memory_space<vmem>>, vector<1x128x128xbf16>
    %16 = vector.shape_cast %15 : vector<1x128x128xbf16> to vector<128x128xbf16>
    %cst_12 = arith.constant dense<0.000000e+00> : vector<16x128xf32>
    %17 = tpu.matmul %11, %16, %cst_12 {dimension_numbers = #tpu.dot_dimension_numbers<[1], [0], [0], [1], [0, 0, 1, 1], [], []>} : vector<16x128xbf16>, vector<128x128xbf16>, vector<16x128xf32> -> vector<16x128xf32>
    %c2 = arith.constant 2 : index
    %c0_13 = arith.constant 0 : index
    %c0_14 = arith.constant 0 : index
    %18 = vector.load %arg4[%c2, %c0_13, %c0_14] : memref<3x128x128xbf16, #tpu.memory_space<vmem>>, vector<1x128x128xbf16>
    %19 = vector.shape_cast %18 : vector<1x128x128xbf16> to vector<128x128xbf16>
    %cst_15 = arith.constant dense<0.000000e+00> : vector<16x128xf32>
    %20 = tpu.matmul %11, %19, %cst_15 {dimension_numbers = #tpu.dot_dimension_numbers<[1], [0], [0], [1], [0, 0, 1, 1], [], []>} : vector<16x128xbf16>, vector<128x128xbf16>, vector<16x128xf32> -> vector<16x128xf32>
    %cst_16 = arith.constant 0.000000e+00 : f32
    %21 = vector.broadcast %cst_16 : f32 to vector<1x128xf32>
    %cst_17 = arith.constant 0.000000e+00 : f32
    %22 = vector.broadcast %cst_17 : f32 to vector<1x128xf32>
    %23 = vector.extract_strided_slice %14 {offsets = [0, 0], sizes = [15, 128], strides = [1, 1]} : vector<16x128xf32> to vector<15x128xf32>
    %24 = tpu.concatenate %21, %23 in 0 : vector<1x128xf32>, vector<15x128xf32> -> vector<16x128xf32>
    %25 = arith.addf %17, %24 : vector<16x128xf32>
    %26 = vector.extract_strided_slice %20 {offsets = [1, 0], sizes = [15, 128], strides = [1, 1]} : vector<16x128xf32> to vector<15x128xf32>
    %27 = tpu.concatenate %26, %22 in 0 : vector<15x128xf32>, vector<1x128xf32> -> vector<16x128xf32>
    %28 = arith.addf %25, %27 : vector<16x128xf32>
    %cst_18 = arith.constant dense<0.000000e+00> : vector<128xf32>
    %29 = vector.multi_reduction <add>, %28, %cst_18 [0] : vector<16x128xf32> to vector<128xf32>
    %30 = vector.shape_cast %29 : vector<128xf32> to vector<1x128xf32>
    %31 = arith.mulf %28, %28 : vector<16x128xf32>
    %cst_19 = arith.constant dense<0.000000e+00> : vector<128xf32>
    %32 = vector.multi_reduction <add>, %31, %cst_19 [0] : vector<16x128xf32> to vector<128xf32>
    %33 = vector.shape_cast %32 : vector<128xf32> to vector<1x128xf32>
    %34 = tpu.concatenate %30, %33 in 0 : vector<1x128xf32>, vector<1x128xf32> -> vector<2x128xf32>
    %35 = vector.shape_cast %34 : vector<2x128xf32> to vector<1x1x2x128xf32>
    %c0_20 = arith.constant 0 : index
    %c0_21 = arith.constant 0 : index
    %c0_22 = arith.constant 0 : index
    %c0_23 = arith.constant 0 : index
    %36 = vector.load %arg8[%c0_20, %c0_21, %c0_22, %c0_23] : memref<1x1x2x128xf32, #tpu.memory_space<vmem>>, vector<1x1x2x128xf32>
    tpu.vector_store %arg8[%c0_20, %c0_21, %c0_22, %c0_23], %35 {strides = array<i32>} : memref<1x1x2x128xf32, #tpu.memory_space<vmem>>, vector<1x1x2x128xf32>,
    %37 = vector.shape_cast %28 : vector<16x128xf32> to vector<1x16x128xf32>
    %38 = arith.truncf %37 : vector<1x16x128xf32> to vector<1x16x128xbf16>
    %c0_24 = arith.constant 0 : index
    %c0_25 = arith.constant 0 : index
    %c0_26 = arith.constant 0 : index
    %39 = vector.load %arg7[%c0_24, %c0_25, %c0_26] : memref<1x16x128xbf16, #tpu.memory_space<vmem>>, vector<1x16x128xbf16>
    tpu.vector_store %arg7[%c0_24, %c0_25, %c0_26], %38 {strides = array<i32>} : memref<1x16x128xbf16, #tpu.memory_space<vmem>>, vector<1x16x128xbf16>,
    return
  }
  func.func @transform_0(%arg0: i32, %arg1: i32) -> (i32, i32, i32) {
    %c0_i32 = arith.constant 0 : i32
    %c0_i32_0 = arith.constant 0 : i32
    return %arg0, %arg1, %c0_i32 : i32, i32, i32
  }
  func.func @transform_2(%arg0: i32, %arg1: i32) -> (i32, i32, i32) {
    %c0_i32 = arith.constant 0 : i32
    %c0_i32_0 = arith.constant 0 : i32
    %c0_i32_1 = arith.constant 0 : i32
    %c0_i32_2 = arith.constant 0 : i32
    return %c0_i32, %c0_i32_0, %c0_i32_1 : i32, i32, i32
  }
  func.func @transform_3(%arg0: i32, %arg1: i32) -> (i32, i32) {
    %c0_i32 = arith.constant 0 : i32
    %c0_i32_0 = arith.constant 0 : i32
    %c0_i32_1 = arith.constant 0 : i32
    return %c0_i32, %c0_i32_0 : i32, i32
  }
  func.func @transform_4(%arg0: i32, %arg1: i32) -> (i32, i32) {
    %c0_i32 = arith.constant 0 : i32
    %c0_i32_0 = arith.constant 0 : i32
    %c0_i32_1 = arith.constant 0 : i32
    return %c0_i32, %c0_i32_0 : i32, i32
  }
  func.func @transform_5(%arg0: i32, %arg1: i32) -> (i32, i32, i32) {
    %c0_i32 = arith.constant 0 : i32
    %c0_i32_0 = arith.constant 0 : i32
    return %arg0, %arg1, %c0_i32 : i32, i32, i32
  }
  func.func @transform_6(%arg0: i32, %arg1: i32) -> (i32, i32, i32, i32) {
    %c0_i32 = arith.constant 0 : i32
    %c0_i32_0 = arith.constant 0 : i32
    %c0_i32_1 = arith.constant 0 : i32
    return %arg0, %arg1, %c0_i32, %c0_i32_0 : i32, i32, i32, i32
  }
}

module attributes {stable_mosaic.version = 11 : i64} {
  func.func @_bn_relu_pool_kernel(%arg0: i32, %arg1: i32, %arg2: memref<1x16x128xbf16, #tpu.memory_space<vmem>>, %arg3: memref<1x16x16x8xbf16, #tpu.memory_space<vmem>>, %arg4: memref<1x128xf32, #tpu.memory_space<vmem>>, %arg5: memref<1x128xf32, #tpu.memory_space<vmem>>, %arg6: memref<1x8xf32, #tpu.memory_space<vmem>>, %arg7: memref<1x8xf32, #tpu.memory_space<vmem>>, %arg8: memref<1x16x128xf32, #tpu.memory_space<vmem>>, %arg9: memref<1x8x8x8xf32, #tpu.memory_space<vmem>>) attributes {dimension_semantics = [#tpu.dimension_semantics<parallel>, #tpu.dimension_semantics<parallel>], iteration_bounds = array<i64: 2, 1>, scalar_prefetch = 0 : i64, scratch_operands = 0 : i64, tpu.core_type = #tpu.core_type<tc>, window_params = [{transform_indices = @transform_0, window_bounds = array<i64: 1, 16, 128>}, {transform_indices = @transform_1, window_bounds = array<i64: 1, 16, 16, 8>}, {pipeline_mode = #tpu.pipeline_mode<synchronous>, transform_indices = @transform_2, window_bounds = array<i64: 1, 128>}, {pipeline_mode = #tpu.pipeline_mode<synchronous>, transform_indices = @transform_3, window_bounds = array<i64: 1, 128>}, {pipeline_mode = #tpu.pipeline_mode<synchronous>, transform_indices = @transform_4, window_bounds = array<i64: 1, 8>}, {pipeline_mode = #tpu.pipeline_mode<synchronous>, transform_indices = @transform_5, window_bounds = array<i64: 1, 8>}, {transform_indices = @transform_6, window_bounds = array<i64: 1, 16, 128>}, {transform_indices = @transform_7, window_bounds = array<i64: 1, 8, 8, 8>}]} {
    %c0 = arith.constant 0 : index
    %c0_0 = arith.constant 0 : index
    %c0_1 = arith.constant 0 : index
    %0 = vector.load %arg2[%c0, %c0_0, %c0_1] : memref<1x16x128xbf16, #tpu.memory_space<vmem>>, vector<1x16x128xbf16>
    %1 = vector.shape_cast %0 : vector<1x16x128xbf16> to vector<16x128xbf16>
    %2 = arith.extf %1 : vector<16x128xbf16> to vector<16x128xf32>
    %c0_2 = arith.constant 0 : index
    %c0_3 = arith.constant 0 : index
    %3 = vector.load %arg4[%c0_2, %c0_3] : memref<1x128xf32, #tpu.memory_space<vmem>>, vector<1x128xf32>
    %4 = vector.broadcast %3 : vector<1x128xf32> to vector<16x128xf32>
    %5 = arith.mulf %2, %4 : vector<16x128xf32>
    %c0_4 = arith.constant 0 : index
    %c0_5 = arith.constant 0 : index
    %6 = vector.load %arg5[%c0_4, %c0_5] : memref<1x128xf32, #tpu.memory_space<vmem>>, vector<1x128xf32>
    %7 = vector.broadcast %6 : vector<1x128xf32> to vector<16x128xf32>
    %8 = arith.addf %5, %7 : vector<16x128xf32>
    %cst = arith.constant 0.000000e+00 : f32
    %9 = vector.broadcast %cst : f32 to vector<16x128xf32>
    %10 = arith.maximumf %8, %9 : vector<16x128xf32>
    %11 = vector.shape_cast %10 : vector<16x128xf32> to vector<1x16x128xf32>
    %c0_6 = arith.constant 0 : index
    %c0_7 = arith.constant 0 : index
    %c0_8 = arith.constant 0 : index
    %12 = vector.load %arg8[%c0_6, %c0_7, %c0_8] : memref<1x16x128xf32, #tpu.memory_space<vmem>>, vector<1x16x128xf32>
    tpu.vector_store %arg8[%c0_6, %c0_7, %c0_8], %11 {strides = array<i32>} : memref<1x16x128xf32, #tpu.memory_space<vmem>>, vector<1x16x128xf32>,
    %c0_9 = arith.constant 0 : index
    %c0_10 = arith.constant 0 : index
    %13 = vector.load %arg6[%c0_9, %c0_10] : memref<1x8xf32, #tpu.memory_space<vmem>>, vector<1x8xf32>
    %14 = vector.shape_cast %13 : vector<1x8xf32> to vector<1x1x8xf32>
    %c0_11 = arith.constant 0 : index
    %c0_12 = arith.constant 0 : index
    %15 = vector.load %arg7[%c0_11, %c0_12] : memref<1x8xf32, #tpu.memory_space<vmem>>, vector<1x8xf32>
    %16 = vector.shape_cast %15 : vector<1x8xf32> to vector<1x1x8xf32>
    %c0_13 = arith.constant 0 : index
    %c0_14 = arith.constant 0 : index
    %c0_15 = arith.constant 0 : index
    %c0_16 = arith.constant 0 : index
    %17 = vector.load %arg3[%c0_13, %c0_14, %c0_15, %c0_16] : memref<1x16x16x8xbf16, #tpu.memory_space<vmem>>, vector<1x16x16x8xbf16>
    %18 = vector.shape_cast %17 : vector<1x16x16x8xbf16> to vector<16x16x8xbf16>
    %19 = arith.extf %18 : vector<16x16x8xbf16> to vector<16x16x8xf32>
    %20 = vector.broadcast %14 : vector<1x1x8xf32> to vector<16x16x8xf32>
    %21 = arith.mulf %19, %20 : vector<16x16x8xf32>
    %22 = vector.broadcast %16 : vector<1x1x8xf32> to vector<16x16x8xf32>
    %23 = arith.addf %21, %22 : vector<16x16x8xf32>
    %cst_17 = arith.constant 0.000000e+00 : f32
    %24 = vector.broadcast %cst_17 : f32 to vector<16x16x8xf32>
    %25 = arith.maximumf %23, %24 : vector<16x16x8xf32>
    %26 = vector.shape_cast %25 : vector<16x16x8xf32> to vector<16x8x2x8xf32>
    %cst_18 = arith.constant dense<0xFF800000> : vector<16x8x8xf32>
    %27 = vector.multi_reduction <maximumf>, %26, %cst_18 [2] : vector<16x8x2x8xf32> to vector<16x8x8xf32>
    %28 = vector.shape_cast %27 : vector<16x8x8xf32> to vector<8x2x8x8xf32>
    %cst_19 = arith.constant dense<0xFF800000> : vector<8x8x8xf32>
    %29 = vector.multi_reduction <maximumf>, %28, %cst_19 [1] : vector<8x2x8x8xf32> to vector<8x8x8xf32>
    %30 = vector.shape_cast %29 : vector<8x8x8xf32> to vector<1x8x8x8xf32>
    %c0_20 = arith.constant 0 : index
    %c0_21 = arith.constant 0 : index
    %c0_22 = arith.constant 0 : index
    %c0_23 = arith.constant 0 : index
    %31 = vector.load %arg9[%c0_20, %c0_21, %c0_22, %c0_23] : memref<1x8x8x8xf32, #tpu.memory_space<vmem>>, vector<1x8x8x8xf32>
    tpu.vector_store %arg9[%c0_20, %c0_21, %c0_22, %c0_23], %30 {strides = array<i32>} : memref<1x8x8x8xf32, #tpu.memory_space<vmem>>, vector<1x8x8x8xf32>,
    return
  }
  func.func @transform_0(%arg0: i32, %arg1: i32) -> (i32, i32, i32) {
    %c0_i32 = arith.constant 0 : i32
    %c0_i32_0 = arith.constant 0 : i32
    return %arg0, %arg1, %c0_i32 : i32, i32, i32
  }
  func.func @transform_1(%arg0: i32, %arg1: i32) -> (i32, i32, i32, i32) {
    %c0_i32 = arith.constant 0 : i32
    %c0_i32_0 = arith.constant 0 : i32
    %c0_i32_1 = arith.constant 0 : i32
    return %arg0, %arg1, %c0_i32, %c0_i32_0 : i32, i32, i32, i32
  }
  func.func @transform_2(%arg0: i32, %arg1: i32) -> (i32, i32) {
    %c0_i32 = arith.constant 0 : i32
    %c0_i32_0 = arith.constant 0 : i32
    %c0_i32_1 = arith.constant 0 : i32
    return %c0_i32, %c0_i32_0 : i32, i32
  }
  func.func @transform_3(%arg0: i32, %arg1: i32) -> (i32, i32) {
    %c0_i32 = arith.constant 0 : i32
    %c0_i32_0 = arith.constant 0 : i32
    %c0_i32_1 = arith.constant 0 : i32
    return %c0_i32, %c0_i32_0 : i32, i32
  }
  func.func @transform_4(%arg0: i32, %arg1: i32) -> (i32, i32) {
    %c0_i32 = arith.constant 0 : i32
    %c0_i32_0 = arith.constant 0 : i32
    %c0_i32_1 = arith.constant 0 : i32
    return %c0_i32, %c0_i32_0 : i32, i32
  }
  func.func @transform_5(%arg0: i32, %arg1: i32) -> (i32, i32) {
    %c0_i32 = arith.constant 0 : i32
    %c0_i32_0 = arith.constant 0 : i32
    %c0_i32_1 = arith.constant 0 : i32
    return %c0_i32, %c0_i32_0 : i32, i32
  }
  func.func @transform_6(%arg0: i32, %arg1: i32) -> (i32, i32, i32) {
    %c0_i32 = arith.constant 0 : i32
    %c0_i32_0 = arith.constant 0 : i32
    return %arg0, %arg1, %c0_i32 : i32, i32, i32
  }
  func.func @transform_7(%arg0: i32, %arg1: i32) -> (i32, i32, i32, i32) {
    %c0_i32 = arith.constant 0 : i32
    %c0_i32_0 = arith.constant 0 : i32
    %c0_i32_1 = arith.constant 0 : i32
    return %arg0, %arg1, %c0_i32, %c0_i32_0 : i32, i32, i32, i32
  }
}

</mosaic_0001>

<bundles_post_ra>
// kernel: tile.18
= control target key start
LH: loop header
LB: loop body
LE: loop exit
PB: predicated region body
PF: predicated region fallthrough
CT: control target
= control target key end

     0   :  { %s28_s0 = inlined_call_operand.vmem [shape: f32[8], index: 0, kind: input, shape index: {}]   ;;  %s29_s1 = inlined_call_operand.vmem [shape: f32[16,8], index: 1, kind: output, shape index: {}]  }
   0x1   :  { %v4_v0 = vld [vmem:[%s28_s0] ss:$0 sm:$0xff] }
   0x2   :  { %5 = vst [vmem:[%s29_s1] sm:$0xff] %v4_v0  ;;  %8 = vst [vmem:[%s29_s1 + $0x8] sm:$0xff] %v4_v0 }

// kernel: tile.19
= control target key start
LH: loop header
LB: loop body
LE: loop exit
PB: predicated region body
PF: predicated region fallthrough
CT: control target
= control target key end

     0   :  { %s131_s10 = smov 120   ;;  %s132_s11 = smov 104   ;;  %vm3_vm0 = vcmask 64512   ;;  %vm9_vm1 = vcmask 1048512   ;;  %vm15_vm2 = vcmask 982912   ;;  %vm21_vm3 = vcmask 917312   ;;  %s207_s0 = inlined_call_operand.vmem [shape: f32[16,8], index: 0, kind: input, shape index: {}]   ;;  %s208_s1 = inlined_call_operand.vmem [shape: f32[1,128], index: 1, kind: output, shape index: {}]  }
   0x1   :  { %v101_v0 = vld [vmem:[%s207_s0 + $0xf] sm:$0x1]   ;;  %v103_v1 = vld [vmem:[%s207_s0 + $0xd] sm:$0x1]   ;;  %v102_v2 = vld [vmem:[%s207_s0 + $0xe] sm:$0x1]  }
   0x2   :  { %7 = vrot.lane.b32.xlu0 %v101_v0, %s131_s10  ;;  %19 = vrot.lane.b32.xlu1 %v103_v1, %s132_s11  ;;  %v104_v3 = vld [vmem:[%s207_s0 + $0xc] sm:$0x1]   ;;  %s133_s16 = smov 112   ;;  %s134_s17 = smov 96   ;;  %v105_v4 = vld [vmem:[%s207_s0 + $0xb] sm:$0x1]  }
   0x3   :  { %v106_v5 = vld [vmem:[%s207_s0 + $0xa] sm:$0x1]   ;;  %v2_v6 = vld [vmem:[%s207_s0] sm:$0x1]   ;;  %s135_s24 = smov 88   ;;  %s136_s25 = smov 80  }
   0x4   :  { %4 = vst.msk [vmem:[#allocation0] sm:$0x1] %vm3_vm0, %v2_v6   ;;  %v107_v7 = vld [vmem:[%s207_s0 + $0x9] sm:$0x1]   ;;  %v108_v8 = vld [vmem:[%s207_s0 + $0x8] sm:$0x1]  }
   0x5   :  { %s137_s30 = smov 72   ;;  %s138_s2 = smov 64   ;;  %v109_v9 = vld [vmem:[%s207_s0 + $0x7] sm:$0x1]   ;;  %v110_v10 = vld [vmem:[%s207_s0 + $0x6] sm:$0x1]  }
   0x6   :  { %13 = vrot.lane.b32.xlu0 %v102_v2, %s133_s16  ;;  %25 = vrot.lane.b32.xlu1 %v104_v3, %s134_s17  ;;  %s139_s7 = smov 56   ;;  %s140_s8 = smov 48   ;;  %v111_v11 = vld [vmem:[%s207_s0 + $0x5] sm:$0x1]   ;;  %v112_v12 = vld [vmem:[%s207_s0 + $0x4] sm:$0x1]  }
   0x7   :  { %s141_s13 = smov 40   ;;  %s142_s14 = smov 32   ;;  %v113_v13 = vld [vmem:[%s207_s0 + $0x3] sm:$0x1]   ;;  %v114_v14 = vld [vmem:[%s207_s0 + $0x2] sm:$0x1]  }
   0x8   :  { %s143_s19 = smov 24   ;;  %s144_s20 = smov 16   ;;  %v115_v15 = vld [vmem:[%s207_s0 + $0x1] sm:$0x1]   ;;  %vm27_vm4 = vcmask 851712   ;;  %vm33_vm5 = vcmask 786112  }
   0x9   :  { %s145_s0 = smov 8   ;;  %vm39_vm6 = vcmask 720512   ;;  %vm45_vm7 = vcmask 654912   ;;  %vm51_vm8 = vcmask 589312   ;;  %vm57_vm9 = vcmask 523712  }
   0xa   :  { %31 = vrot.lane.b32.xlu0 %v105_v4, %s135_s24  ;;  %37 = vrot.lane.b32.xlu1 %v106_v5, %s136_s25  ;;  %vm63_vm10 = vcmask 458112   ;;  %vm69_vm11 = vcmask 392512   ;;  %vm75_vm12 = vcmask 326912   ;;  %vm81_vm13 = vcmask 261312  }
   0xb   :  { %vm87_vm14 = vcmask 195712   ;;  %vm93_vm15 = vcmask 130112  }
   0xe   :  { %43 = vrot.lane.b32.xlu0 %v107_v7, %s137_s30  ;;  %49 = vrot.lane.b32.xlu1 %v108_v8, %s138_s2 }
  0x12   :  { %55 = vrot.lane.b32.xlu0 %v109_v9, %s139_s7  ;;  %61 = vrot.lane.b32.xlu1 %v110_v10, %s140_s8 }
  0x16   :  { %67 = vrot.lane.b32.xlu0 %v111_v11, %s141_s13  ;;  %73 = vrot.lane.b32.xlu1 %v112_v12, %s142_s14 }
  0x1a   :  { %79 = vrot.lane.b32.xlu0 %v113_v13, %s143_s19  ;;  %85 = vrot.lane.b32.xlu1 %v114_v14, %s144_s20 }
  0x1e   :  { %91 = vrot.lane.b32.xlu0 %v115_v15, %s145_s0 }
  0x74   :  { %v8_v16 = vpop.permute.xlu0 %7   ;;  %v20_v17 = vpop.permute.xlu1 %19  }
  0x75   :  { %10 = vst.msk [vmem:[#allocation0] sm:$0x1] %vm9_vm1, %v8_v16  }
  0x78   :  { %v14_v18 = vpop.permute.xlu0 %13   ;;  %v26_v19 = vpop.permute.xlu1 %25  }
  0x79   :  { %16 = vst.msk [vmem:[#allocation0] sm:$0x1] %vm15_vm2, %v14_v18  }
  0x7a   :  { %22 = vst.msk [vmem:[#allocation0] sm:$0x1] %vm21_vm3, %v20_v17  }
  0x7b   :  { %28 = vst.msk [vmem:[#allocation0] sm:$0x1] %vm27_vm4, %v26_v19  }
  0x7c   :  { %v32_v20 = vpop.permute.xlu0 %31   ;;  %v38_v21 = vpop.permute.xlu1 %37  }
  0x7d   :  { %34 = vst.msk [vmem:[#allocation0] sm:$0x1] %vm33_vm5, %v32_v20  }
  0x7e   :  { %40 = vst.msk [vmem:[#allocation0] sm:$0x1] %vm39_vm6, %v38_v21  }
  0x80   :  { %v44_v22 = vpop.permute.xlu0 %43   ;;  %v50_v23 = vpop.permute.xlu1 %49  }
  0x81   :  { %46 = vst.msk [vmem:[#allocation0] sm:$0x1] %vm45_vm7, %v44_v22  }
  0x82   :  { %52 = vst.msk [vmem:[#allocation0] sm:$0x1] %vm51_vm8, %v50_v23  }
  0x84   :  { %v56_v24 = vpop.permute.xlu0 %55   ;;  %v62_v25 = vpop.permute.xlu1 %61  }
  0x85   :  { %58 = vst.msk [vmem:[#allocation0] sm:$0x1] %vm57_vm9, %v56_v24  }
  0x86   :  { %64 = vst.msk [vmem:[#allocation0] sm:$0x1] %vm63_vm10, %v62_v25  }
  0x88   :  { %v68_v26 = vpop.permute.xlu0 %67   ;;  %v74_v27 = vpop.permute.xlu1 %73  }
  0x89   :  { %70 = vst.msk [vmem:[#allocation0] sm:$0x1] %vm69_vm11, %v68_v26  }
  0x8a   :  { %76 = vst.msk [vmem:[#allocation0] sm:$0x1] %vm75_vm12, %v74_v27  }
  0x8c   :  { %v80_v28 = vpop.permute.xlu0 %79   ;;  %v86_v29 = vpop.permute.xlu1 %85  }
  0x8d   :  { %82 = vst.msk [vmem:[#allocation0] sm:$0x1] %vm81_vm13, %v80_v28  }
  0x8e   :  { %88 = vst.msk [vmem:[#allocation0] sm:$0x1] %vm87_vm14, %v86_v29  }
  0x90   :  { %v92_v30 = vpop.permute.xlu0 %91  }
  0x91   :  { %94 = vst.msk [vmem:[#allocation0] sm:$0x1] %vm93_vm15, %v92_v30  }
  0x98   :  { %v98_v31 = vld [vmem:[#allocation0] sm:$0x1] }
  0x99   :  { %100 = vst [vmem:[%s208_s1] sm:$0x1] %v98_v31 }

// kernel: down_block_forward.3
= control target key start
LH: loop header
LB: loop body
LE: loop exit
PB: predicated region body
PF: predicated region fallthrough
CT: control target
= control target key end

     0   :  { %s914_s21 = smov 0   ;;  %s916_s22 = smov 0   ;;  %s1003_s0 = inlined_call_operand.vmem [shape: bf16[2,16,64], index: 0, kind: input, shape index: {}, may-alias: {0,1}]   ;;  %s1004_s1 = inlined_call_operand.vmem [shape: bf16[2,16,64], index: 1, kind: input, shape index: {}, may-alias: {0,1}]   ;;  %s1005_s2 = inlined_call_operand.vmem [shape: bf16[3,64,128], index: 2, kind: input, shape index: {}]   ;;  %s1006_s3 = inlined_call_operand.vmem [shape: f32[1,64], index: 3, kind: input, shape index: {}]   ;;  %s1007_s4 = inlined_call_operand.vmem [shape: f32[1,64], index: 4, kind: input, shape index: {}]   ;;  %s1008_s5 = inlined_call_operand.vmem [shape: bf16[2,16,128], index: 5, kind: output, shape index: {0}]   ;;  %s1009_s6 = inlined_call_operand.vmem [shape: f32[2,1,2,128], index: 6, kind: output, shape index: {1}]  }
   0x1   :  { %s918_s1 = smov 0  }
   0x2 LB: > { %s29_s3 = sadd.s32 1, %s871_s22  ;;  %p710_p0 = scmp.ge.s32.totalorder %s875_s1, 1  ;;  %s875_s1 = sphi %s918_s1, %s17_s1   ;;  %s871_s22 = sphi %s916_s22, %s1011_s22   ;;  %s867_s21 = sphi %s914_s21, %s1010_s21  }
   0x3   : > { %p31_p1 = scmp.ge.s32.totalorder %s29_s3, 2  ;;  %p214_p2 = scmp.lt.s32.totalorder %s875_s1, 3 }
   0x5   : > { %s1013_s3 = smov (%p31_p1, %s29_s3), 0  ;;  %p215_p3 = pnand %p710_p0, %p214_p2 }
   0x6   : > { %v840_v0 = vld [vmem:[%s1005_s2] sm:$0xff] (!%p215_p3)   ;;  %v877_v1 = vmov (!%p215_p3), 0.0   ;;  %v841_v2 = vld [vmem:[%s1005_s2 + $0x8] sm:$0xff] (!%p215_p3)   ;;  %vm878_vm0 = vmmov (!%p215_p3), 0   ;;  %p258_p4 = scmp.lt.s32.totalorder (!%p215_p3), %s867_s21, 1  ;;  %v842_v4 = vld [vmem:[%s1005_s2 + $0x10] sm:$0xff] (!%p215_p3)  }
   0x7   : > { %218 = sbr.rel (%p215_p3) target bundleno = 275 (0x113), region = 36  ;;  %778 = vmatprep.subr.bf16.mxu0 (!%p215_p3), %v877_v1  ;;  %790 = vmatprep.subr.bf16.mxu1 (!%p215_p3), %v877_v1  ;;  %v844_v3 = vld [vmem:[%s1005_s2 + $0x40] sm:$0xff] (!%p215_p3)   ;;  %v846_v5 = vld [vmem:[%s1005_s2 + $0x48] sm:$0xff] (!%p215_p3)   ;;  %v843_v6 = vld [vmem:[%s1005_s2 + $0x18] sm:$0xff] (!%p215_p3)   ;;  %vm324_vm1 = vcmask (!%p215_p3), 523264   ;;  %vm454_vm2 = vcmask (!%p215_p3), 1040384  }
   0x8   : > { %779 = vmatpush3.bf16.msra.mxu0 (!%p215_p3), %v840_v0  ;;  %786 = vmatprep.mubr.msk.bf16.mxu0 (!%p215_p3), %vm878_vm0, %v877_v1  ;;  %v848_v7 = vld [vmem:[%s1005_s2 + $0x50] sm:$0xff] (!%p215_p3)   ;;  %v847_v9 = vld [vmem:[%s1005_s2 + $0x20] sm:$0xff] (!%p215_p3)   ;;  %v850_v10 = vld [vmem:[%s1005_s2 + $0x58] sm:$0xff] (!%p215_p3)   ;;  %vm528_vm3 = vcmask (!%p215_p3), 1046528  }
   0x9   : > { %780 = vmatprep.subr.bf16.mxu0 (!%p215_p3), %v877_v1  ;;  %798 = vmatprep.mubr.msk.bf16.mxu1 (!%p215_p3), %vm878_vm0, %v877_v1  ;;  %v849_v11 = vld [vmem:[%s1005_s2 + $0x28] sm:$0xff] (!%p215_p3)   ;;  %v851_v12 = vld [vmem:[%s1005_s2 + $0x30] sm:$0xff] (!%p215_p3)   ;;  %v852_v13 = vld [vmem:[%s1005_s2 + $0x38] sm:$0xff] (!%p215_p3)  }
   0xa   : > { %791 = vmatpush3.bf16.msra.mxu1 (!%p215_p3), %v844_v3 }
   0xb   : > { %792 = vmatprep.subr.bf16.mxu1 (!%p215_p3), %v877_v1 }
   0xc   : > { %781 = vmatpush3.bf16.msra.mxu0 (!%p215_p3), %v841_v2 }
   0xd   : > { %782 = vmatprep.subr.bf16.mxu0 (!%p215_p3), %v877_v1 }
   0xe   : > { %s1015_s21 = smov (!%p258_p4, %s867_s21), 1  ;;  %793 = vmatpush3.bf16.msra.mxu1 %v846_v5 }
   0xf   : > { %s754_s30 = sshll.u32 %s1015_s21, 3  ;;  %794 = vmatprep.subr.bf16.mxu1 %v877_v1  ;;  %s715_s7 = sshll.u32 %s1015_s21, 1 }
  0x10   : > { %s265_s11 = scalar_lea.vmem %s1003_s0, %s754_s30  ;;  %783 = vmatpush3.bf16.msra.mxu0 %v842_v4  ;;  %s275_s29 = scalar_lea.vmem %s1008_s5, %s754_s30 }
  0x11   : > { %784 = vmatprep.subr.bf16.mxu0 %v877_v1  ;;  %v845_v8 = vld [vmem:[%s265_s11] sm:$0xff]   ;;  %s283_s9 = scalar_lea.vmem %s1009_s6, %s715_s7 }
  0x12   : > { %795 = vmatpush3.bf16.msra.mxu1 %v848_v7 }
  0x13   : > { %796 = vmatprep.subr.bf16.mxu1 %v877_v1 }
  0x14   : > { %785 = vmatpush3.bf16.msra.mxu0 %v843_v6 }
  0x15   : > { %802 = vmatprep.subr.bf16.mxu0 %v877_v1 }
  0x16   : > { %797 = vmatpush3.bf16.msra.mxu1 %v850_v10 }
  0x17   : > { %787 = vmatmul.mubr.msk.bf16.vlgmr.msra.gmra.mrb[0].mxu0 %vm324_vm1, %v845_v8 }
  0x18   : > { %803 = vmatpush3.bf16.msra.mxu0 %v847_v9  ;;  %810 = vmatprep.mubr.msk.bf16.mxu0 %vm878_vm0, %v877_v1 }
  0x19   : > { %804 = vmatprep.subr.bf16.mxu0 %v877_v1  ;;  %799 = vmatmul.mubr.msk.bf16.vlgmr.msra.gmra.mrb[0].mxu1 %vm324_vm1, %v845_v8 }
  0x1c   : > { %805 = vmatpush3.bf16.msra.mxu0 %v849_v11 }
  0x1d   : > { %806 = vmatprep.subr.bf16.mxu0 %v877_v1 }
  0x20   : > { %807 = vmatpush3.bf16.msra.mxu0 %v851_v12 }
  0x21   : > { %808 = vmatprep.subr.bf16.mxu0 %v877_v1 }
  0x24   : > { %809 = vmatpush3.bf16.msra.mxu0 %v852_v13 }
  0x27   : > { %811 = vmatmul.mubr.msk.bf16.vlgmr.msra.gmra.mrb[4].mxu0 %vm324_vm1, %v845_v8 }
  0xea   : > { %v362_v14 = vpop.f32.mrb[0].mxu0 }
  0xeb   : > { %v455_v15 = vrot.slane %v362_v14, 7  ;;  %v788_v16 = vpop.f32.mrb[1].mxu0 }
  0xec   : > { %v365_v17 = vpop.f32.mrb[2].mxu0  ;;  %v445_v20 = vpop.f32.mrb[0].mxu1 }
  0xed   : > { %v456_v18 = vrot.slane %v365_v17, 7  ;;  %v789_v19 = vpop.f32.mrb[3].mxu0  ;;  %v529_v21 = vrot.slane %v445_v20, 1  ;;  %v800_v22 = vpop.f32.mrb[1].mxu1  ;;  %v460_v28 = vsel %vm454_vm2, 0.0, %v455_v15 }
  0xee   : > { %v448_v24 = vpop.f32.mrb[2].mxu1 }
  0xef   : > { %v457_v23 = vsel %vm454_vm2, %v455_v15, %v456_v18  ;;  %v530_v25 = vrot.slane %v448_v24, 1  ;;  %v801_v26 = vpop.f32.mrb[3].mxu1 }
  0xf1   : > { %v531_v27 = vsel %vm528_vm3, %v529_v21, %v530_v25  ;;  %v534_v36 = vsel %vm528_vm3, %v530_v25, 0.0 }
  0xfa   : > { %v519_v29 = vpop.f32.mrb[4].mxu0 }
  0xfb   : > { %v520_v30 = vadd.f32 %v519_v29, %v460_v28  ;;  %v812_v31 = vpop.f32.mrb[5].mxu0 }
  0xfc   : > { %v522_v32 = vpop.f32.mrb[6].mxu0 }
  0xfd   : > { %v535_v33 = vadd.f32 %v531_v27, %v520_v30  ;;  %v523_v34 = vadd.f32 %v522_v32, %v457_v23  ;;  %v813_v35 = vpop.f32.mrb[7].mxu0 }
  0xff   : > { %v536_v37 = vadd.f32 %v534_v36, %v523_v34  ;;  %v544_v38 = vmul.f32 %v535_v33, %v535_v33 }
 0x101   : > { %v537_v39 = vadd.f32 %v536_v37, %v535_v33  ;;  %v545_v40 = vmul.f32 %v536_v37, %v536_v37  ;;  %v761_v41 = vpack.c.bf16 %v536_v37, %v535_v33 }
 0x103   : > { %v538_v42 = vrot.slane %v537_v39, 4  ;;  %v546_v43 = vadd.f32 %v545_v40, %v544_v38  ;;  %762 = vst [vmem:[%s275_s29] sm:$0xff] %v761_v41  }
 0x105   : > { %v539_v44 = vadd.f32 %v538_v42, %v537_v39  ;;  %v547_v45 = vrot.slane %v546_v43, 4 }
 0x107   : > { %v540_v46 = vrot.slane %v539_v44, 2  ;;  %v548_v47 = vadd.f32 %v547_v45, %v546_v43 }
 0x109   : > { %v541_v48 = vadd.f32 %v540_v46, %v539_v44  ;;  %v549_v49 = vrot.slane %v548_v47, 2 }
 0x10b   : > { %v542_v50 = vrot.slane %v541_v48, 1  ;;  %v550_v51 = vadd.f32 %v549_v49, %v548_v47 }
 0x10d   : > { %v551_v52 = vrot.slane %v550_v51, 1  ;;  %v543_v53 = vadd.f32 %v542_v50, %v541_v48 }
 0x10f   : > { %v552_v54 = vadd.f32 %v551_v52, %v550_v51 }
 0x111   : > { %v553_v55 = vsel %vm454_vm2, %v543_v53, %v552_v54 }
 0x112   : > { %554 = vst [vmem:[%s283_s9] sm:$0x3] %v553_v55 }
 0x113 PF: > { %s17_s1 = sadd.s32 1, %s875_s1   ;;  %s1010_s21 = smov %s871_s22 }
 0x114   : > { %p14_p5 = scmp.ge.s32.totalorder %s17_s1, 4   ;;  %s1011_s22 = smov %s1013_s3 }
 0x116   :  { %16 = sbr.rel (!%p14_p5) target bundleno = 2 (0x2), region = 81 }
 0x11d   :  { %615 = vsyncmov [#allocation3] }
 0x120   :  { %s616_s10 = vpop.sfrf %615 }
 0x121   :  { %p752_p6 = scmp.ne.s32.totalorder %s616_s10, 0 }
 0x123   :  { %620 = shalt.err (%p752_p6)  }
 0x124   :  { %622 = vsyncmov [#allocation3 + $0x1] }
 0x127   :  { %s623_s11 = vpop.sfrf %622 }
 0x128   :  { %p753_p7 = scmp.ne.s32.totalorder %s623_s11, 0 }
 0x12a   :  { %627 = shalt.err (%p753_p7)  }

// kernel: down_block_forward.4
= control target key start
LH: loop header
LB: loop body
LE: loop exit
PB: predicated region body
PF: predicated region fallthrough
CT: control target
= control target key end

     0   :  { %s1101_s21 = smov 0   ;;  %s1103_s22 = smov 0   ;;  %s1256_s0 = inlined_call_operand.vmem [shape: bf16[2,16,128], index: 0, kind: input, shape index: {}, may-alias: {0,1}]   ;;  %s1257_s1 = inlined_call_operand.vmem [shape: bf16[2,16,128], index: 1, kind: input, shape index: {}, may-alias: {0,1}]   ;;  %s1258_s2 = inlined_call_operand.vmem [shape: bf16[3,128,128], index: 2, kind: input, shape index: {}]   ;;  %s1259_s3 = inlined_call_operand.vmem [shape: f32[1,128], index: 3, kind: input, shape index: {}]   ;;  %s1260_s4 = inlined_call_operand.vmem [shape: f32[1,128], index: 4, kind: input, shape index: {}]   ;;  %s1261_s5 = inlined_call_operand.vmem [shape: bf16[2,16,128], index: 5, kind: output, shape index: {0}]   ;;  %s1262_s6 = inlined_call_operand.vmem [shape: f32[2,1,2,128], index: 6, kind: output, shape index: {1}]  }
   0x1   :  { %s1105_s1 = smov 0  }
   0x2 LB: > { %s29_s23 = sadd.s32 1, %s1058_s22  ;;  %p820_p0 = scmp.ge.s32.totalorder %s1062_s1, 1  ;;  %s1062_s1 = sphi %s1105_s1, %s17_s1   ;;  %s1058_s22 = sphi %s1103_s22, %s1264_s22   ;;  %s1054_s21 = sphi %s1101_s21, %s1263_s21  }
   0x3   : > { %p31_p1 = scmp.ge.s32.totalorder %s29_s23, 2  ;;  %p214_p2 = scmp.lt.s32.totalorder %s1062_s1, 3 }
   0x5   : > { %s1266_s23 = smov (%p31_p1, %s29_s23), 0  ;;  %p215_p3 = pnand %p820_p0, %p214_p2 }
   0x6   : > { %v1016_v0 = vld [vmem:[%s1258_s2] sm:$0xff] (!%p215_p3)   ;;  %v1064_v1 = vmov (!%p215_p3), 0.0   ;;  %v1017_v2 = vld [vmem:[%s1258_s2 + $0x8] sm:$0xff] (!%p215_p3)   ;;  %vm1065_vm0 = vmmov (!%p215_p3), 0   ;;  %p258_p4 = scmp.lt.s32.totalorder (!%p215_p3), %s1054_s21, 1  ;;  %v1018_v3 = vld [vmem:[%s1258_s2 + $0x10] sm:$0xff] (!%p215_p3)  }
   0x7   : > { %218 = sbr.rel (%p215_p3) target bundleno = 307 (0x133), region = 36  ;;  %930 = vmatprep.subr.bf16.mxu0 (!%p215_p3), %v1064_v1  ;;  %950 = vmatprep.subr.bf16.mxu1 (!%p215_p3), %v1064_v1  ;;  %v1024_v4 = vld [vmem:[%s1258_s2 + $0x80] sm:$0xff] (!%p215_p3)   ;;  %v1019_v5 = vld [vmem:[%s1258_s2 + $0x18] sm:$0xff] (!%p215_p3)   ;;  %v1025_v7 = vld [vmem:[%s1258_s2 + $0x88] sm:$0xff] (!%p215_p3)   ;;  %vm540_vm1 = vcmask (!%p215_p3), 1040384   ;;  %vm638_vm2 = vcmask (!%p215_p3), 1046528  }
   0x8   : > { %931 = vmatpush3.bf16.msra.mxu0 (!%p215_p3), %v1016_v0  ;;  %946 = vmatprep.mubr.msk.bf16.mxu0 (!%p215_p3), %vm1065_vm0, %v1064_v1  ;;  %v1020_v8 = vld [vmem:[%s1258_s2 + $0x20] sm:$0xff] (!%p215_p3)   ;;  %v1027_v12 = vld [vmem:[%s1258_s2 + $0x90] sm:$0xff] (!%p215_p3)   ;;  %v1021_v13 = vld [vmem:[%s1258_s2 + $0x28] sm:$0xff] (!%p215_p3)  }
   0x9   : > { %932 = vmatprep.subr.bf16.mxu0 (!%p215_p3), %v1064_v1  ;;  %966 = vmatprep.mubr.msk.bf16.mxu1 (!%p215_p3), %vm1065_vm0, %v1064_v1  ;;  %v826_v11 = vld [vmem:[%s1259_s3] ss:$0 sm:$0xff] (!%p215_p3)  ;;  %v1029_v17 = vld [vmem:[%s1258_s2 + $0x98] sm:$0xff] (!%p215_p3)   ;;  %v1022_v18 = vld [vmem:[%s1258_s2 + $0x30] sm:$0xff] (!%p215_p3)  }
   0xa   : > { %951 = vmatpush3.bf16.msra.mxu1 (!%p215_p3), %v1024_v4  ;;  %v827_v16 = vld [vmem:[%s1260_s4] ss:$0 sm:$0xff] (!%p215_p3)  ;;  %v1023_v24 = vld [vmem:[%s1258_s2 + $0x38] sm:$0xff] (!%p215_p3)   ;;  %v1033_v25 = vld [vmem:[%s1258_s2 + $0xa8] sm:$0xff] (!%p215_p3)  }
   0xb   : > { %952 = vmatprep.subr.bf16.mxu1 (!%p215_p3), %v1064_v1  ;;  %v1031_v21 = vld [vmem:[%s1258_s2 + $0xa0] sm:$0xff] (!%p215_p3)   ;;  %v1035_v28 = vld [vmem:[%s1258_s2 + $0xb0] sm:$0xff] (!%p215_p3)   ;;  %v1028_v29 = vld [vmem:[%s1258_s2 + $0x48] sm:$0xff] (!%p215_p3)  }
   0xc   : > { %933 = vmatpush3.bf16.msra.mxu0 (!%p215_p3), %v1017_v2  ;;  %v1026_v27 = vld [vmem:[%s1258_s2 + $0x40] sm:$0xff] (!%p215_p3)   ;;  %v1037_v30 = vld [vmem:[%s1258_s2 + $0xb8] sm:$0xff] (!%p215_p3)   ;;  %v1030_v31 = vld [vmem:[%s1258_s2 + $0x50] sm:$0xff] (!%p215_p3)  }
   0xd   : > { %934 = vmatprep.subr.bf16.mxu0 (!%p215_p3), %v1064_v1  ;;  %v1032_v32 = vld [vmem:[%s1258_s2 + $0x58] sm:$0xff] (!%p215_p3)   ;;  %v1034_v33 = vld [vmem:[%s1258_s2 + $0x60] sm:$0xff] (!%p215_p3)   ;;  %v1036_v34 = vld [vmem:[%s1258_s2 + $0x68] sm:$0xff] (!%p215_p3)  }
   0xe   : > { %s1268_s21 = smov (!%p258_p4, %s1054_s21), 1  ;;  %953 = vmatpush3.bf16.msra.mxu1 %v1025_v7  ;;  %v1038_v35 = vld [vmem:[%s1258_s2 + $0x70] sm:$0xff]   ;;  %v1039_v36 = vld [vmem:[%s1258_s2 + $0x78] sm:$0xff]  }
   0xf   : > { %s890_s30 = sshll.u32 %s1268_s21, 3  ;;  %954 = vmatprep.subr.bf16.mxu1 %v1064_v1  ;;  %s825_s19 = sshll.u32 %s1268_s21, 1 }
  0x10   : > { %s265_s9 = scalar_lea.vmem %s1256_s0, %s890_s30  ;;  %935 = vmatpush3.bf16.msra.mxu0 %v1018_v3  ;;  %s275_s18 = scalar_lea.vmem %s1261_s5, %s890_s30 }
  0x11   : > { %v895_v6 = vld [vmem:[%s265_s9] sm:$0xff]   ;;  %936 = vmatprep.subr.bf16.mxu0 %v1064_v1  ;;  %s283_s24 = scalar_lea.vmem %s1262_s6, %s825_s19 }
  0x12   : > { %v896_v9 = vunpack.c.l.bf16 %v895_v6  ;;  %v897_v10 = vunpack.c.h.bf16 %v895_v6  ;;  %955 = vmatpush3.bf16.msra.mxu1 %v1027_v12 }
  0x13   : > { %956 = vmatprep.subr.bf16.mxu1 %v1064_v1 }
  0x14   : > { %937 = vmatpush3.bf16.msra.mxu0 %v1019_v5  ;;  %v296_v14 = vmul.f32 %v896_v9, %v826_v11  ;;  %v297_v15 = vmul.f32 %v897_v10, %v826_v11 }
  0x15   : > { %938 = vmatprep.subr.bf16.mxu0 %v1064_v1 }
  0x16   : > { %v305_v19 = vadd.f32 %v827_v16, %v296_v14  ;;  %v306_v20 = vadd.f32 %v827_v16, %v297_v15  ;;  %957 = vmatpush3.bf16.msra.mxu1 %v1029_v17 }
  0x17   : > { %958 = vmatprep.subr.bf16.mxu1 %v1064_v1 }
  0x18   : > { %939 = vmatpush3.bf16.msra.mxu0 %v1020_v8  ;;  %v307_v22 = vmax.f32 %v305_v19, 0.0  ;;  %v308_v23 = vmax.f32 %v306_v20, 0.0 }
  0x19   : > { %940 = vmatprep.subr.bf16.mxu0 %v1064_v1 }
  0x1a   : > { %959 = vmatpush3.bf16.msra.mxu1 %v1031_v21  ;;  %v309_v26 = vpack.c.bf16 %v308_v23, %v307_v22 }
  0x1b   : > { %960 = vmatprep.subr.bf16.mxu1 %v1064_v1 }
  0x1c   : > { %941 = vmatpush3.bf16.msra.mxu0 %v1021_v13 }
  0x1d   : > { %942 = vmatprep.subr.bf16.mxu0 %v1064_v1 }
  0x1e   : > { %961 = vmatpush3.bf16.msra.mxu1 %v1033_v25 }
  0x1f   : > { %962 = vmatprep.subr.bf16.mxu1 %v1064_v1 }
  0x20   : > { %943 = vmatpush3.bf16.msra.mxu0 %v1022_v18 }
  0x21   : > { %944 = vmatprep.subr.bf16.mxu0 %v1064_v1 }
  0x22   : > { %963 = vmatpush3.bf16.msra.mxu1 %v1035_v28 }
  0x23   : > { %964 = vmatprep.subr.bf16.mxu1 %v1064_v1 }
  0x24   : > { %945 = vmatpush3.bf16.msra.mxu0 %v1023_v24 }
  0x25   : > { %970 = vmatprep.subr.bf16.mxu0 %v1064_v1 }
  0x26   : > { %965 = vmatpush3.bf16.msra.mxu1 %v1037_v30 }
  0x27   : > { %947 = vmatmul.mubr.bf16.vlgmr.msra.gmra.mrb[0].mxu0 %v309_v26 }
  0x28   : > { %971 = vmatpush3.bf16.msra.mxu0 %v1026_v27  ;;  %986 = vmatprep.mubr.msk.bf16.mxu0 %vm1065_vm0, %v1064_v1 }
  0x29   : > { %972 = vmatprep.subr.bf16.mxu0 %v1064_v1  ;;  %967 = vmatmul.mubr.bf16.vlgmr.msra.gmra.mrb[0].mxu1 %v309_v26 }
  0x2c   : > { %973 = vmatpush3.bf16.msra.mxu0 %v1028_v29 }
  0x2d   : > { %974 = vmatprep.subr.bf16.mxu0 %v1064_v1 }
  0x30   : > { %975 = vmatpush3.bf16.msra.mxu0 %v1030_v31 }
  0x31   : > { %976 = vmatprep.subr.bf16.mxu0 %v1064_v1 }
  0x34   : > { %977 = vmatpush3.bf16.msra.mxu0 %v1032_v32 }
  0x35   : > { %978 = vmatprep.subr.bf16.mxu0 %v1064_v1 }
  0x38   : > { %979 = vmatpush3.bf16.msra.mxu0 %v1034_v33 }
  0x39   : > { %980 = vmatprep.subr.bf16.mxu0 %v1064_v1 }
  0x3c   : > { %981 = vmatpush3.bf16.msra.mxu0 %v1036_v34 }
  0x3d   : > { %982 = vmatprep.subr.bf16.mxu0 %v1064_v1 }
  0x40   : > { %983 = vmatpush3.bf16.msra.mxu0 %v1038_v35 }
  0x41   : > { %984 = vmatprep.subr.bf16.mxu0 %v1064_v1 }
  0x44   : > { %985 = vmatpush3.bf16.msra.mxu0 %v1039_v36 }
  0x47   : > { %987 = vmatmul.mubr.bf16.vlgmr.msra.gmra.mrb[4].mxu0 %v309_v26 }
  0xfa   : > { %v408_v37 = vpop.f32.mrb[0].mxu0 }
  0xfb   : > { %v541_v38 = vrot.slane %v408_v37, 7  ;;  %v948_v39 = vpop.f32.mrb[1].mxu0 }
  0xfc   : > { %v411_v40 = vpop.f32.mrb[2].mxu0  ;;  %v531_v44 = vpop.f32.mrb[0].mxu1 }
  0xfd   : > { %v542_v41 = vrot.slane %v411_v40, 7  ;;  %v949_v42 = vpop.f32.mrb[3].mxu0  ;;  %v639_v45 = vrot.slane %v531_v44, 1  ;;  %v968_v46 = vpop.f32.mrb[1].mxu1  ;;  %v546_v51 = vsel %vm540_vm1, 0.0, %v541_v38 }
  0xfe   : > { %v534_v47 = vpop.f32.mrb[2].mxu1 }
  0xff   : > { %v543_v43 = vsel %vm540_vm1, %v541_v38, %v542_v41  ;;  %v640_v48 = vrot.slane %v534_v47, 1  ;;  %v969_v49 = vpop.f32.mrb[3].mxu1 }
 0x101   : > { %v641_v50 = vsel %vm638_vm2, %v639_v45, %v640_v48  ;;  %v644_v59 = vsel %vm638_vm2, %v640_v48, 0.0 }
 0x11a   : > { %v629_v52 = vpop.f32.mrb[4].mxu0 }
 0x11b   : > { %v630_v53 = vadd.f32 %v629_v52, %v546_v51  ;;  %v988_v54 = vpop.f32.mrb[5].mxu0 }
 0x11c   : > { %v632_v55 = vpop.f32.mrb[6].mxu0 }
 0x11d   : > { %v645_v56 = vadd.f32 %v641_v50, %v630_v53  ;;  %v633_v57 = vadd.f32 %v632_v55, %v543_v43  ;;  %v989_v58 = vpop.f32.mrb[7].mxu0 }
 0x11f   : > { %v646_v60 = vadd.f32 %v644_v59, %v633_v57  ;;  %v654_v61 = vmul.f32 %v645_v56, %v645_v56 }
 0x121   : > { %v647_v62 = vadd.f32 %v646_v60, %v645_v56  ;;  %v655_v63 = vmul.f32 %v646_v60, %v646_v60  ;;  %v901_v0 = vpack.c.bf16 %v646_v60, %v645_v56 }
 0x123   : > { %v648_v1 = vrot.slane %v647_v62, 4  ;;  %v656_v2 = vadd.f32 %v655_v63, %v654_v61  ;;  %902 = vst [vmem:[%s275_s18] sm:$0xff] %v901_v0  }
 0x125   : > { %v649_v3 = vadd.f32 %v648_v1, %v647_v62  ;;  %v657_v4 = vrot.slane %v656_v2, 4 }
 0x127   : > { %v650_v5 = vrot.slane %v649_v3, 2  ;;  %v658_v6 = vadd.f32 %v657_v4, %v656_v2 }
 0x129   : > { %v651_v7 = vadd.f32 %v650_v5, %v649_v3  ;;  %v659_v8 = vrot.slane %v658_v6, 2 }
 0x12b   : > { %v652_v9 = vrot.slane %v651_v7, 1  ;;  %v660_v10 = vadd.f32 %v659_v8, %v658_v6 }
 0x12d   : > { %v661_v11 = vrot.slane %v660_v10, 1  ;;  %v653_v12 = vadd.f32 %v652_v9, %v651_v7 }
 0x12f   : > { %v662_v13 = vadd.f32 %v661_v11, %v660_v10 }
 0x131   : > { %v663_v14 = vsel %vm540_vm1, %v653_v12, %v662_v13 }
 0x132   : > { %664 = vst [vmem:[%s283_s24] sm:$0x3] %v663_v14 }
 0x133 PF: > { %s17_s1 = sadd.s32 1, %s1062_s1   ;;  %s1263_s21 = smov %s1058_s22 }
 0x134   : > { %p14_p5 = scmp.ge.s32.totalorder %s17_s1, 4   ;;  %s1264_s22 = smov %s1266_s23 }
 0x136   :  { %16 = sbr.rel (!%p14_p5) target bundleno = 2 (0x2), region = 81 }
 0x13d   :  { %725 = vsyncmov [#allocation3] }
 0x140   :  { %s726_s25 = vpop.sfrf %725 }
 0x141   :  { %p888_p6 = scmp.ne.s32.totalorder %s726_s25, 0 }
 0x143   :  { %730 = shalt.err (%p888_p6)  }
 0x144   :  { %732 = vsyncmov [#allocation3 + $0x1] }
 0x147   :  { %s733_s26 = vpop.sfrf %732 }
 0x148   :  { %p889_p7 = scmp.ne.s32.totalorder %s733_s26, 0 }
 0x14a   :  { %737 = shalt.err (%p889_p7)  }

// kernel: down_block_forward.5
= control target key start
LH: loop header
LB: loop body
LE: loop exit
PB: predicated region body
PF: predicated region fallthrough
CT: control target
= control target key end

     0   :  { %s2872_s24 = smov 0   ;;  %s2874_s25 = smov 0   ;;  %s4956_s0 = inlined_call_operand.vmem [shape: bf16[2,16,128], index: 0, kind: input, shape index: {}]   ;;  %s4957_s1 = inlined_call_operand.vmem [shape: bf16[2,16,16,8], index: 1, kind: input, shape index: {}]   ;;  %s4958_s2 = inlined_call_operand.vmem [shape: f32[1,128], index: 2, kind: input, shape index: {}]   ;;  %s4959_s3 = inlined_call_operand.vmem [shape: f32[1,128], index: 3, kind: input, shape index: {}]   ;;  %s4960_s4 = inlined_call_operand.vmem [shape: f32[1,8], index: 4, kind: input, shape index: {}]   ;;  %s4961_s5 = inlined_call_operand.vmem [shape: f32[1,8], index: 5, kind: input, shape index: {}]   ;;  %s4962_s6 = inlined_call_operand.vmem [shape: f32[2,16,128], index: 6, kind: output, shape index: {0}]   ;;  %s4963_s7 = inlined_call_operand.vmem [shape: f32[2,8,8,8], index: 7, kind: output, shape index: {1}]  }
   0x1   :  { %s2876_s26 = smov 0  }
   0x2 LB: > { %s30_s27 = sadd.s32 1, %s2825_s25  ;;  %p2680_p0 = scmp.ge.s32.totalorder %s2829_s26, 1  ;;  %s2829_s26 = sphi %s2876_s26, %s18_s26   ;;  %s2825_s25 = sphi %s2874_s25, %s5577_s25   ;;  %s2821_s24 = sphi %s2872_s24, %s5576_s24  }
   0x3   : > { %p32_p1 = scmp.ge.s32.totalorder %s30_s27, 2  ;;  %p281_p2 = scmp.lt.s32.totalorder %s2829_s26, 3 }
   0x5   : > { %s5579_s27 = smov (%p32_p1, %s30_s27), 0  ;;  %p282_p3 = pnand %p2680_p0, %p281_p2 }
   0x7   : > { %285 = sbr.rel (%p282_p3) target bundleno = 400 (0x190), region = 44 }
   0xe   : > { %p341_p4 = scmp.lt.s32.totalorder %s2821_s24, 1  ;;  %v617_v0 = vlaneseq  ;;  %v2831_v1 = vmov 1983009808   ;;  %v2689_v5 = vld [vmem:[%s4958_s2] ss:$0 sm:$0xff]  ;;  %vm1285_vm0 = vcmask 58368  }
   0xf   : > { %v615_v2 = vunpack.c.l.s4 %v2831_v1  ;;  %v2690_v17 = vld [vmem:[%s4959_s3] ss:$0 sm:$0xff]  ;;  %vm2182_vm1 = vcmask 64512   ;;  %vm2439_vm2 = vcmask 1041409   ;;  %vm2441_vm3 = vcmask 1042434  }
  0x10   : > { %s5581_s24 = smov (!%p341_p4, %s2821_s24), 1  ;;  %v618_v3 = vshrl.u32 %v617_v0, 7  ;;  %v2691_v53 = vld [vmem:[%s4960_s4] ss:$0 sm:$0xff]  ;;  %vm2443_vm4 = vcmask 1043459   ;;  %vm2445_vm5 = vcmask 1044484  }
  0x11   : > { %s2695_s28 = sshll.u32 %s5581_s24, 3  ;;  %s2696_s29 = sshll.u32 %s5581_s24, 7  ;;  %v616_v4 = vunpack.c.0.s8 %v615_v2  ;;  %vm2447_vm6 = vcmask 1045509   ;;  %vm2449_vm7 = vcmask 1046534   ;;  %vm2451_vm8 = vcmask 1047559  }
  0x12   : > { %s348_s9 = scalar_lea.vmem %s4956_s0, %s2695_s28  ;;  %s2900_s12 = scalar_lea.vmem %s4957_s1, %s2696_s29 }
  0x13   : > { %v2700_v6 = vld [vmem:[%s348_s9] sm:$0xff]   ;;  %v2909_v8 = vld [vmem:[%s2900_s12 + $0x8] sm:$0xff]   ;;  %v2911_v9 = vsub.s32 %v616_v4, %v618_v3  ;;  %v2768_v14 = vld [vmem:[%s2900_s12 + $0x10] sm:$0xff]   ;;  %s2697_s17 = sshll.u32 %s5581_s24, 4  ;;  %s2698_s29 = sshll.u32 %s5581_s24, 6 }
  0x14   : > { %v2906_v7 = vld [vmem:[%s2900_s12] sm:$0xff]   ;;  %v2701_v10 = vunpack.c.l.bf16 %v2700_v6  ;;  %v2702_v11 = vunpack.c.h.bf16 %v2700_v6  ;;  %v2917_v15 = vld [vmem:[%s2900_s12 + $0x18] sm:$0xff]   ;;  %v2709_v18 = vunpack.c.l.bf16 %v2909_v8  ;;  %v2710_v19 = vunpack.c.h.bf16 %v2909_v8  ;;  %v2771_v22 = vld [vmem:[%s2900_s12 + $0x28] sm:$0xff]   ;;  %s369_s20 = scalar_lea.vmem %s4962_s6, %s2697_s17  ;;  %s4741_s8 = scalar_lea.vmem %s4963_s7, %s2698_s29 }
  0x15   : > { %v2705_v12 = vunpack.c.l.bf16 %v2906_v7  ;;  %v2706_v13 = vunpack.c.h.bf16 %v2906_v7  ;;  %v2920_v16 = vld [vmem:[%s2900_s12 + $0x20] sm:$0xff]   ;;  %v2713_v20 = vunpack.c.l.bf16 %v2768_v14  ;;  %v2714_v21 = vunpack.c.h.bf16 %v2768_v14  ;;  %v2772_v23 = vld [vmem:[%s2900_s12 + $0x30] sm:$0xff]   ;;  %v2773_v28 = vld [vmem:[%s2900_s12 + $0x38] sm:$0xff]  }
  0x16   : > { %v392_v24 = vmul.f32 %v2701_v10, %v2689_v5  ;;  %v393_v25 = vmul.f32 %v2702_v11, %v2689_v5  ;;  %v2717_v26 = vunpack.c.l.bf16 %v2917_v15  ;;  %v2718_v27 = vunpack.c.h.bf16 %v2917_v15  ;;  %v2774_v29 = vld [vmem:[%s2900_s12 + $0x40] sm:$0xff]   ;;  %v2775_v34 = vld [vmem:[%s2900_s12 + $0x48] sm:$0xff]   ;;  %v2776_v39 = vld [vmem:[%s2900_s12 + $0x50] sm:$0xff]  }
  0x17   : > { %v2721_v30 = vunpack.c.l.bf16 %v2920_v16  ;;  %v2722_v31 = vunpack.c.h.bf16 %v2920_v16  ;;  %v2725_v32 = vunpack.c.l.bf16 %v2771_v22  ;;  %v2726_v33 = vunpack.c.h.bf16 %v2771_v22  ;;  %v2777_v40 = vld [vmem:[%s2900_s12 + $0x58] sm:$0xff]   ;;  %v2778_v45 = vld [vmem:[%s2900_s12 + $0x60] sm:$0xff]   ;;  %v2779_v46 = vld [vmem:[%s2900_s12 + $0x68] sm:$0xff]  }
  0x18   : > { %v401_v35 = vadd.f32 %v2690_v17, %v392_v24  ;;  %v402_v36 = vadd.f32 %v2690_v17, %v393_v25  ;;  %v2729_v37 = vunpack.c.l.bf16 %v2772_v23  ;;  %v2730_v38 = vunpack.c.h.bf16 %v2772_v23  ;;  %v2780_v51 = vld [vmem:[%s2900_s12 + $0x70] sm:$0xff]   ;;  %v2781_v52 = vld [vmem:[%s2900_s12 + $0x78] sm:$0xff]  }
  0x19   : > { %v2733_v41 = vunpack.c.l.bf16 %v2773_v28  ;;  %v2734_v42 = vunpack.c.h.bf16 %v2773_v28  ;;  %v2737_v43 = vunpack.c.l.bf16 %v2774_v29  ;;  %v2738_v44 = vunpack.c.h.bf16 %v2774_v29 }
  0x1a   : > { %v403_v47 = vmax.f32 %v401_v35, 0.0  ;;  %v404_v48 = vmax.f32 %v402_v36, 0.0  ;;  %v2741_v49 = vunpack.c.l.bf16 %v2775_v34  ;;  %v2742_v50 = vunpack.c.h.bf16 %v2775_v34 }
  0x1b   : > { %v2745_v54 = vunpack.c.l.bf16 %v2776_v39  ;;  %v2746_v55 = vunpack.c.h.bf16 %v2776_v39  ;;  %v2749_v56 = vunpack.c.l.bf16 %v2777_v40  ;;  %v2750_v57 = vunpack.c.h.bf16 %v2777_v40 }
  0x1c   : > { %405 = vst [vmem:[%s369_s20] sm:$0xff] %v403_v47  ;;  %406 = vst [vmem:[%s369_s20 + $0x8] sm:$0xff] %v404_v48  ;;  %v2753_v58 = vunpack.c.l.bf16 %v2778_v45  ;;  %v2754_v59 = vunpack.c.h.bf16 %v2778_v45  ;;  %v2757_v60 = vunpack.c.l.bf16 %v2779_v46  ;;  %v2758_v61 = vunpack.c.h.bf16 %v2779_v46 }
  0x1d   : > { %v2761_v62 = vunpack.c.l.bf16 %v2780_v51  ;;  %v2762_v63 = vunpack.c.h.bf16 %v2780_v51  ;;  %v2765_v0 = vunpack.c.l.bf16 %v2781_v52  ;;  %v2766_v1 = vunpack.c.h.bf16 %v2781_v52 }
  0x1e   : > { %v479_v2 = vmul.f32 %v2705_v12, %v2691_v53  ;;  %v480_v3 = vmul.f32 %v2706_v13, %v2691_v53  ;;  %v481_v4 = vmul.f32 %v2709_v18, %v2691_v53  ;;  %v482_v5 = vmul.f32 %v2710_v19, %v2691_v53  ;;  %v2692_v12 = vld [vmem:[%s4961_s5] ss:$0 sm:$0xff] }
  0x1f   : > { %v483_v6 = vmul.f32 %v2713_v20, %v2691_v53  ;;  %v484_v7 = vmul.f32 %v2714_v21, %v2691_v53  ;;  %v485_v8 = vmul.f32 %v2717_v26, %v2691_v53  ;;  %v486_v10 = vmul.f32 %v2718_v27, %v2691_v53 }
  0x20   : > { %v487_v11 = vmul.f32 %v2721_v30, %v2691_v53  ;;  %v488_v14 = vmul.f32 %v2722_v31, %v2691_v53  ;;  %v489_v15 = vmul.f32 %v2725_v32, %v2691_v53  ;;  %v490_v16 = vmul.f32 %v2726_v33, %v2691_v53 }
  0x21   : > { %v491_v17 = vmul.f32 %v2729_v37, %v2691_v53  ;;  %v492_v22 = vmul.f32 %v2730_v38, %v2691_v53  ;;  %v493_v23 = vmul.f32 %v2733_v41, %v2691_v53  ;;  %v494_v24 = vmul.f32 %v2734_v42, %v2691_v53 }
  0x22   : > { %v495_v25 = vmul.f32 %v2737_v43, %v2691_v53  ;;  %v496_v28 = vmul.f32 %v2738_v44, %v2691_v53  ;;  %v497_v29 = vmul.f32 %v2741_v49, %v2691_v53  ;;  %v498_v34 = vmul.f32 %v2742_v50, %v2691_v53 }
  0x23   : > { %v499_v13 = vmul.f32 %v2745_v54, %v2691_v53  ;;  %v500_v18 = vmul.f32 %v2746_v55, %v2691_v53  ;;  %v501_v19 = vmul.f32 %v2749_v56, %v2691_v53  ;;  %v502_v20 = vmul.f32 %v2750_v57, %v2691_v53 }
  0x24   : > { %v503_v21 = vmul.f32 %v2753_v58, %v2691_v53  ;;  %v504_v26 = vmul.f32 %v2754_v59, %v2691_v53  ;;  %v505_v27 = vmul.f32 %v2757_v60, %v2691_v53  ;;  %v506_v30 = vmul.f32 %v2758_v61, %v2691_v53 }
  0x25   : > { %v507_v31 = vmul.f32 %v2761_v62, %v2691_v53  ;;  %v508_v32 = vmul.f32 %v2762_v63, %v2691_v53  ;;  %v509_v33 = vmul.f32 %v2765_v0, %v2691_v53  ;;  %v510_v35 = vmul.f32 %v2766_v1, %v2691_v53 }
  0x26   : > { %v517_v36 = vadd.f32 %v2692_v12, %v479_v2  ;;  %v518_v37 = vadd.f32 %v2692_v12, %v480_v3  ;;  %v519_v38 = vadd.f32 %v2692_v12, %v481_v4  ;;  %v520_v39 = vadd.f32 %v2692_v12, %v482_v5 }
  0x27   : > { %v521_v40 = vadd.f32 %v2692_v12, %v483_v6  ;;  %v522_v41 = vadd.f32 %v2692_v12, %v484_v7  ;;  %v523_v42 = vadd.f32 %v2692_v12, %v485_v8  ;;  %v524_v43 = vadd.f32 %v2692_v12, %v486_v10 }
  0x28   : > { %v525_v44 = vadd.f32 %v2692_v12, %v487_v11  ;;  %v526_v45 = vadd.f32 %v2692_v12, %v488_v14  ;;  %v527_v46 = vadd.f32 %v2692_v12, %v489_v15  ;;  %v528_v47 = vadd.f32 %v2692_v12, %v490_v16 }
  0x29   : > { %v529_v48 = vadd.f32 %v2692_v12, %v491_v17  ;;  %v530_v49 = vadd.f32 %v2692_v12, %v492_v22  ;;  %v531_v50 = vadd.f32 %v2692_v12, %v493_v23  ;;  %v532_v51 = vadd.f32 %v2692_v12, %v494_v24 }
  0x2a   : > { %v533_v52 = vadd.f32 %v2692_v12, %v495_v25  ;;  %v534_v54 = vadd.f32 %v2692_v12, %v496_v28  ;;  %v535_v55 = vadd.f32 %v2692_v12, %v497_v29  ;;  %v536_v53 = vadd.f32 %v2692_v12, %v498_v34 }
  0x2b   : > { %v537_v56 = vadd.f32 %v2692_v12, %v499_v13  ;;  %v538_v57 = vadd.f32 %v2692_v12, %v500_v18  ;;  %v539_v58 = vadd.f32 %v2692_v12, %v501_v19  ;;  %v540_v59 = vadd.f32 %v2692_v12, %v502_v20 }
  0x2c   : > { %v541_v60 = vadd.f32 %v2692_v12, %v503_v21  ;;  %v542_v61 = vadd.f32 %v2692_v12, %v504_v26  ;;  %v543_v62 = vadd.f32 %v2692_v12, %v505_v27  ;;  %v544_v63 = vadd.f32 %v2692_v12, %v506_v30 }
  0x2d   : > { %v545_v0 = vadd.f32 %v2692_v12, %v507_v31  ;;  %v546_v1 = vadd.f32 %v2692_v12, %v508_v32  ;;  %v547_v2 = vadd.f32 %v2692_v12, %v509_v33  ;;  %v548_v3 = vadd.f32 %v2692_v12, %v510_v35 }
  0x2e   : > { %v549_v4 = vmax.f32 %v517_v36, 0.0  ;;  %v550_v5 = vmax.f32 %v518_v37, 0.0  ;;  %v551_v6 = vmax.f32 %v519_v38, 0.0  ;;  %v552_v7 = vmax.f32 %v520_v39, 0.0 }
  0x2f   : > { %v553_v8 = vmax.f32 %v521_v40, 0.0  ;;  %v554_v10 = vmax.f32 %v522_v41, 0.0  ;;  %v555_v11 = vmax.f32 %v523_v42, 0.0  ;;  %v2952_v14 = vmax.f32 %v524_v43, 0.0 }
  0x30   : > { %v2954_v15 = vmax.f32 %v525_v44, 0.0  ;;  %v2956_v16 = vmax.f32 %v526_v45, 0.0  ;;  %v2958_v17 = vmax.f32 %v527_v46, 0.0  ;;  %v2960_v22 = vmax.f32 %v528_v47, 0.0 }
  0x31   : > { %v2962_v23 = vmax.f32 %v529_v48, 0.0  ;;  %v2964_v24 = vmax.f32 %v530_v49, 0.0  ;;  %v2966_v25 = vmax.f32 %v531_v50, 0.0  ;;  %v2968_v28 = vmax.f32 %v532_v51, 0.0 }
  0x32   : > { %v2970_v29 = vmax.f32 %v533_v52, 0.0  ;;  %v2972_v34 = vmax.f32 %v534_v54, 0.0  ;;  %v2974_v12 = vmax.f32 %v535_v55, 0.0  ;;  %v2976_v13 = vmax.f32 %v536_v53, 0.0 }
  0x33   : > { %v2978_v18 = vmax.f32 %v537_v56, 0.0  ;;  %v2980_v19 = vmax.f32 %v538_v57, 0.0  ;;  %v2982_v20 = vmax.f32 %v539_v58, 0.0  ;;  %v2984_v21 = vmax.f32 %v540_v59, 0.0 }
  0x34   : > { %v2986_v26 = vmax.f32 %v541_v60, 0.0  ;;  %v2988_v27 = vmax.f32 %v542_v61, 0.0  ;;  %v2990_v30 = vmax.f32 %v543_v62, 0.0  ;;  %v2992_v31 = vmax.f32 %v544_v63, 0.0 }
  0x35   : > { %v2994_v32 = vmax.f32 %v545_v0, 0.0  ;;  %v2996_v33 = vmax.f32 %v546_v1, 0.0  ;;  %v2998_v35 = vmax.f32 %v547_v2, 0.0  ;;  %v3000_v36 = vmax.f32 %v548_v3, 0.0 }
  0x36   : > { %v613_v37 = vcombine.high %v549_v4, %v549_v4  ;;  %v3003_v38 = vrot.slane %v549_v4, %v2911_v9  ;;  %v630_v39 = vcombine.high %v550_v5, %v550_v5  ;;  %v3006_v40 = vrot.slane %v550_v5, %v2911_v9 }
  0x37   : > { %v647_v41 = vcombine.high %v551_v6, %v551_v6  ;;  %v3009_v42 = vrot.slane %v551_v6, %v2911_v9  ;;  %v664_v43 = vcombine.high %v552_v7, %v552_v7  ;;  %v3012_v44 = vrot.slane %v552_v7, %v2911_v9 }
  0x38   : > { %v3015_v45 = vrot.slane %v613_v37, %v2911_v9  ;;  %v3020_v47 = vrot.slane %v630_v39, %v2911_v9  ;;  %v681_v53 = vcombine.high %v553_v8, %v553_v8  ;;  %v3039_v56 = vrot.slane %v553_v8, %v2911_v9 }
  0x39   : > { %v3025_v49 = vrot.slane %v647_v41, %v2911_v9  ;;  %v3030_v51 = vrot.slane %v664_v43, %v2911_v9  ;;  %v698_v59 = vcombine.high %v554_v10, %v554_v10  ;;  %v3046_v60 = vrot.slane %v554_v10, %v2911_v9 }
  0x3a   : > { %v3049_v61 = vrot.slane %v681_v53, %v2911_v9  ;;  %v715_v63 = vcombine.high %v555_v11, %v555_v11  ;;  %v3054_v0 = vrot.slane %v555_v11, %v2911_v9  ;;  %v732_v3 = vcombine.high %v2952_v14, %v2952_v14 }
  0x3b   : > { %v3057_v1 = vrot.slane %v698_v59, %v2911_v9  ;;  %v3065_v4 = vrot.slane %v2952_v14, %v2911_v9  ;;  %v749_v8 = vcombine.high %v2954_v15, %v2954_v15  ;;  %v3085_v37 = vrot.slane %v2954_v15, %v2911_v9 }
  0x3c   : > { %v3070_v6 = vrot.slane %v715_v63, %v2911_v9  ;;  %v3079_v11 = vrot.slane %v732_v3, %v2911_v9  ;;  %v766_v43 = vcombine.high %v2956_v16, %v2956_v16  ;;  %v3096_v53 = vrot.slane %v2956_v16, %v2911_v9 }
  0x3d   : > { %v3090_v41 = vrot.slane %v749_v8, %v2911_v9  ;;  %v783_v63 = vcombine.high %v2958_v17, %v2958_v17  ;;  %v3106_v3 = vrot.slane %v2958_v17, %v2911_v9  ;;  %v800_v59 = vcombine.high %v2960_v22, %v2960_v22 }
  0x3e   : > { %v3111_v14 = vrot.slane %v766_v43, %v2911_v9  ;;  %v3124_v17 = vrot.slane %v2960_v22, %v2911_v9  ;;  %v817_v43 = vcombine.high %v2962_v23, %v2962_v23  ;;  %v834_v39 = vcombine.high %v2964_v24, %v2964_v24 }
  0x3f   : > { %v3118_v15 = vrot.slane %v783_v63, %v2911_v9  ;;  %v3131_v16 = vrot.slane %v800_v59, %v2911_v9  ;;  %v3135_v63 = vrot.slane %v2962_v23, %v2911_v9  ;;  %v3148_v59 = vrot.slane %v2964_v24, %v2911_v9 }
  0x40   : > { %v3144_v10 = vrot.slane %v817_v43, %v2911_v9  ;;  %v3155_v2 = vrot.slane %v834_v39, %v2911_v9  ;;  %v851_v22 = vcombine.high %v2966_v25, %v2966_v25  ;;  %v3165_v24 = vrot.slane %v2966_v25, %v2911_v9 }
  0x41   : > { %v868_v23 = vcombine.high %v2968_v28, %v2968_v28  ;;  %v3176_v5 = vrot.slane %v2968_v28, %v2911_v9  ;;  %v885_v7 = vcombine.high %v2970_v29, %v2970_v29  ;;  %v3187_v62 = vrot.slane %v2970_v29, %v2911_v9 }
  0x42   : > { %v3172_v8 = vrot.slane %v851_v22, %v2911_v9  ;;  %v902_v22 = vcombine.high %v2972_v34, %v2972_v34  ;;  %v919_v28 = vcombine.high %v2974_v12, %v2974_v12  ;;  %v936_v29 = vcombine.high %v2976_v13, %v2976_v13 }
  0x43   : > { %v3183_v43 = vrot.slane %v868_v23, %v2911_v9  ;;  %v3196_v58 = vrot.slane %v885_v7, %v2911_v9  ;;  %v3200_v23 = vrot.slane %v2972_v34, %v2911_v9  ;;  %v3217_v34 = vrot.slane %v2974_v12, %v2911_v9 }
  0x44   : > { %v3207_v52 = vrot.slane %v902_v22, %v2911_v9  ;;  %v3224_v25 = vrot.slane %v919_v28, %v2911_v9  ;;  %v3228_v57 = vrot.slane %v2976_v13, %v2911_v9  ;;  %v953_v39 = vcombine.high %v2978_v18, %v2978_v18 }
  0x45   : > { %v3235_v7 = vrot.slane %v936_v29, %v2911_v9  ;;  %v3239_v50 = vrot.slane %v2978_v18, %v2911_v9  ;;  %v970_v28 = vcombine.high %v2980_v19, %v2980_v19  ;;  %v3252_v29 = vrot.slane %v2980_v19, %v2911_v9 }
  0x46   : > { %5088 = vst [vmem:[#allocation2_spill] sm:$0xff] %v3224_v25  ;;  %5089 = vst [vmem:[#allocation3_spill] sm:$0xff] %v3228_v57  ;;  %v3248_v55 = vrot.slane %v953_v39, %v2911_v9  ;;  %v987_v13 = vcombine.high %v2982_v20, %v2982_v20  ;;  %v3269_v19 = vrot.slane %v2982_v20, %v2911_v9 }
  0x47   : > { %5090 = vst [vmem:[#allocation4_spill] sm:$0xff] %v3235_v7  ;;  %5091 = vst [vmem:[#allocation5_spill] sm:$0xff] %v3239_v50  ;;  %v3259_v48 = vrot.slane %v970_v28, %v2911_v9  ;;  %v1004_v18 = vcombine.high %v2984_v21, %v2984_v21  ;;  %v3280_v39 = vrot.slane %v2984_v21, %v2911_v9 }
  0x48   : > { %5092 = vst [vmem:[#allocation6_spill] sm:$0xff] %v3248_v55  ;;  %5093 = vst [vmem:[#allocation7_spill] sm:$0xff] %v3252_v29  ;;  %v3276_v12 = vrot.slane %v987_v13, %v2911_v9  ;;  %v1021_v22 = vcombine.high %v2986_v26, %v2986_v26  ;;  %v3291_v46 = vrot.slane %v2986_v26, %v2911_v9 }
  0x49   : > { %5094 = vst [vmem:[#allocation8_spill] sm:$0xff] %v3259_v48  ;;  %5095 = vst [vmem:[#allocation9_spill] sm:$0xff] %v3269_v19  ;;  %v3287_v54 = vrot.slane %v1004_v18, %v2911_v9  ;;  %v1038_v13 = vcombine.high %v2988_v27, %v2988_v27  ;;  %v3304_v18 = vrot.slane %v2988_v27, %v2911_v9 }
  0x4a   : > { %5096 = vst [vmem:[#allocation10_spill] sm:$0xff] %v3276_v12  ;;  %5097 = vst [vmem:[#allocation11_spill] sm:$0xff] %v3280_v39  ;;  %v3300_v48 = vrot.slane %v1021_v22, %v2911_v9  ;;  %v1055_v21 = vcombine.high %v2990_v30, %v2990_v30  ;;  %v3321_v27 = vrot.slane %v2990_v30, %v2911_v9 }
  0x4b   : > { %5098 = vst [vmem:[#allocation12_spill] sm:$0xff] %v3287_v54  ;;  %5099 = vst [vmem:[#allocation13_spill] sm:$0xff] %v3291_v46  ;;  %v3311_v19 = vrot.slane %v1038_v13, %v2911_v9  ;;  %v1072_v26 = vcombine.high %v2992_v31, %v2992_v31  ;;  %v3332_v46 = vrot.slane %v2992_v31, %v2911_v9  ;;  %v1286_v13 = vsel %vm1285_vm0, %v3003_v38, -inf }
  0x4c   : > { %5100 = vst [vmem:[#allocation14_spill] sm:$0xff] %v3300_v48  ;;  %5101 = vst [vmem:[#allocation15_spill] sm:$0xff] %v3304_v18  ;;  %v3328_v20 = vrot.slane %v1055_v21, %v2911_v9  ;;  %v1089_v28 = vcombine.high %v2994_v32, %v2994_v32  ;;  %v3343_v18 = vrot.slane %v2994_v32, %v2911_v9 }
  0x4d   : > { %5102 = vst [vmem:[#allocation16_spill] sm:$0xff] %v3311_v19  ;;  %5103 = vst [vmem:[#allocation17_spill] sm:$0xff] %v3321_v27  ;;  %v3339_v22 = vrot.slane %v1072_v26, %v2911_v9  ;;  %v1106_v21 = vcombine.high %v2996_v33, %v2996_v33  ;;  %v3356_v26 = vrot.slane %v2996_v33, %v2911_v9 }
  0x4e   : > { %5104 = vst [vmem:[#allocation18_spill] sm:$0xff] %v3328_v20  ;;  %5105 = vst [vmem:[#allocation19_spill] sm:$0xff] %v3332_v46  ;;  %v3352_v19 = vrot.slane %v1089_v28, %v2911_v9  ;;  %v1123_v31 = vcombine.high %v2998_v35, %v2998_v35  ;;  %v3373_v33 = vrot.slane %v2998_v35, %v2911_v9 }
  0x4f   : > { %5106 = vst [vmem:[#allocation20_spill] sm:$0xff] %v3339_v22  ;;  %5107 = vst [vmem:[#allocation21_spill] sm:$0xff] %v3343_v18  ;;  %v3363_v27 = vrot.slane %v1106_v21, %v2911_v9  ;;  %v1140_v32 = vcombine.high %v3000_v36, %v3000_v36  ;;  %v3384_v18 = vrot.slane %v3000_v36, %v2911_v9  ;;  %v1300_v22 = vsel %vm1285_vm0, %v3015_v45, -inf }
  0x50   : > { %5108 = vst [vmem:[#allocation22_spill] sm:$0xff] %v3352_v19  ;;  %5109 = vst [vmem:[#allocation23_spill] sm:$0xff] %v3356_v26  ;;  %v3380_v30 = vrot.slane %v1123_v31, %v2911_v9  ;;  %v1287_v26 = vrot.slane %v1286_v13, 4  ;;  %v5115_v21 = vcombine.high %v3003_v38, %v3003_v38  ;;  %v1301_v35 = vrot.slane %v1300_v22, 4 }
  0x51   : > { %5110 = vst [vmem:[#allocation24_spill] sm:$0xff] %v3363_v27  ;;  %5111 = vst [vmem:[#allocation25_spill] sm:$0xff] %v3373_v33  ;;  %v3391_v28 = vrot.slane %v1140_v32, %v2911_v9  ;;  %v5116_v38 = vcombine.high %v3015_v45, %v3015_v45  ;;  %v1314_v27 = vsel %vm1285_vm0, %v3006_v40, -inf  ;;  %v5117_v36 = vcombine.high %v3006_v40, %v3006_v40 }
  0x52   : > { %5112 = vst [vmem:[#allocation26_spill] sm:$0xff] %v3380_v30  ;;  %5113 = vst [vmem:[#allocation27_spill] sm:$0xff] %v3384_v18  ;;  %v1293_v31 = vsel %vm1285_vm0, %v5115_v21, -inf  ;;  %v1288_v32 = vmax.f32 %v1286_v13, %v1287_v26  ;;  %v1302_v20 = vmax.f32 %v1300_v22, %v1301_v35  ;;  %v1315_v9 = vrot.slane %v1314_v27, 4 }
  0x53   : > { %5114 = vst [vmem:[#allocation28_spill] sm:$0xff] %v3391_v28  ;;  %v1294_v19 = vrot.slane %v1293_v31, 4  ;;  %v1307_v21 = vsel %vm1285_vm0, %v5116_v38, -inf  ;;  %v1321_v18 = vsel %vm1285_vm0, %v5117_v36, -inf  ;;  %v1328_v45 = vsel %vm1285_vm0, %v3020_v47, -inf }
  0x54   : > { %v1308_v46 = vrot.slane %v1307_v21, 4  ;;  %v1289_v30 = vrot.slane %v1288_v32, 2  ;;  %v1322_v13 = vrot.slane %v1321_v18, 4  ;;  %v1303_v48 = vrot.slane %v1302_v20, 2 }
  0x55   : > { %v1295_v33 = vmax.f32 %v1293_v31, %v1294_v19  ;;  %v5118_v19 = vcombine.high %v3020_v47, %v3020_v47  ;;  %v1316_v54 = vmax.f32 %v1314_v27, %v1315_v9  ;;  %v1329_v12 = vrot.slane %v1328_v45, 4 }
  0x56   : > { %v1309_v28 = vmax.f32 %v1307_v21, %v1308_v46  ;;  %v1290_v38 = vmax.f32 %v1288_v32, %v1289_v30  ;;  %v1323_v40 = vmax.f32 %v1321_v18, %v1322_v13  ;;  %v1304_v29 = vmax.f32 %v1302_v20, %v1303_v48 }
  0x57   : > { %v1296_v26 = vrot.slane %v1295_v33, 2  ;;  %v1335_v31 = vsel %vm1285_vm0, %v5118_v19, -inf  ;;  %v1317_v55 = vrot.slane %v1316_v54, 2  ;;  %v1330_v7 = vmax.f32 %v1328_v45, %v1329_v12 }
  0x58   : > { %v1310_v36 = vrot.slane %v1309_v28, 2  ;;  %v1336_v22 = vrot.slane %v1335_v31, 4  ;;  %v1291_v35 = vrot.slane %v1290_v38, 1  ;;  %v1324_v46 = vrot.slane %v1323_v40, 2 }
  0x59   : > { %v1297_v39 = vmax.f32 %v1295_v33, %v1296_v26  ;;  %v1305_v47 = vrot.slane %v1304_v29, 1  ;;  %v1318_v19 = vmax.f32 %v1316_v54, %v1317_v55  ;;  %v1331_v27 = vrot.slane %v1330_v7, 2 }
  0x5a   : > { %v1311_v50 = vmax.f32 %v1309_v28, %v1310_v36  ;;  %v1337_v57 = vmax.f32 %v1335_v31, %v1336_v22  ;;  %v3421_v25 = vmax.f32 %v1290_v38, %v1291_v35  ;;  %v1325_v30 = vmax.f32 %v1323_v40, %v1324_v46 }
  0x5b   : > { %v1298_v21 = vrot.slane %v1297_v39, 1  ;;  %v3425_v9 = vmax.f32 %v1304_v29, %v1305_v47  ;;  %v1319_v13 = vrot.slane %v1318_v19, 1  ;;  %v1342_v20 = vsel %vm1285_vm0, %v3009_v42, -inf }
  0x5c   : > { %v1312_v18 = vrot.slane %v1311_v50, 1  ;;  %v1338_v33 = vrot.slane %v1337_v57, 2  ;;  %v1326_v48 = vrot.slane %v1325_v30, 1  ;;  %v1332_v12 = vmax.f32 %v1330_v7, %v1331_v27 }
  0x5d   : > { %v3423_v32 = vmax.f32 %v1297_v39, %v1298_v21  ;;  %v1343_v45 = vrot.slane %v1342_v20, 4  ;;  %v3431_v31 = vmax.f32 %v1318_v19, %v1319_v13  ;;  %v5122_v55 = vcombine.high %v3009_v42, %v3009_v42 }
  0x5e   : > { %v3429_v28 = vmax.f32 %v1311_v50, %v1312_v18  ;;  %v1339_v26 = vmax.f32 %v1337_v57, %v1338_v33  ;;  %v3433_v54 = vmax.f32 %v1325_v30, %v1326_v48  ;;  %v1356_v39 = vsel %vm1285_vm0, %v3025_v49, -inf }
  0x5f   : > { %5120 = vst [vmem:[#allocation30_spill] sm:$0xff] %v3431_v31  ;;  %v1349_v29 = vsel %vm1285_vm0, %v5122_v55, -inf  ;;  %v1333_v38 = vrot.slane %v1332_v12, 1  ;;  %v1344_v36 = vmax.f32 %v1342_v20, %v1343_v45  ;;  %v1357_v22 = vrot.slane %v1356_v39, 4 }
  0x60   : > { %5119 = vst [vmem:[#allocation29_spill] sm:$0xff] %v3429_v28  ;;  %5121 = vst [vmem:[#allocation31_spill] sm:$0xff] %v3433_v54  ;;  %v1340_v40 = vrot.slane %v1339_v26, 1  ;;  %v1350_v50 = vrot.slane %v1349_v29, 4  ;;  %v5123_v57 = vcombine.high %v3025_v49, %v3025_v49  ;;  %v1370_v35 = vsel %vm1285_vm0, %v3012_v44, -inf }
  0x61   : > { %v5124_v42 = vcombine.high %v3012_v44, %v3012_v44  ;;  %v3451_v21 = vmax.f32 %v1332_v12, %v1333_v38  ;;  %v1345_v19 = vrot.slane %v1344_v36, 2  ;;  %v1358_v18 = vmax.f32 %v1356_v39, %v1357_v22 }
  0x62   : > { %v1363_v7 = vsel %vm1285_vm0, %v5123_v57, -inf  ;;  %v3453_v47 = vmax.f32 %v1339_v26, %v1340_v40  ;;  %v1351_v30 = vmax.f32 %v1349_v29, %v1350_v50  ;;  %v1371_v33 = vrot.slane %v1370_v35, 4 }
  0x63   : > { %v1377_v46 = vsel %vm1285_vm0, %v5124_v42, -inf  ;;  %5125 = vst [vmem:[#allocation32_spill] sm:$0xff] %v3451_v21  ;;  %v1364_v27 = vrot.slane %v1363_v7, 4  ;;  %v1346_v13 = vmax.f32 %v1344_v36, %v1345_v19  ;;  %v1384_v20 = vsel %vm1285_vm0, %v3030_v51, -inf }
  0x64   : > { %5126 = vst [vmem:[#allocation33_spill] sm:$0xff] %v3453_v47  ;;  %v1378_v49 = vrot.slane %v1377_v46, 4  ;;  %v1352_v48 = vrot.slane %v1351_v30, 2  ;;  %v5127_v44 = vcombine.high %v3030_v51, %v3030_v51  ;;  %v1359_v12 = vrot.slane %v1358_v18, 2 }
  0x65   : > { %v1365_v55 = vmax.f32 %v1363_v7, %v1364_v27  ;;  %v1372_v26 = vmax.f32 %v1370_v35, %v1371_v33  ;;  %v1347_v40 = vrot.slane %v1346_v13, 1  ;;  %v1385_v39 = vrot.slane %v1384_v20, 4 }
  0x66   : > { %v1391_v45 = vsel %vm1285_vm0, %v5127_v44, -inf  ;;  %v1379_v38 = vmax.f32 %v1377_v46, %v1378_v49  ;;  %v1353_v29 = vmax.f32 %v1351_v30, %v1352_v48  ;;  %v1360_v22 = vmax.f32 %v1358_v18, %v1359_v12 }
  0x67   : > { %v1392_v50 = vrot.slane %v1391_v45, 4  ;;  %v1366_v57 = vrot.slane %v1365_v55, 2  ;;  %v1373_v36 = vrot.slane %v1372_v26, 2  ;;  %v3461_v19 = vmax.f32 %v1346_v13, %v1347_v40 }
  0x68   : > { %v1380_v42 = vrot.slane %v1379_v38, 2  ;;  %v1354_v47 = vrot.slane %v1353_v29, 1  ;;  %v1386_v21 = vmax.f32 %v1384_v20, %v1385_v39  ;;  %v1361_v51 = vrot.slane %v1360_v22, 1 }
  0x69   : > { %v1393_v54 = vmax.f32 %v1391_v45, %v1392_v50  ;;  %v1367_v31 = vmax.f32 %v1365_v55, %v1366_v57  ;;  %v1374_v44 = vmax.f32 %v1372_v26, %v1373_v36  ;;  %v1398_v30 = vsel %vm1285_vm0, %v3039_v56, -inf }
  0x6a   : > { %v1381_v28 = vmax.f32 %v1379_v38, %v1380_v42  ;;  %v3463_v7 = vmax.f32 %v1353_v29, %v1354_v47  ;;  %v1387_v35 = vrot.slane %v1386_v21, 2  ;;  %v3467_v18 = vmax.f32 %v1360_v22, %v1361_v51 }
  0x6b   : > { %v1394_v46 = vrot.slane %v1393_v54, 2  ;;  %v1368_v27 = vrot.slane %v1367_v31, 1  ;;  %v1375_v33 = vrot.slane %v1374_v44, 1  ;;  %v1399_v20 = vrot.slane %v1398_v30, 4 }
  0x6c   : > { %v1382_v49 = vrot.slane %v1381_v28, 1  ;;  %v1388_v13 = vmax.f32 %v1386_v21, %v1387_v35  ;;  %v5128_v45 = vcombine.high %v3039_v56, %v3039_v56  ;;  %v1412_v21 = vsel %vm1285_vm0, %v3049_v61, -inf }
  0x6d   : > { %v1395_v48 = vmax.f32 %v1393_v54, %v1394_v46  ;;  %v3473_v47 = vmax.f32 %v1367_v31, %v1368_v27  ;;  %v3475_v55 = vmax.f32 %v1374_v44, %v1375_v33  ;;  %v1400_v39 = vmax.f32 %v1398_v30, %v1399_v20 }
  0x6e   : > { %v1405_v12 = vsel %vm1285_vm0, %v5128_v45, -inf  ;;  %v3477_v26 = vmax.f32 %v1381_v28, %v1382_v49  ;;  %v1389_v40 = vrot.slane %v1388_v13, 1  ;;  %v1413_v50 = vrot.slane %v1412_v21, 4 }
  0x6f   : > { %v1406_v38 = vrot.slane %v1405_v12, 4  ;;  %v1396_v29 = vrot.slane %v1395_v48, 1  ;;  %v5129_v56 = vcombine.high %v3049_v61, %v3049_v61  ;;  %v1426_v31 = vsel %vm1285_vm0, %v3046_v60, -inf }
  0x70   : > { %v3487_v57 = vmax.f32 %v1388_v13, %v1389_v40  ;;  %v1401_v36 = vrot.slane %v1400_v39, 2  ;;  %v1414_v44 = vmax.f32 %v1412_v21, %v1413_v50  ;;  %v1427_v35 = vrot.slane %v1426_v31, 4 }
  0x71   : > { %v1407_v54 = vmax.f32 %v1405_v12, %v1406_v38  ;;  %v1419_v22 = vsel %vm1285_vm0, %v5129_v56, -inf  ;;  %v3489_v28 = vmax.f32 %v1395_v48, %v1396_v29  ;;  %v5131_v46 = vcombine.high %v3046_v60, %v3046_v60 }
  0x72   : > { %v1420_v42 = vrot.slane %v1419_v22, 4  ;;  %v1402_v61 = vmax.f32 %v1400_v39, %v1401_v36  ;;  %v1440_v49 = vsel %vm1285_vm0, %v3057_v1, -inf  ;;  %v1415_v20 = vrot.slane %v1414_v44, 2 }
  0x73   : > { %5130 = vst [vmem:[#allocation34_spill] sm:$0xff] %v3489_v28  ;;  %v1408_v51 = vrot.slane %v1407_v54, 2  ;;  %v1433_v30 = vsel %vm1285_vm0, %v5131_v46, -inf  ;;  %v1428_v48 = vmax.f32 %v1426_v31, %v1427_v35  ;;  %v1441_v45 = vrot.slane %v1440_v49, 4 }
  0x74   : > { %v1421_v27 = vmax.f32 %v1419_v22, %v1420_v42  ;;  %v1434_v33 = vrot.slane %v1433_v30, 4  ;;  %v1403_v12 = vrot.slane %v1402_v61, 1  ;;  %v5132_v29 = vcombine.high %v3057_v1, %v3057_v1 }
  0x75   : > { %v1409_v13 = vmax.f32 %v1407_v54, %v1408_v51  ;;  %v1416_v50 = vmax.f32 %v1414_v44, %v1415_v20  ;;  %v1429_v39 = vrot.slane %v1428_v48, 2  ;;  %v1442_v56 = vmax.f32 %v1440_v49, %v1441_v45 }
  0x76   : > { %v1422_v38 = vrot.slane %v1421_v27, 2  ;;  %v1435_v40 = vmax.f32 %v1433_v30, %v1434_v33  ;;  %v1447_v60 = vsel %vm1285_vm0, %v5132_v29, -inf  ;;  %v3501_v22 = vmax.f32 %v1402_v61, %v1403_v12 }
  0x77   : > { %v1410_v21 = vrot.slane %v1409_v13, 1  ;;  %v1448_v54 = vrot.slane %v1447_v60, 4  ;;  %v1417_v31 = vrot.slane %v1416_v50, 1  ;;  %v1430_v35 = vmax.f32 %v1428_v48, %v1429_v39 }
  0x78   : > { %v1423_v36 = vmax.f32 %v1421_v27, %v1422_v38  ;;  %v1436_v42 = vrot.slane %v1435_v40, 2  ;;  %v1443_v46 = vrot.slane %v1442_v56, 2  ;;  %v1454_v1 = vsel %vm1285_vm0, %v3054_v0, -inf }
  0x79   : > { %v3503_v51 = vmax.f32 %v1409_v13, %v1410_v21  ;;  %v1449_v28 = vmax.f32 %v1447_v60, %v1448_v54  ;;  %v3507_v29 = vmax.f32 %v1416_v50, %v1417_v31  ;;  %v1431_v44 = vrot.slane %v1430_v35, 1 }
  0x7a   : > { %v1424_v30 = vrot.slane %v1423_v36, 1  ;;  %v1437_v33 = vmax.f32 %v1435_v40, %v1436_v42  ;;  %v1444_v49 = vmax.f32 %v1442_v56, %v1443_v46  ;;  %v1455_v61 = vrot.slane %v1454_v1, 4 }
  0x7b   : > { %v1450_v45 = vrot.slane %v1449_v28, 2  ;;  %v5133_v13 = vcombine.high %v3054_v0, %v3054_v0  ;;  %v3515_v12 = vmax.f32 %v1430_v35, %v1431_v44  ;;  %v1468_v39 = vsel %vm1285_vm0, %v3070_v6, -inf }
  0x7c   : > { %v3509_v20 = vmax.f32 %v1423_v36, %v1424_v30  ;;  %v1438_v27 = vrot.slane %v1437_v33, 1  ;;  %v1445_v38 = vrot.slane %v1444_v49, 1  ;;  %v1456_v40 = vmax.f32 %v1454_v1, %v1455_v61 }
  0x7d   : > { %v1461_v48 = vsel %vm1285_vm0, %v5133_v13, -inf  ;;  %v1451_v50 = vmax.f32 %v1449_v28, %v1450_v45  ;;  %v5135_v56 = vcombine.high %v3070_v6, %v3070_v6  ;;  %v1469_v31 = vrot.slane %v1468_v39, 4 }
  0x7e   : > { %v1462_v60 = vrot.slane %v1461_v48, 4  ;;  %v3517_v21 = vmax.f32 %v1437_v33, %v1438_v27  ;;  %v3525_v42 = vmax.f32 %v1444_v49, %v1445_v38  ;;  %v1457_v0 = vrot.slane %v1456_v40, 2 }
  0x7f   : > { %v1475_v36 = vsel %vm1285_vm0, %v5135_v56, -inf  ;;  %v1452_v35 = vrot.slane %v1451_v50, 1  ;;  %v1482_v30 = vsel %vm1285_vm0, %v3065_v4, -inf  ;;  %v5137_v28 = vcombine.high %v3065_v4, %v3065_v4 }
  0x80   : > { %5134 = vst [vmem:[#allocation35_spill] sm:$0xff] %v3517_v21  ;;  %5136 = vst [vmem:[#allocation36_spill] sm:$0xff] %v3525_v42  ;;  %v1463_v54 = vmax.f32 %v1461_v48, %v1462_v60  ;;  %v1476_v46 = vrot.slane %v1475_v36, 4  ;;  %v1458_v1 = vmax.f32 %v1456_v40, %v1457_v0  ;;  %v1470_v6 = vmax.f32 %v1468_v39, %v1469_v31 }
  0x81   : > { %v1489_v33 = vsel %vm1285_vm0, %v5137_v28, -inf  ;;  %v1483_v61 = vrot.slane %v1482_v30, 4  ;;  %v3533_v27 = vmax.f32 %v1451_v50, %v1452_v35  ;;  %v1496_v13 = vsel %vm1285_vm0, %v3079_v11, -inf }
  0x82   : > { %v1464_v44 = vrot.slane %v1463_v54, 2  ;;  %v1477_v49 = vmax.f32 %v1475_v36, %v1476_v46  ;;  %v1490_v45 = vrot.slane %v1489_v33, 4  ;;  %v1459_v48 = vrot.slane %v1458_v1, 1 }
  0x83   : > { %5138 = vst [vmem:[#allocation37_spill] sm:$0xff] %v3533_v27  ;;  %v1471_v60 = vrot.slane %v1470_v6, 2  ;;  %v1484_v56 = vmax.f32 %v1482_v30, %v1483_v61  ;;  %v1497_v4 = vrot.slane %v1496_v13, 4  ;;  %v5139_v40 = vcombine.high %v3079_v11, %v3079_v11 }
  0x84   : > { %v1465_v38 = vmax.f32 %v1463_v54, %v1464_v44  ;;  %v1478_v42 = vrot.slane %v1477_v49, 2  ;;  %v1491_v21 = vmax.f32 %v1489_v33, %v1490_v45  ;;  %v3541_v0 = vmax.f32 %v1458_v1, %v1459_v48 }
  0x85   : > { %v1503_v39 = vsel %vm1285_vm0, %v5139_v40, -inf  ;;  %v1472_v36 = vmax.f32 %v1470_v6, %v1471_v60  ;;  %v1485_v31 = vrot.slane %v1484_v56, 2  ;;  %v1498_v28 = vmax.f32 %v1496_v13, %v1497_v4 }
  0x86   : > { %v1466_v50 = vrot.slane %v1465_v38, 1  ;;  %v1479_v35 = vmax.f32 %v1477_v49, %v1478_v42  ;;  %v1492_v46 = vrot.slane %v1491_v21, 2  ;;  %v1504_v27 = vrot.slane %v1503_v39, 4 }
  0x87   : > { %v1473_v30 = vrot.slane %v1472_v36, 1  ;;  %v1486_v44 = vmax.f32 %v1484_v56, %v1485_v31  ;;  %v1510_v33 = vsel %vm1285_vm0, %v3085_v37, -inf  ;;  %v1499_v45 = vrot.slane %v1498_v28, 2 }
  0x88   : > { %v3543_v54 = vmax.f32 %v1465_v38, %v1466_v50  ;;  %v1480_v61 = vrot.slane %v1479_v35, 1  ;;  %v1493_v11 = vmax.f32 %v1491_v21, %v1492_v46  ;;  %v1505_v40 = vmax.f32 %v1503_v39, %v1504_v27 }
  0x89   : > { %v3547_v1 = vmax.f32 %v1472_v36, %v1473_v30  ;;  %v1487_v48 = vrot.slane %v1486_v44, 1  ;;  %v1511_v6 = vrot.slane %v1510_v33, 4  ;;  %v5140_v42 = vcombine.high %v3085_v37, %v3085_v37 }
  0x8a   : > { %v3553_v13 = vmax.f32 %v1479_v35, %v1480_v61  ;;  %v1494_v38 = vrot.slane %v1493_v11, 1  ;;  %v1500_v60 = vmax.f32 %v1498_v28, %v1499_v45  ;;  %v1506_v56 = vrot.slane %v1505_v40, 2 }
  0x8b   : > { %v1517_v49 = vsel %vm1285_vm0, %v5140_v42, -inf  ;;  %v3555_v4 = vmax.f32 %v1486_v44, %v1487_v48  ;;  %v1512_v50 = vmax.f32 %v1510_v33, %v1511_v6  ;;  %v1524_v27 = vsel %vm1285_vm0, %v3090_v41, -inf }
  0x8c   : > { %v1518_v21 = vrot.slane %v1517_v49, 4  ;;  %v3559_v39 = vmax.f32 %v1493_v11, %v1494_v38  ;;  %v1501_v36 = vrot.slane %v1500_v60, 1  ;;  %v1507_v31 = vmax.f32 %v1505_v40, %v1506_v56 }
  0x8d   : > { %5141 = vst [vmem:[#allocation38_spill] sm:$0xff] %v3555_v4  ;;  %v1525_v46 = vrot.slane %v1524_v27, 4  ;;  %v1513_v37 = vrot.slane %v1512_v50, 2  ;;  %v5143_v35 = vcombine.high %v3090_v41, %v3090_v41  ;;  %v1538_v44 = vsel %vm1285_vm0, %v3096_v53, -inf }
  0x8e   : > { %5142 = vst [vmem:[#allocation39_spill] sm:$0xff] %v3559_v39  ;;  %v1519_v30 = vmax.f32 %v1517_v49, %v1518_v21  ;;  %v3567_v33 = vmax.f32 %v1500_v60, %v1501_v36  ;;  %v1508_v61 = vrot.slane %v1507_v31, 1  ;;  %v1539_v42 = vrot.slane %v1538_v44, 4 }
  0x8f   : > { %v1531_v28 = vsel %vm1285_vm0, %v5143_v35, -inf  ;;  %v1526_v45 = vmax.f32 %v1524_v27, %v1525_v46  ;;  %v1514_v11 = vmax.f32 %v1512_v50, %v1513_v37  ;;  %v5145_v40 = vcombine.high %v3096_v53, %v3096_v53 }
  0x90   : > { %5144 = vst [vmem:[#allocation40_spill] sm:$0xff] %v3567_v33  ;;  %v1532_v48 = vrot.slane %v1531_v28, 4  ;;  %v1520_v6 = vrot.slane %v1519_v30, 2  ;;  %v3573_v38 = vmax.f32 %v1507_v31, %v1508_v61  ;;  %v1540_v60 = vmax.f32 %v1538_v44, %v1539_v42 }
  0x91   : > { %v1545_v49 = vsel %vm1285_vm0, %v5145_v40, -inf  ;;  %v1527_v41 = vrot.slane %v1526_v45, 2  ;;  %v1515_v35 = vrot.slane %v1514_v11, 1  ;;  %v1552_v27 = vsel %vm1285_vm0, %v3111_v14, -inf }
  0x92   : > { %v1533_v56 = vmax.f32 %v1531_v28, %v1532_v48  ;;  %v1546_v21 = vrot.slane %v1545_v49, 4  ;;  %v1521_v39 = vmax.f32 %v1519_v30, %v1520_v6  ;;  %v1553_v37 = vrot.slane %v1552_v27, 4 }
  0x93   : > { %v1528_v36 = vmax.f32 %v1526_v45, %v1527_v41  ;;  %v3577_v33 = vmax.f32 %v1514_v11, %v1515_v35  ;;  %v1541_v4 = vrot.slane %v1540_v60, 2  ;;  %v5147_v31 = vcombine.high %v3111_v14, %v3111_v14 }
  0x94   : > { %v1534_v50 = vrot.slane %v1533_v56, 2  ;;  %v1547_v46 = vmax.f32 %v1545_v49, %v1546_v21  ;;  %v1522_v53 = vrot.slane %v1521_v39, 1  ;;  %v1554_v44 = vmax.f32 %v1552_v27, %v1553_v37 }
  0x95   : > { %5146 = vst [vmem:[#allocation41_spill] sm:$0xff] %v3577_v33  ;;  %v1559_v28 = vsel %vm1285_vm0, %v5147_v31, -inf  ;;  %v1529_v61 = vrot.slane %v1528_v36, 1  ;;  %v1542_v42 = vmax.f32 %v1540_v60, %v1541_v4  ;;  %v1566_v40 = vsel %vm1285_vm0, %v3106_v3, -inf }
  0x96   : > { %v1535_v48 = vmax.f32 %v1533_v56, %v1534_v50  ;;  %v1548_v30 = vrot.slane %v1547_v46, 2  ;;  %v3583_v6 = vmax.f32 %v1521_v39, %v1522_v53  ;;  %v1560_v45 = vrot.slane %v1559_v28, 4 }
  0x97   : > { %v3587_v11 = vmax.f32 %v1528_v36, %v1529_v61  ;;  %v1555_v21 = vrot.slane %v1554_v44, 2  ;;  %v1543_v35 = vrot.slane %v1542_v42, 1  ;;  %v1567_v33 = vrot.slane %v1566_v40, 4 }
  0x98   : > { %v1536_v49 = vrot.slane %v1535_v48, 1  ;;  %v1549_v41 = vmax.f32 %v1547_v46, %v1548_v30  ;;  %v1561_v14 = vmax.f32 %v1559_v28, %v1560_v45  ;;  %v5148_v56 = vcombine.high %v3106_v3, %v3106_v3 }
  0x99   : > { %v1556_v60 = vmax.f32 %v1554_v44, %v1555_v21  ;;  %v3595_v37 = vmax.f32 %v1542_v42, %v1543_v35  ;;  %v1568_v53 = vmax.f32 %v1566_v40, %v1567_v33  ;;  %v1580_v46 = vsel %vm1285_vm0, %v3118_v15, -inf }
  0x9a   : > { %v1573_v27 = vsel %vm1285_vm0, %v5148_v56, -inf  ;;  %v3593_v39 = vmax.f32 %v1535_v48, %v1536_v49  ;;  %v1550_v4 = vrot.slane %v1549_v41, 1  ;;  %v1562_v36 = vrot.slane %v1561_v14, 2 }
  0x9b   : > { %v1574_v50 = vrot.slane %v1573_v27, 4  ;;  %5149 = vst [vmem:[#allocation42_spill] sm:$0xff] %v3595_v37  ;;  %v1557_v28 = vrot.slane %v1556_v60, 1  ;;  %v1581_v30 = vrot.slane %v1580_v46, 4  ;;  %v1569_v45 = vrot.slane %v1568_v53, 2 }
  0x9c   : > { %v3599_v31 = vmax.f32 %v1549_v41, %v1550_v4  ;;  %v1563_v3 = vmax.f32 %v1561_v14, %v1562_v36  ;;  %v5151_v48 = vcombine.high %v3118_v15, %v3118_v15  ;;  %v1594_v42 = vsel %vm1285_vm0, %v3124_v17, -inf }
  0x9d   : > { %v1575_v61 = vmax.f32 %v1573_v27, %v1574_v50  ;;  %v3607_v49 = vmax.f32 %v1556_v60, %v1557_v28  ;;  %v1582_v40 = vmax.f32 %v1580_v46, %v1581_v30  ;;  %v1570_v35 = vmax.f32 %v1568_v53, %v1569_v45 }
  0x9e   : > { %5150 = vst [vmem:[#allocation43_spill] sm:$0xff] %v3599_v31  ;;  %v1587_v44 = vsel %vm1285_vm0, %v5151_v48, -inf  ;;  %v1564_v41 = vrot.slane %v1563_v3, 1  ;;  %v1595_v56 = vrot.slane %v1594_v42, 4  ;;  %v5153_v14 = vcombine.high %v3124_v17, %v3124_v17 }
  0x9f   : > { %5152 = vst [vmem:[#allocation44_spill] sm:$0xff] %v3607_v49  ;;  %v1576_v33 = vrot.slane %v1575_v61, 2  ;;  %v1588_v21 = vrot.slane %v1587_v44, 4  ;;  %v1583_v15 = vrot.slane %v1582_v40, 2  ;;  %v1571_v31 = vrot.slane %v1570_v35, 1 }
  0xa0   : > { %v1601_v27 = vsel %vm1285_vm0, %v5153_v14, -inf  ;;  %v3613_v48 = vmax.f32 %v1563_v3, %v1564_v41  ;;  %v1596_v60 = vmax.f32 %v1594_v42, %v1595_v56  ;;  %v1608_v46 = vsel %vm1285_vm0, %v3131_v16, -inf }
  0xa1   : > { %v1577_v4 = vmax.f32 %v1575_v61, %v1576_v33  ;;  %v1589_v50 = vmax.f32 %v1587_v44, %v1588_v21  ;;  %v1602_v36 = vrot.slane %v1601_v27, 4  ;;  %v1584_v30 = vmax.f32 %v1582_v40, %v1583_v15 }
  0xa2   : > { %5154 = vst [vmem:[#allocation45_spill] sm:$0xff] %v3613_v48  ;;  %v3617_v49 = vmax.f32 %v1570_v35, %v1571_v31  ;;  %v1597_v17 = vrot.slane %v1596_v60, 2  ;;  %v1609_v37 = vrot.slane %v1608_v46, 4  ;;  %v5155_v61 = vcombine.high %v3131_v16, %v3131_v16 }
  0xa3   : > { %v1578_v28 = vrot.slane %v1577_v4, 1  ;;  %v1590_v53 = vrot.slane %v1589_v50, 2  ;;  %v1603_v45 = vmax.f32 %v1601_v27, %v1602_v36  ;;  %v1585_v33 = vrot.slane %v1584_v30, 1 }
  0xa4   : > { %v1615_v44 = vsel %vm1285_vm0, %v5155_v61, -inf  ;;  %v1598_v41 = vmax.f32 %v1596_v60, %v1597_v17  ;;  %v1610_v56 = vmax.f32 %v1608_v46, %v1609_v37  ;;  %v1622_v40 = vsel %vm1285_vm0, %v3135_v63, -inf }
  0xa5   : > { %v3623_v3 = vmax.f32 %v1577_v4, %v1578_v28  ;;  %v1591_v42 = vmax.f32 %v1589_v50, %v1590_v53  ;;  %v1604_v21 = vrot.slane %v1603_v45, 2  ;;  %v1616_v14 = vrot.slane %v1615_v44, 4 }
  0xa6   : > { %v3627_v31 = vmax.f32 %v1584_v30, %v1585_v33  ;;  %v1623_v15 = vrot.slane %v1622_v40, 4  ;;  %v1599_v36 = vrot.slane %v1598_v41, 1  ;;  %v1611_v16 = vrot.slane %v1610_v56, 2 }
  0xa7   : > { %v1592_v35 = vrot.slane %v1591_v42, 1  ;;  %v1605_v27 = vmax.f32 %v1603_v45, %v1604_v21  ;;  %v1617_v48 = vmax.f32 %v1615_v44, %v1616_v14  ;;  %v5156_v4 = vcombine.high %v3135_v63, %v3135_v63 }
  0xa8   : > { %v1624_v60 = vmax.f32 %v1622_v40, %v1623_v15  ;;  %v3635_v53 = vmax.f32 %v1598_v41, %v1599_v36  ;;  %v1612_v30 = vmax.f32 %v1610_v56, %v1611_v16  ;;  %v1636_v45 = vsel %vm1285_vm0, %v3144_v10, -inf }
  0xa9   : > { %v1629_v50 = vsel %vm1285_vm0, %v5156_v4, -inf  ;;  %v3633_v28 = vmax.f32 %v1591_v42, %v1592_v35  ;;  %v1606_v37 = vrot.slane %v1605_v27, 1  ;;  %v1618_v17 = vrot.slane %v1617_v48, 2 }
  0xaa   : > { %v1630_v46 = vrot.slane %v1629_v50, 4  ;;  %5157 = vst [vmem:[#allocation46_spill] sm:$0xff] %v3635_v53  ;;  %v1625_v44 = vrot.slane %v1624_v60, 2  ;;  %v1637_v21 = vrot.slane %v1636_v45, 4  ;;  %v1613_v63 = vrot.slane %v1612_v30, 1 }
  0xab   : > { %v3639_v61 = vmax.f32 %v1605_v27, %v1606_v37  ;;  %v1619_v14 = vmax.f32 %v1617_v48, %v1618_v17  ;;  %v5159_v42 = vcombine.high %v3144_v10, %v3144_v10  ;;  %v1650_v41 = vsel %vm1285_vm0, %v3148_v59, -inf }
  0xac   : > { %v1631_v33 = vmax.f32 %v1629_v50, %v1630_v46  ;;  %v1626_v56 = vmax.f32 %v1624_v60, %v1625_v44  ;;  %v1638_v15 = vmax.f32 %v1636_v45, %v1637_v21  ;;  %v3647_v16 = vmax.f32 %v1612_v30, %v1613_v63 }
  0xad   : > { %5158 = vst [vmem:[#allocation47_spill] sm:$0xff] %v3639_v61  ;;  %v1643_v40 = vsel %vm1285_vm0, %v5159_v42, -inf  ;;  %v1620_v27 = vrot.slane %v1619_v14, 1  ;;  %v1651_v4 = vrot.slane %v1650_v41, 4  ;;  %v5161_v50 = vcombine.high %v3148_v59, %v3148_v59 }
  0xae   : > { %v1632_v35 = vrot.slane %v1631_v33, 2  ;;  %v1644_v36 = vrot.slane %v1643_v40, 4  ;;  %5160 = vst [vmem:[#allocation48_spill] sm:$0xff] %v3647_v16  ;;  %v1627_v37 = vrot.slane %v1626_v56, 1  ;;  %v1639_v46 = vrot.slane %v1638_v15, 2 }
  0xaf   : > { %v1657_v48 = vsel %vm1285_vm0, %v5161_v50, -inf  ;;  %v3653_v42 = vmax.f32 %v1619_v14, %v1620_v27  ;;  %v1652_v61 = vmax.f32 %v1650_v41, %v1651_v4  ;;  %v1664_v45 = vsel %vm1285_vm0, %v3155_v2, -inf }
  0xb0   : > { %v1633_v10 = vmax.f32 %v1631_v33, %v1632_v35  ;;  %v1645_v17 = vmax.f32 %v1643_v40, %v1644_v36  ;;  %v1658_v60 = vrot.slane %v1657_v48, 4  ;;  %v3657_v30 = vmax.f32 %v1626_v56, %v1627_v37 }
  0xb1   : > { %v1640_v21 = vmax.f32 %v1638_v15, %v1639_v46  ;;  %v1653_v16 = vrot.slane %v1652_v61, 2  ;;  %v1665_v53 = vrot.slane %v1664_v45, 4  ;;  %v5163_v33 = vcombine.high %v3155_v2, %v3155_v2 }
  0xb2   : > { %5162 = vst [vmem:[#allocation49_spill] sm:$0xff] %v3657_v30  ;;  %v1634_v44 = vrot.slane %v1633_v10, 1  ;;  %v1646_v63 = vrot.slane %v1645_v17, 2  ;;  %v1659_v59 = vmax.f32 %v1657_v48, %v1658_v60  ;;  %v1678_v15 = vsel %vm1285_vm0, %v3165_v24, -inf }
  0xb3   : > { %v1671_v40 = vsel %vm1285_vm0, %v5163_v33, -inf  ;;  %v1641_v41 = vrot.slane %v1640_v21, 1  ;;  %v1654_v27 = vmax.f32 %v1652_v61, %v1653_v16  ;;  %v1666_v56 = vmax.f32 %v1664_v45, %v1665_v53 }
  0xb4   : > { %v3663_v14 = vmax.f32 %v1633_v10, %v1634_v44  ;;  %v1647_v35 = vmax.f32 %v1645_v17, %v1646_v63  ;;  %v1672_v36 = vrot.slane %v1671_v40, 4  ;;  %v1660_v4 = vrot.slane %v1659_v59, 2 }
  0xb5   : > { %v3667_v50 = vmax.f32 %v1640_v21, %v1641_v41  ;;  %v1679_v46 = vrot.slane %v1678_v15, 4  ;;  %v1655_v60 = vrot.slane %v1654_v27, 1  ;;  %v1667_v30 = vrot.slane %v1666_v56, 2 }
  0xb6   : > { %v1648_v48 = vrot.slane %v1647_v35, 1  ;;  %v1673_v37 = vmax.f32 %v1671_v40, %v1672_v36  ;;  %v1661_v2 = vmax.f32 %v1659_v59, %v1660_v4  ;;  %v5164_v10 = vcombine.high %v3165_v24, %v3165_v24 }
  0xb7   : > { %v1680_v53 = vmax.f32 %v1678_v15, %v1679_v46  ;;  %v3675_v45 = vmax.f32 %v1654_v27, %v1655_v60  ;;  %v1668_v63 = vmax.f32 %v1666_v56, %v1667_v30  ;;  %v1692_v33 = vsel %vm1285_vm0, %v3172_v8, -inf }
  0xb8   : > { %v1685_v17 = vsel %vm1285_vm0, %v5164_v10, -inf  ;;  %v3673_v44 = vmax.f32 %v1647_v35, %v1648_v48  ;;  %v1674_v61 = vrot.slane %v1673_v37, 2  ;;  %v1662_v21 = vrot.slane %v1661_v2, 1 }
  0xb9   : > { %v1686_v16 = vrot.slane %v1685_v17, 4  ;;  %5165 = vst [vmem:[#allocation50_spill] sm:$0xff] %v3675_v45  ;;  %v1681_v59 = vrot.slane %v1680_v53, 2  ;;  %v1693_v36 = vrot.slane %v1692_v33, 4  ;;  %v1669_v24 = vrot.slane %v1668_v63, 1 }
  0xba   : > { %v1675_v40 = vmax.f32 %v1673_v37, %v1674_v61  ;;  %v3679_v4 = vmax.f32 %v1661_v2, %v1662_v21  ;;  %v5167_v35 = vcombine.high %v3172_v8, %v3172_v8  ;;  %v1706_v27 = vsel %vm1285_vm0, %v3176_v5, -inf }
  0xbb   : > { %v1687_v41 = vmax.f32 %v1685_v17, %v1686_v16  ;;  %v1682_v30 = vmax.f32 %v1680_v53, %v1681_v59  ;;  %v1694_v46 = vmax.f32 %v1692_v33, %v1693_v36  ;;  %v3687_v60 = vmax.f32 %v1668_v63, %v1669_v24 }
  0xbc   : > { %5166 = vst [vmem:[#allocation51_spill] sm:$0xff] %v3679_v4  ;;  %v1699_v15 = vsel %vm1285_vm0, %v5167_v35, -inf  ;;  %v1676_v48 = vrot.slane %v1675_v40, 1  ;;  %v1707_v10 = vrot.slane %v1706_v27, 4  ;;  %v5169_v2 = vcombine.high %v3176_v5, %v3176_v5 }
  0xbd   : > { %v1688_v56 = vrot.slane %v1687_v41, 2  ;;  %5168 = vst [vmem:[#allocation52_spill] sm:$0xff] %v3687_v60  ;;  %v1700_v37 = vrot.slane %v1699_v15, 4  ;;  %v1683_v8 = vrot.slane %v1682_v30, 1  ;;  %v1695_v21 = vrot.slane %v1694_v46, 2 }
  0xbe   : > { %v1713_v17 = vsel %vm1285_vm0, %v5169_v2, -inf  ;;  %v3693_v61 = vmax.f32 %v1675_v40, %v1676_v48  ;;  %v1708_v4 = vmax.f32 %v1706_v27, %v1707_v10  ;;  %v1720_v53 = vsel %vm1285_vm0, %v3183_v43, -inf }
  0xbf   : > { %v1689_v16 = vmax.f32 %v1687_v41, %v1688_v56  ;;  %v1701_v35 = vmax.f32 %v1699_v15, %v1700_v37  ;;  %v1714_v45 = vrot.slane %v1713_v17, 4  ;;  %v3697_v63 = vmax.f32 %v1682_v30, %v1683_v8 }
  0xc0   : > { %5170 = vst [vmem:[#allocation53_spill] sm:$0xff] %v3693_v61  ;;  %v1696_v59 = vmax.f32 %v1694_v46, %v1695_v21  ;;  %v1721_v36 = vrot.slane %v1720_v53, 4  ;;  %v1709_v5 = vrot.slane %v1708_v4, 2  ;;  %v5171_v40 = vcombine.high %v3183_v43, %v3183_v43 }
  0xc1   : > { %v1690_v33 = vrot.slane %v1689_v16, 1  ;;  %v1702_v24 = vrot.slane %v1701_v35, 2  ;;  %v1715_v60 = vmax.f32 %v1713_v17, %v1714_v45  ;;  %v1734_v46 = vsel %vm1285_vm0, %v3187_v62, -inf }
  0xc2   : > { %v1727_v41 = vsel %vm1285_vm0, %v5171_v40, -inf  ;;  %v1697_v15 = vrot.slane %v1696_v59, 1  ;;  %v1722_v27 = vmax.f32 %v1720_v53, %v1721_v36  ;;  %v1710_v10 = vmax.f32 %v1708_v4, %v1709_v5 }
  0xc3   : > { %v3703_v48 = vmax.f32 %v1689_v16, %v1690_v33  ;;  %v1728_v56 = vrot.slane %v1727_v41, 4  ;;  %v1703_v37 = vmax.f32 %v1701_v35, %v1702_v24  ;;  %v1716_v30 = vrot.slane %v1715_v60, 2 }
  0xc4   : > { %v3707_v2 = vmax.f32 %v1696_v59, %v1697_v15  ;;  %v1723_v8 = vrot.slane %v1722_v27, 2  ;;  %v1735_v17 = vrot.slane %v1734_v46, 4  ;;  %v1711_v43 = vrot.slane %v1710_v10, 1 }
  0xc5   : > { %v1729_v45 = vmax.f32 %v1727_v41, %v1728_v56  ;;  %v1704_v21 = vrot.slane %v1703_v37, 1  ;;  %v1717_v61 = vmax.f32 %v1715_v60, %v1716_v30  ;;  %v5172_v16 = vcombine.high %v3187_v62, %v3187_v62 }
  0xc6   : > { %v1724_v33 = vmax.f32 %v1722_v27, %v1723_v8  ;;  %v1736_v4 = vmax.f32 %v1734_v46, %v1735_v17  ;;  %v3715_v5 = vmax.f32 %v1710_v10, %v1711_v43  ;;  %v1748_v40 = vsel %vm1285_vm0, %v3196_v58, -inf }
  0xc7   : > { %v1741_v53 = vsel %vm1285_vm0, %v5172_v16, -inf  ;;  %v1730_v35 = vrot.slane %v1729_v45, 2  ;;  %v3713_v24 = vmax.f32 %v1703_v37, %v1704_v21  ;;  %v1718_v59 = vrot.slane %v1717_v61, 1 }
  0xc8   : > { %v1742_v36 = vrot.slane %v1741_v53, 4  ;;  %5173 = vst [vmem:[#allocation54_spill] sm:$0xff] %v3715_v5  ;;  %v1725_v41 = vrot.slane %v1724_v33, 1  ;;  %v1737_v60 = vrot.slane %v1736_v4, 2  ;;  %v1749_v62 = vrot.slane %v1748_v40, 4 }
  0xc9   : > { %v1731_v15 = vmax.f32 %v1729_v45, %v1730_v35  ;;  %v3719_v30 = vmax.f32 %v1717_v61, %v1718_v59  ;;  %v5175_v27 = vcombine.high %v3196_v58, %v3196_v58  ;;  %v1762_v37 = vsel %vm1285_vm0, %v3200_v23, -inf }
  0xca   : > { %v1743_v56 = vmax.f32 %v1741_v53, %v1742_v36  ;;  %v3727_v10 = vmax.f32 %v1724_v33, %v1725_v41  ;;  %v1738_v17 = vmax.f32 %v1736_v4, %v1737_v60  ;;  %v1750_v43 = vmax.f32 %v1748_v40, %v1749_v62 }
  0xcb   : > { %5174 = vst [vmem:[#allocation55_spill] sm:$0xff] %v3719_v30  ;;  %v1755_v46 = vsel %vm1285_vm0, %v5175_v27, -inf  ;;  %v1732_v8 = vrot.slane %v1731_v15, 1  ;;  %v1763_v16 = vrot.slane %v1762_v37, 4  ;;  %v5177_v61 = vcombine.high %v3200_v23, %v3200_v23 }
  0xcc   : > { %5176 = vst [vmem:[#allocation56_spill] sm:$0xff] %v3727_v10  ;;  %v1744_v21 = vrot.slane %v1743_v56, 2  ;;  %v1756_v45 = vrot.slane %v1755_v46, 4  ;;  %v1739_v58 = vrot.slane %v1738_v17, 1  ;;  %v1751_v27 = vrot.slane %v1750_v43, 2 }
  0xcd   : > { %v1769_v53 = vsel %vm1285_vm0, %v5177_v61, -inf  ;;  %v3733_v35 = vmax.f32 %v1731_v15, %v1732_v8  ;;  %v1764_v33 = vmax.f32 %v1762_v37, %v1763_v16  ;;  %v1776_v4 = vsel %vm1285_vm0, %v3207_v52, -inf }
  0xce   : > { %v1745_v36 = vmax.f32 %v1743_v56, %v1744_v21  ;;  %v1770_v59 = vrot.slane %v1769_v53, 4  ;;  %v1757_v30 = vmax.f32 %v1755_v46, %v1756_v45  ;;  %v3737_v41 = vmax.f32 %v1738_v17, %v1739_v58 }
  0xcf   : > { %v1777_v62 = vrot.slane %v1776_v4, 4  ;;  %v1752_v10 = vmax.f32 %v1750_v43, %v1751_v27  ;;  %v1765_v5 = vrot.slane %v1764_v33, 2  ;;  %v5179_v15 = vcombine.high %v3207_v52, %v3207_v52 }
  0xd0   : > { %5178 = vst [vmem:[#allocation57_spill] sm:$0xff] %v3737_v41  ;;  %v1746_v40 = vrot.slane %v1745_v36, 1  ;;  %v1771_v60 = vmax.f32 %v1769_v53, %v1770_v59  ;;  %v1758_v23 = vrot.slane %v1757_v30, 2  ;;  %v1790_v61 = vsel %vm1285_vm0, %v3217_v34, -inf }
  0xd1   : > { %v1783_v56 = vsel %vm1285_vm0, %v5179_v15, -inf  ;;  %v1778_v37 = vmax.f32 %v1776_v4, %v1777_v62  ;;  %v1753_v45 = vrot.slane %v1752_v10, 1  ;;  %v1766_v17 = vmax.f32 %v1764_v33, %v1765_v5  ;;  %v5185_v15 = vld [vmem:[#allocation2_spill] sm:$0xff] }
  0xd2   : > { %v3743_v8 = vmax.f32 %v1745_v36, %v1746_v40  ;;  %v1772_v46 = vrot.slane %v1771_v60, 2  ;;  %v1784_v21 = vrot.slane %v1783_v56, 4  ;;  %v1759_v16 = vmax.f32 %v1757_v30, %v1758_v23 }
  0xd3   : > { %v1779_v43 = vrot.slane %v1778_v37, 2  ;;  %v1791_v59 = vrot.slane %v1790_v61, 4  ;;  %v3747_v27 = vmax.f32 %v1752_v10, %v1753_v45  ;;  %v1767_v41 = vrot.slane %v1766_v17, 1 }
  0xd4   : > { %5180 = vst [vmem:[#allocation58_spill] sm:$0xff] %v3743_v8  ;;  %v1773_v53 = vmax.f32 %v1771_v60, %v1772_v46  ;;  %v1785_v58 = vmax.f32 %v1783_v56, %v1784_v21  ;;  %v1760_v52 = vrot.slane %v1759_v16, 1  ;;  %v5182_v36 = vcombine.high %v3217_v34, %v3217_v34 }
  0xd5   : > { %5181 = vst [vmem:[#allocation59_spill] sm:$0xff] %v3747_v27  ;;  %v1780_v62 = vmax.f32 %v1778_v37, %v1779_v43  ;;  %v1792_v5 = vmax.f32 %v1790_v61, %v1791_v59  ;;  %v3755_v23 = vmax.f32 %v1766_v17, %v1767_v41  ;;  %v1804_v10 = vsel %vm1285_vm0, %v5185_v15, -inf }
  0xd6   : > { %v1797_v4 = vsel %vm1285_vm0, %v5182_v36, -inf  ;;  %v1774_v40 = vrot.slane %v1773_v53, 1  ;;  %v1786_v30 = vrot.slane %v1785_v58, 2  ;;  %v3753_v33 = vmax.f32 %v1759_v16, %v1760_v52  ;;  %v5188_v16 = vld [vmem:[#allocation3_spill] sm:$0xff] }
  0xd7   : > { %5184 = vst [vmem:[#allocation61_spill] sm:$0xff] %v3755_v23  ;;  %v1798_v60 = vrot.slane %v1797_v4, 4  ;;  %v1781_v46 = vrot.slane %v1780_v62, 1  ;;  %v1793_v45 = vrot.slane %v1792_v5, 2  ;;  %v1805_v27 = vrot.slane %v1804_v10, 4 }
  0xd8   : > { %5183 = vst [vmem:[#allocation60_spill] sm:$0xff] %v3753_v33  ;;  %v3759_v56 = vmax.f32 %v1773_v53, %v1774_v40  ;;  %v1787_v21 = vmax.f32 %v1785_v58, %v1786_v30  ;;  %v5187_v37 = vcombine.high %v5185_v15, %v5185_v15  ;;  %v1818_v41 = vsel %vm1285_vm0, %v5188_v16, -inf }
  0xd9   : > { %v1799_v34 = vmax.f32 %v1797_v4, %v1798_v60  ;;  %v3767_v17 = vmax.f32 %v1780_v62, %v1781_v46  ;;  %v1794_v59 = vmax.f32 %v1792_v5, %v1793_v45  ;;  %v1806_v36 = vmax.f32 %v1804_v10, %v1805_v27  ;;  %v5192_v46 = vld [vmem:[#allocation4_spill] sm:$0xff] }
  0xda   : > { %5186 = vst [vmem:[#allocation2_spill] sm:$0xff] %v3759_v56  ;;  %v1811_v61 = vsel %vm1285_vm0, %v5187_v37, -inf  ;;  %v1788_v43 = vrot.slane %v1787_v21, 1  ;;  %v1819_v40 = vrot.slane %v1818_v41, 4  ;;  %v5190_v58 = vcombine.high %v5188_v16, %v5188_v16 }
  0xdb   : > { %5189 = vst [vmem:[#allocation3_spill] sm:$0xff] %v3767_v17  ;;  %v1812_v52 = vrot.slane %v1811_v61, 4  ;;  %v1800_v53 = vrot.slane %v1799_v34, 2  ;;  %v1795_v60 = vrot.slane %v1794_v59, 1  ;;  %v1807_v23 = vrot.slane %v1806_v36, 2 }
  0xdc   : > { %v1825_v4 = vsel %vm1285_vm0, %v5190_v58, -inf  ;;  %v3773_v30 = vmax.f32 %v1787_v21, %v1788_v43  ;;  %v1820_v62 = vmax.f32 %v1818_v41, %v1819_v40  ;;  %v1832_v5 = vsel %vm1285_vm0, %v5192_v46, -inf  ;;  %v5196_v58 = vld [vmem:[#allocation5_spill] sm:$0xff] }
  0xdd   : > { %v1813_v15 = vmax.f32 %v1811_v61, %v1812_v52  ;;  %v1826_v37 = vrot.slane %v1825_v4, 4  ;;  %v1801_v56 = vmax.f32 %v1799_v34, %v1800_v53  ;;  %v3777_v45 = vmax.f32 %v1794_v59, %v1795_v60 }
  0xde   : > { %5191 = vst [vmem:[#allocation62_spill] sm:$0xff] %v3773_v30  ;;  %v1833_v17 = vrot.slane %v1832_v5, 4  ;;  %v1808_v16 = vmax.f32 %v1806_v36, %v1807_v23  ;;  %v1821_v8 = vrot.slane %v1820_v62, 2  ;;  %v5194_v21 = vcombine.high %v5192_v46, %v5192_v46 }
  0xdf   : > { %5193 = vst [vmem:[#allocation4_spill] sm:$0xff] %v3777_v45  ;;  %v1814_v27 = vrot.slane %v1813_v15, 2  ;;  %v1827_v10 = vmax.f32 %v1825_v4, %v1826_v37  ;;  %v1802_v33 = vrot.slane %v1801_v56, 1  ;;  %v1846_v4 = vsel %vm1285_vm0, %v5196_v58, -inf }
  0xe0   : > { %v1839_v61 = vsel %vm1285_vm0, %v5194_v21, -inf  ;;  %v1834_v52 = vmax.f32 %v1832_v5, %v1833_v17  ;;  %v1809_v40 = vrot.slane %v1808_v16, 1  ;;  %v1822_v59 = vmax.f32 %v1820_v62, %v1821_v8  ;;  %v5201_v21 = vld [vmem:[#allocation6_spill] sm:$0xff] }
  0xe1   : > { %v1815_v43 = vmax.f32 %v1813_v15, %v1814_v27  ;;  %v1828_v34 = vrot.slane %v1827_v10, 2  ;;  %v1840_v41 = vrot.slane %v1839_v61, 4  ;;  %v3783_v53 = vmax.f32 %v1801_v56, %v1802_v33 }
  0xe2   : > { %v1835_v23 = vrot.slane %v1834_v52, 2  ;;  %v3787_v30 = vmax.f32 %v1808_v16, %v1809_v40  ;;  %v1823_v46 = vrot.slane %v1822_v59, 1  ;;  %v1847_v45 = vrot.slane %v1846_v4, 4 }
  0xe3   : > { %5195 = vst [vmem:[#allocation63_spill] sm:$0xff] %v3783_v53  ;;  %v1816_v60 = vrot.slane %v1815_v43, 1  ;;  %v1829_v37 = vmax.f32 %v1827_v10, %v1828_v34  ;;  %v1841_v36 = vmax.f32 %v1839_v61, %v1840_v41  ;;  %v5198_v15 = vcombine.high %v5196_v58, %v5196_v58 }
  0xe4   : > { %5197 = vst [vmem:[#allocation5_spill] sm:$0xff] %v3787_v30  ;;  %v1836_v8 = vmax.f32 %v1834_v52, %v1835_v23  ;;  %v3795_v5 = vmax.f32 %v1822_v59, %v1823_v46  ;;  %v1848_v27 = vmax.f32 %v1846_v4, %v1847_v45  ;;  %v1860_v16 = vsel %vm1285_vm0, %v5201_v21, -inf }
  0xe5   : > { %v1853_v17 = vsel %vm1285_vm0, %v5198_v15, -inf  ;;  %v3793_v33 = vmax.f32 %v1815_v43, %v1816_v60  ;;  %v1830_v56 = vrot.slane %v1829_v37, 1  ;;  %v1842_v62 = vrot.slane %v1841_v36, 2  ;;  %v5204_v60 = vld [vmem:[#allocation7_spill] sm:$0xff] }
  0xe6   : > { %5200 = vst [vmem:[#allocation65_spill] sm:$0xff] %v3795_v5  ;;  %v1854_v10 = vrot.slane %v1853_v17, 4  ;;  %v1837_v34 = vrot.slane %v1836_v8, 1  ;;  %v1861_v40 = vrot.slane %v1860_v16, 4  ;;  %v1849_v58 = vrot.slane %v1848_v27, 2 }
  0xe7   : > { %5199 = vst [vmem:[#allocation64_spill] sm:$0xff] %v3793_v33  ;;  %v3799_v61 = vmax.f32 %v1829_v37, %v1830_v56  ;;  %v1843_v41 = vmax.f32 %v1841_v36, %v1842_v62  ;;  %v5203_v43 = vcombine.high %v5201_v21, %v5201_v21  ;;  %v1874_v59 = vsel %vm1285_vm0, %v5204_v60, -inf }
  0xe8   : > { %v1855_v30 = vmax.f32 %v1853_v17, %v1854_v10  ;;  %v3807_v45 = vmax.f32 %v1836_v8, %v1837_v34  ;;  %v1862_v23 = vmax.f32 %v1860_v16, %v1861_v40  ;;  %v1850_v37 = vmax.f32 %v1848_v27, %v1849_v58  ;;  %v5208_v34 = vld [vmem:[#allocation8_spill] sm:$0xff] }
  0xe9   : > { %5202 = vst [vmem:[#allocation6_spill] sm:$0xff] %v3799_v61  ;;  %v1867_v52 = vsel %vm1285_vm0, %v5203_v43, -inf  ;;  %v1844_v4 = vrot.slane %v1843_v41, 1  ;;  %v1875_v56 = vrot.slane %v1874_v59, 4  ;;  %v5206_v36 = vcombine.high %v5204_v60, %v5204_v60 }
  0xea   : > { %5205 = vst [vmem:[#allocation7_spill] sm:$0xff] %v3807_v45  ;;  %v1868_v46 = vrot.slane %v1867_v52, 4  ;;  %v1856_v15 = vrot.slane %v1855_v30, 2  ;;  %v1863_v10 = vrot.slane %v1862_v23, 2  ;;  %v1851_v61 = vrot.slane %v1850_v37, 1 }
  0xeb   : > { %v1881_v17 = vsel %vm1285_vm0, %v5206_v36, -inf  ;;  %v3813_v62 = vmax.f32 %v1843_v41, %v1844_v4  ;;  %v1876_v8 = vmax.f32 %v1874_v59, %v1875_v56  ;;  %v1888_v16 = vsel %vm1285_vm0, %v5208_v34, -inf  ;;  %v5212_v36 = vld [vmem:[#allocation9_spill] sm:$0xff] }
  0xec   : > { %v1869_v21 = vmax.f32 %v1867_v52, %v1868_v46  ;;  %v1882_v43 = vrot.slane %v1881_v17, 4  ;;  %v1857_v5 = vmax.f32 %v1855_v30, %v1856_v15  ;;  %v1864_v40 = vmax.f32 %v1862_v23, %v1863_v10 }
  0xed   : > { %5207 = vst [vmem:[#allocation66_spill] sm:$0xff] %v3813_v62  ;;  %v1889_v45 = vrot.slane %v1888_v16, 4  ;;  %v3817_v33 = vmax.f32 %v1850_v37, %v1851_v61  ;;  %v1877_v53 = vrot.slane %v1876_v8, 2  ;;  %v5210_v41 = vcombine.high %v5208_v34, %v5208_v34 }
  0xee   : > { %v1870_v27 = vrot.slane %v1869_v21, 2  ;;  %v1883_v58 = vmax.f32 %v1881_v17, %v1882_v43  ;;  %v1858_v60 = vrot.slane %v1857_v5, 1  ;;  %v1865_v4 = vrot.slane %v1864_v40, 1 }
  0xef   : > { %5209 = vst [vmem:[#allocation8_spill] sm:$0xff] %v3817_v33  ;;  %v1895_v52 = vsel %vm1285_vm0, %v5210_v41, -inf  ;;  %v1890_v59 = vmax.f32 %v1888_v16, %v1889_v45  ;;  %v1878_v56 = vmax.f32 %v1876_v8, %v1877_v53  ;;  %v1902_v17 = vsel %vm1285_vm0, %v5212_v36, -inf  ;;  %v5217_v41 = vld [vmem:[#allocation10_spill] sm:$0xff] }
  0xf0   : > { %v1871_v46 = vmax.f32 %v1869_v21, %v1870_v27  ;;  %v1884_v30 = vrot.slane %v1883_v58, 2  ;;  %v3823_v15 = vmax.f32 %v1857_v5, %v1858_v60  ;;  %v1896_v23 = vrot.slane %v1895_v52, 4 }
  0xf1   : > { %v3827_v61 = vmax.f32 %v1864_v40, %v1865_v4  ;;  %v1891_v43 = vrot.slane %v1890_v59, 2  ;;  %v1879_v33 = vrot.slane %v1878_v56, 1  ;;  %v1903_v62 = vrot.slane %v1902_v17, 4 }
  0xf2   : > { %5211 = vst [vmem:[#allocation67_spill] sm:$0xff] %v3823_v15  ;;  %v1872_v37 = vrot.slane %v1871_v46, 1  ;;  %v1885_v10 = vmax.f32 %v1883_v58, %v1884_v30  ;;  %v1897_v34 = vmax.f32 %v1895_v52, %v1896_v23  ;;  %v5214_v21 = vcombine.high %v5212_v36, %v5212_v36 }
  0xf3   : > { %5213 = vst [vmem:[#allocation9_spill] sm:$0xff] %v3827_v61  ;;  %v1892_v8 = vmax.f32 %v1890_v59, %v1891_v43  ;;  %v3835_v27 = vmax.f32 %v1878_v56, %v1879_v33  ;;  %v1904_v60 = vmax.f32 %v1902_v17, %v1903_v62  ;;  %v1916_v58 = vsel %vm1285_vm0, %v5217_v41, -inf }
  0xf4   : > { %v1909_v45 = vsel %vm1285_vm0, %v5214_v21, -inf  ;;  %v3833_v5 = vmax.f32 %v1871_v46, %v1872_v37  ;;  %v1886_v53 = vrot.slane %v1885_v10, 1  ;;  %v1898_v40 = vrot.slane %v1897_v34, 2  ;;  %v5220_v37 = vld [vmem:[#allocation11_spill] sm:$0xff] }
  0xf5   : > { %v1910_v16 = vrot.slane %v1909_v45, 4  ;;  %5216 = vst [vmem:[#allocation69_spill] sm:$0xff] %v3835_v27  ;;  %v1893_v52 = vrot.slane %v1892_v8, 1  ;;  %v1917_v23 = vrot.slane %v1916_v58, 4  ;;  %v1905_v61 = vrot.slane %v1904_v60, 2 }
  0xf6   : > { %5215 = vst [vmem:[#allocation68_spill] sm:$0xff] %v3833_v5  ;;  %v3839_v4 = vmax.f32 %v1885_v10, %v1886_v53  ;;  %v1899_v36 = vmax.f32 %v1897_v34, %v1898_v40  ;;  %v5219_v46 = vcombine.high %v5217_v41, %v5217_v41  ;;  %v1930_v33 = vsel %vm1285_vm0, %v5220_v37, -inf }
  0xf7   : > { %v1911_v30 = vmax.f32 %v1909_v45, %v1910_v16  ;;  %v3847_v56 = vmax.f32 %v1892_v8, %v1893_v52  ;;  %v1918_v17 = vmax.f32 %v1916_v58, %v1917_v23  ;;  %v1906_v21 = vmax.f32 %v1904_v60, %v1905_v61  ;;  %v5224_v52 = vld [vmem:[#allocation12_spill] sm:$0xff] }
  0xf8   : > { %5218 = vst [vmem:[#allocation10_spill] sm:$0xff] %v3839_v4  ;;  %v1923_v59 = vsel %vm1285_vm0, %v5219_v46, -inf  ;;  %v1900_v10 = vrot.slane %v1899_v36, 1  ;;  %v1931_v53 = vrot.slane %v1930_v33, 4  ;;  %v5222_v34 = vcombine.high %v5220_v37, %v5220_v37 }
  0xf9   : > { %5221 = vst [vmem:[#allocation11_spill] sm:$0xff] %v3847_v56  ;;  %v1912_v62 = vrot.slane %v1911_v30, 2  ;;  %v1924_v43 = vrot.slane %v1923_v59, 4  ;;  %v1919_v40 = vrot.slane %v1918_v17, 2  ;;  %v1907_v27 = vrot.slane %v1906_v21, 1 }
  0xfa   : > { %v1937_v45 = vsel %vm1285_vm0, %v5222_v34, -inf  ;;  %v3853_v4 = vmax.f32 %v1899_v36, %v1900_v10  ;;  %v1932_v8 = vmax.f32 %v1930_v33, %v1931_v53  ;;  %v1944_v58 = vsel %vm1285_vm0, %v5224_v52, -inf }
  0xfb   : > { %v1913_v16 = vmax.f32 %v1911_v30, %v1912_v62  ;;  %v1925_v41 = vmax.f32 %v1923_v59, %v1924_v43  ;;  %v1938_v46 = vrot.slane %v1937_v45, 4  ;;  %v1920_v56 = vmax.f32 %v1918_v17, %v1919_v40  ;;  %v5228_v17 = vld [vmem:[#allocation13_spill] sm:$0xff] }
  0xfc   : > { %5223 = vst [vmem:[#allocation70_spill] sm:$0xff] %v3853_v4  ;;  %v3857_v5 = vmax.f32 %v1906_v21, %v1907_v27  ;;  %v1933_v37 = vrot.slane %v1932_v8, 2  ;;  %v1945_v15 = vrot.slane %v1944_v58, 4  ;;  %v5226_v30 = vcombine.high %v5224_v52, %v5224_v52 }
  0xfd   : > { %v1914_v23 = vrot.slane %v1913_v16, 1  ;;  %v1926_v61 = vrot.slane %v1925_v41, 2  ;;  %v1939_v60 = vmax.f32 %v1937_v45, %v1938_v46  ;;  %v1921_v62 = vrot.slane %v1920_v56, 1 }
  0xfe   : > { %5225 = vst [vmem:[#allocation12_spill] sm:$0xff] %v3857_v5  ;;  %v1951_v59 = vsel %vm1285_vm0, %v5226_v30, -inf  ;;  %v1934_v10 = vmax.f32 %v1932_v8, %v1933_v37  ;;  %v1946_v53 = vmax.f32 %v1944_v58, %v1945_v15  ;;  %v1958_v45 = vsel %vm1285_vm0, %v5228_v17, -inf  ;;  %v5233_v30 = vld [vmem:[#allocation14_spill] sm:$0xff] }
  0xff   : > { %v3863_v36 = vmax.f32 %v1913_v16, %v1914_v23  ;;  %v1927_v33 = vmax.f32 %v1925_v41, %v1926_v61  ;;  %v1940_v43 = vrot.slane %v1939_v60, 2  ;;  %v1952_v34 = vrot.slane %v1951_v59, 4 }
 0x100   : > { %v3867_v27 = vmax.f32 %v1920_v56, %v1921_v62  ;;  %v1959_v46 = vrot.slane %v1958_v45, 4  ;;  %v1935_v4 = vrot.slane %v1934_v10, 1  ;;  %v1947_v52 = vrot.slane %v1946_v53, 2 }
 0x101   : > { %5227 = vst [vmem:[#allocation71_spill] sm:$0xff] %v3863_v36  ;;  %v1928_v21 = vrot.slane %v1927_v33, 1  ;;  %v1941_v40 = vmax.f32 %v1939_v60, %v1940_v43  ;;  %v1953_v5 = vmax.f32 %v1951_v59, %v1952_v34  ;;  %v5230_v16 = vcombine.high %v5228_v17, %v5228_v17 }
 0x102   : > { %5229 = vst [vmem:[#allocation13_spill] sm:$0xff] %v3867_v27  ;;  %v1960_v8 = vmax.f32 %v1958_v45, %v1959_v46  ;;  %v3875_v61 = vmax.f32 %v1934_v10, %v1935_v4  ;;  %v1948_v56 = vmax.f32 %v1946_v53, %v1947_v52  ;;  %v1972_v60 = vsel %vm1285_vm0, %v5233_v30, -inf }
 0x103   : > { %v1965_v41 = vsel %vm1285_vm0, %v5230_v16, -inf  ;;  %v3873_v23 = vmax.f32 %v1927_v33, %v1928_v21  ;;  %v1942_v15 = vrot.slane %v1941_v40, 1  ;;  %v1954_v37 = vrot.slane %v1953_v5, 2  ;;  %v5236_v21 = vld [vmem:[#allocation15_spill] sm:$0xff] }
 0x104   : > { %v1966_v58 = vrot.slane %v1965_v41, 4  ;;  %5232 = vst [vmem:[#allocation73_spill] sm:$0xff] %v3875_v61  ;;  %v1961_v59 = vrot.slane %v1960_v8, 2  ;;  %v1973_v34 = vrot.slane %v1972_v60, 4  ;;  %v1949_v17 = vrot.slane %v1948_v56, 1 }
 0x105   : > { %5231 = vst [vmem:[#allocation72_spill] sm:$0xff] %v3873_v23  ;;  %v3879_v62 = vmax.f32 %v1941_v40, %v1942_v15  ;;  %v1955_v27 = vmax.f32 %v1953_v5, %v1954_v37  ;;  %v5235_v33 = vcombine.high %v5233_v30, %v5233_v30  ;;  %v1986_v4 = vsel %vm1285_vm0, %v5236_v21, -inf }
 0x106   : > { %v1967_v43 = vmax.f32 %v1965_v41, %v1966_v58  ;;  %v1962_v10 = vmax.f32 %v1960_v8, %v1961_v59  ;;  %v1974_v46 = vmax.f32 %v1972_v60, %v1973_v34  ;;  %v3887_v16 = vmax.f32 %v1948_v56, %v1949_v17  ;;  %v5240_v59 = vld [vmem:[#allocation16_spill] sm:$0xff] }
 0x107   : > { %5234 = vst [vmem:[#allocation14_spill] sm:$0xff] %v3879_v62  ;;  %v1979_v45 = vsel %vm1285_vm0, %v5235_v33, -inf  ;;  %v1956_v40 = vrot.slane %v1955_v27, 1  ;;  %v1987_v15 = vrot.slane %v1986_v4, 4  ;;  %v5238_v41 = vcombine.high %v5236_v21, %v5236_v21 }
 0x108   : > { %v1968_v53 = vrot.slane %v1967_v43, 2  ;;  %v1980_v52 = vrot.slane %v1979_v45, 4  ;;  %5237 = vst [vmem:[#allocation15_spill] sm:$0xff] %v3887_v16  ;;  %v1963_v58 = vrot.slane %v1962_v10, 1  ;;  %v1975_v30 = vrot.slane %v1974_v46, 2 }
 0x109   : > { %v1993_v5 = vsel %vm1285_vm0, %v5238_v41, -inf  ;;  %v3893_v62 = vmax.f32 %v1955_v27, %v1956_v40  ;;  %v1988_v61 = vmax.f32 %v1986_v4, %v1987_v15  ;;  %v2000_v60 = vsel %vm1285_vm0, %v5240_v59, -inf  ;;  %v5244_v41 = vld [vmem:[#allocation17_spill] sm:$0xff] }
 0x10a   : > { %v1969_v37 = vmax.f32 %v1967_v43, %v1968_v53  ;;  %v1981_v33 = vmax.f32 %v1979_v45, %v1980_v52  ;;  %v1994_v8 = vrot.slane %v1993_v5, 4  ;;  %v3897_v56 = vmax.f32 %v1962_v10, %v1963_v58 }
 0x10b   : > { %5239 = vst [vmem:[#allocation74_spill] sm:$0xff] %v3893_v62  ;;  %v1976_v17 = vmax.f32 %v1974_v46, %v1975_v30  ;;  %v1989_v23 = vrot.slane %v1988_v61, 2  ;;  %v2001_v36 = vrot.slane %v2000_v60, 4  ;;  %v5242_v43 = vcombine.high %v5240_v59, %v5240_v59 }
 0x10c   : > { %5241 = vst [vmem:[#allocation16_spill] sm:$0xff] %v3897_v56  ;;  %v1970_v34 = vrot.slane %v1969_v37, 1  ;;  %v1982_v16 = vrot.slane %v1981_v33, 2  ;;  %v1995_v21 = vmax.f32 %v1993_v5, %v1994_v8  ;;  %v2014_v46 = vsel %vm1285_vm0, %v5244_v41, -inf }
 0x10d   : > { %v2007_v45 = vsel %vm1285_vm0, %v5242_v43, -inf  ;;  %v1977_v4 = vrot.slane %v1976_v17, 1  ;;  %v1990_v40 = vmax.f32 %v1988_v61, %v1989_v23  ;;  %v2002_v10 = vmax.f32 %v2000_v60, %v2001_v36  ;;  %v5249_v43 = vld [vmem:[#allocation18_spill] sm:$0xff] }
 0x10e   : > { %v3903_v27 = vmax.f32 %v1969_v37, %v1970_v34  ;;  %v1983_v53 = vmax.f32 %v1981_v33, %v1982_v16  ;;  %v2008_v52 = vrot.slane %v2007_v45, 4  ;;  %v1996_v15 = vrot.slane %v1995_v21, 2 }
 0x10f   : > { %v3907_v58 = vmax.f32 %v1976_v17, %v1977_v4  ;;  %v2015_v8 = vrot.slane %v2014_v46, 4  ;;  %v1991_v56 = vrot.slane %v1990_v40, 1  ;;  %v2003_v62 = vrot.slane %v2002_v10, 2 }
 0x110   : > { %5243 = vst [vmem:[#allocation75_spill] sm:$0xff] %v3903_v27  ;;  %v1984_v5 = vrot.slane %v1983_v53, 1  ;;  %v2009_v30 = vmax.f32 %v2007_v45, %v2008_v52  ;;  %v1997_v59 = vmax.f32 %v1995_v21, %v1996_v15  ;;  %v5246_v37 = vcombine.high %v5244_v41, %v5244_v41 }
 0x111   : > { %5245 = vst [vmem:[#allocation17_spill] sm:$0xff] %v3907_v58  ;;  %v2016_v36 = vmax.f32 %v2014_v46, %v2015_v8  ;;  %v3915_v60 = vmax.f32 %v1990_v40, %v1991_v56  ;;  %v2004_v17 = vmax.f32 %v2002_v10, %v2003_v62  ;;  %v2028_v45 = vsel %vm1285_vm0, %v5249_v43, -inf }
 0x112   : > { %v2021_v16 = vsel %vm1285_vm0, %v5246_v37, -inf  ;;  %v3913_v33 = vmax.f32 %v1983_v53, %v1984_v5  ;;  %v2010_v23 = vrot.slane %v2009_v30, 2  ;;  %v1998_v34 = vrot.slane %v1997_v59, 1  ;;  %v5252_v5 = vld [vmem:[#allocation19_spill] sm:$0xff] }
 0x113   : > { %v2022_v61 = vrot.slane %v2021_v16, 4  ;;  %5248 = vst [vmem:[#allocation77_spill] sm:$0xff] %v3915_v60  ;;  %v2017_v21 = vrot.slane %v2016_v36, 2  ;;  %v2029_v15 = vrot.slane %v2028_v45, 4  ;;  %v2005_v41 = vrot.slane %v2004_v17, 1 }
 0x114   : > { %5247 = vst [vmem:[#allocation76_spill] sm:$0xff] %v3913_v33  ;;  %v2011_v4 = vmax.f32 %v2009_v30, %v2010_v23  ;;  %v3919_v58 = vmax.f32 %v1997_v59, %v1998_v34  ;;  %v5251_v53 = vcombine.high %v5249_v43, %v5249_v43  ;;  %v2042_v56 = vsel %vm1285_vm0, %v5252_v5, -inf }
 0x115   : > { %v2023_v52 = vmax.f32 %v2021_v16, %v2022_v61  ;;  %v2018_v62 = vmax.f32 %v2016_v36, %v2017_v21  ;;  %v2030_v8 = vmax.f32 %v2028_v45, %v2029_v15  ;;  %v3927_v37 = vmax.f32 %v2004_v17, %v2005_v41  ;;  %v5256_v36 = vld [vmem:[#allocation20_spill] sm:$0xff] }
 0x116   : > { %5250 = vst [vmem:[#allocation18_spill] sm:$0xff] %v3919_v58  ;;  %v2035_v46 = vsel %vm1285_vm0, %v5251_v53, -inf  ;;  %v2012_v40 = vrot.slane %v2011_v4, 1  ;;  %v2043_v16 = vrot.slane %v2042_v56, 4  ;;  %v5254_v59 = vcombine.high %v5252_v5, %v5252_v5 }
 0x117   : > { %v2024_v10 = vrot.slane %v2023_v52, 2  ;;  %5253 = vst [vmem:[#allocation19_spill] sm:$0xff] %v3927_v37  ;;  %v2036_v30 = vrot.slane %v2035_v46, 4  ;;  %v2019_v34 = vrot.slane %v2018_v62, 1  ;;  %v2031_v53 = vrot.slane %v2030_v8, 2 }
 0x118   : > { %v2049_v23 = vsel %vm1285_vm0, %v5254_v59, -inf  ;;  %v3933_v61 = vmax.f32 %v2011_v4, %v2012_v40  ;;  %v2044_v60 = vmax.f32 %v2042_v56, %v2043_v16  ;;  %v2056_v45 = vsel %vm1285_vm0, %v5256_v36, -inf  ;;  %v5260_v59 = vld [vmem:[#allocation21_spill] sm:$0xff] }
 0x119   : > { %v2025_v43 = vmax.f32 %v2023_v52, %v2024_v10  ;;  %v2037_v58 = vmax.f32 %v2035_v46, %v2036_v30  ;;  %v2050_v33 = vrot.slane %v2049_v23, 4  ;;  %v3937_v17 = vmax.f32 %v2018_v62, %v2019_v34 }
 0x11a   : > { %5255 = vst [vmem:[#allocation78_spill] sm:$0xff] %v3933_v61  ;;  %v2032_v15 = vmax.f32 %v2030_v8, %v2031_v53  ;;  %v2057_v41 = vrot.slane %v2056_v45, 4  ;;  %v2045_v5 = vrot.slane %v2044_v60, 2  ;;  %v5258_v4 = vcombine.high %v5256_v36, %v5256_v36 }
 0x11b   : > { %5257 = vst [vmem:[#allocation20_spill] sm:$0xff] %v3937_v17  ;;  %v2026_v21 = vrot.slane %v2025_v43, 1  ;;  %v2038_v37 = vrot.slane %v2037_v58, 2  ;;  %v2051_v27 = vmax.f32 %v2049_v23, %v2050_v33  ;;  %v2070_v8 = vsel %vm1285_vm0, %v5260_v59, -inf }
 0x11c   : > { %v2063_v52 = vsel %vm1285_vm0, %v5258_v4, -inf  ;;  %v2033_v46 = vrot.slane %v2032_v15, 1  ;;  %v2058_v56 = vmax.f32 %v2056_v45, %v2057_v41  ;;  %v2046_v16 = vmax.f32 %v2044_v60, %v2045_v5  ;;  %v5265_v4 = vld [vmem:[#allocation22_spill] sm:$0xff] }
 0x11d   : > { %v3943_v40 = vmax.f32 %v2025_v43, %v2026_v21  ;;  %v2064_v10 = vrot.slane %v2063_v52, 4  ;;  %v2039_v30 = vmax.f32 %v2037_v58, %v2038_v37  ;;  %v2052_v62 = vrot.slane %v2051_v27, 2 }
 0x11e   : > { %v3947_v34 = vmax.f32 %v2032_v15, %v2033_v46  ;;  %v2059_v53 = vrot.slane %v2058_v56, 2  ;;  %v2071_v23 = vrot.slane %v2070_v8, 4  ;;  %v2047_v36 = vrot.slane %v2046_v16, 1 }
 0x11f   : > { %5259 = vst [vmem:[#allocation79_spill] sm:$0xff] %v3943_v40  ;;  %v2065_v33 = vmax.f32 %v2063_v52, %v2064_v10  ;;  %v2040_v61 = vrot.slane %v2039_v30, 1  ;;  %v2053_v17 = vmax.f32 %v2051_v27, %v2052_v62  ;;  %v5262_v43 = vcombine.high %v5260_v59, %v5260_v59 }
 0x120   : > { %5261 = vst [vmem:[#allocation21_spill] sm:$0xff] %v3947_v34  ;;  %v2060_v21 = vmax.f32 %v2058_v56, %v2059_v53  ;;  %v2072_v60 = vmax.f32 %v2070_v8, %v2071_v23  ;;  %v3955_v5 = vmax.f32 %v2046_v16, %v2047_v36  ;;  %v2084_v52 = vsel %vm1285_vm0, %v5265_v4, -inf }
 0x121   : > { %v2077_v45 = vsel %vm1285_vm0, %v5262_v43, -inf  ;;  %v2066_v58 = vrot.slane %v2065_v33, 2  ;;  %v3953_v41 = vmax.f32 %v2039_v30, %v2040_v61  ;;  %v2054_v15 = vrot.slane %v2053_v17, 1  ;;  %v5268_v61 = vld [vmem:[#allocation23_spill] sm:$0xff] }
 0x122   : > { %v2078_v37 = vrot.slane %v2077_v45, 4  ;;  %5264 = vst [vmem:[#allocation81_spill] sm:$0xff] %v3955_v5  ;;  %v2061_v46 = vrot.slane %v2060_v21, 1  ;;  %v2073_v27 = vrot.slane %v2072_v60, 2  ;;  %v2085_v59 = vrot.slane %v2084_v52, 4 }
 0x123   : > { %5263 = vst [vmem:[#allocation80_spill] sm:$0xff] %v3953_v41  ;;  %v2067_v10 = vmax.f32 %v2065_v33, %v2066_v58  ;;  %v3959_v34 = vmax.f32 %v2053_v17, %v2054_v15  ;;  %v5267_v56 = vcombine.high %v5265_v4, %v5265_v4  ;;  %v2098_v30 = vsel %vm1285_vm0, %v5268_v61, -inf }
 0x124   : > { %v2079_v62 = vmax.f32 %v2077_v45, %v2078_v37  ;;  %v3967_v16 = vmax.f32 %v2060_v21, %v2061_v46  ;;  %v2074_v23 = vmax.f32 %v2072_v60, %v2073_v27  ;;  %v2086_v43 = vmax.f32 %v2084_v52, %v2085_v59  ;;  %v5272_v46 = vld [vmem:[#allocation24_spill] sm:$0xff] }
 0x125   : > { %5266 = vst [vmem:[#allocation22_spill] sm:$0xff] %v3959_v34  ;;  %v2091_v8 = vsel %vm1285_vm0, %v5267_v56, -inf  ;;  %v2068_v53 = vrot.slane %v2067_v10, 1  ;;  %v2099_v58 = vrot.slane %v2098_v30, 4  ;;  %v5270_v17 = vcombine.high %v5268_v61, %v5268_v61 }
 0x126   : > { %5269 = vst [vmem:[#allocation23_spill] sm:$0xff] %v3967_v16  ;;  %v2080_v36 = vrot.slane %v2079_v62, 2  ;;  %v2092_v33 = vrot.slane %v2091_v8, 4  ;;  %v2075_v15 = vrot.slane %v2074_v23, 1  ;;  %v2087_v34 = vrot.slane %v2086_v43, 2 }
 0x127   : > { %v2105_v45 = vsel %vm1285_vm0, %v5270_v17, -inf  ;;  %v3973_v37 = vmax.f32 %v2067_v10, %v2068_v53  ;;  %v2100_v21 = vmax.f32 %v2098_v30, %v2099_v58  ;;  %v2112_v60 = vsel %vm1285_vm0, %v5272_v46, -inf  ;;  %v5276_v17 = vld [vmem:[#allocation25_spill] sm:$0xff] }
 0x128   : > { %v2081_v4 = vmax.f32 %v2079_v62, %v2080_v36  ;;  %v2106_v56 = vrot.slane %v2105_v45, 4  ;;  %v2093_v5 = vmax.f32 %v2091_v8, %v2092_v33  ;;  %v3977_v27 = vmax.f32 %v2074_v23, %v2075_v15 }
 0x129   : > { %5271 = vst [vmem:[#allocation82_spill] sm:$0xff] %v3973_v37  ;;  %v2113_v16 = vrot.slane %v2112_v60, 4  ;;  %v2088_v41 = vmax.f32 %v2086_v43, %v2087_v34  ;;  %v2101_v40 = vrot.slane %v2100_v21, 2  ;;  %v5274_v10 = vcombine.high %v5272_v46, %v5272_v46 }
 0x12a   : > { %5273 = vst [vmem:[#allocation24_spill] sm:$0xff] %v3977_v27  ;;  %v2082_v52 = vrot.slane %v2081_v4, 1  ;;  %v2107_v59 = vmax.f32 %v2105_v45, %v2106_v56  ;;  %v2094_v61 = vrot.slane %v2093_v5, 2  ;;  %v2126_v45 = vsel %vm1285_vm0, %v5276_v17, -inf }
 0x12b   : > { %v2119_v62 = vsel %vm1285_vm0, %v5274_v10, -inf  ;;  %v2114_v30 = vmax.f32 %v2112_v60, %v2113_v16  ;;  %v2089_v33 = vrot.slane %v2088_v41, 1  ;;  %v2102_v23 = vmax.f32 %v2100_v21, %v2101_v40  ;;  %v5281_v10 = vld [vmem:[#allocation26_spill] sm:$0xff] }
 0x12c   : > { %v3983_v53 = vmax.f32 %v2081_v4, %v2082_v52  ;;  %v2108_v8 = vrot.slane %v2107_v59, 2  ;;  %v2120_v36 = vrot.slane %v2119_v62, 4  ;;  %v2095_v58 = vmax.f32 %v2093_v5, %v2094_v61 }
 0x12d   : > { %v2115_v34 = vrot.slane %v2114_v30, 2  ;;  %v2127_v56 = vrot.slane %v2126_v45, 4  ;;  %v3987_v27 = vmax.f32 %v2088_v41, %v2089_v33  ;;  %v2103_v37 = vrot.slane %v2102_v23, 1 }
 0x12e   : > { %5275 = vst [vmem:[#allocation83_spill] sm:$0xff] %v3983_v53  ;;  %v2109_v15 = vmax.f32 %v2107_v59, %v2108_v8  ;;  %v2121_v43 = vmax.f32 %v2119_v62, %v2120_v36  ;;  %v2096_v46 = vrot.slane %v2095_v58, 1  ;;  %v5278_v4 = vcombine.high %v5276_v17, %v5276_v17 }
 0x12f   : > { %5277 = vst [vmem:[#allocation25_spill] sm:$0xff] %v3987_v27  ;;  %v2116_v52 = vmax.f32 %v2114_v30, %v2115_v34  ;;  %v2128_v40 = vmax.f32 %v2126_v45, %v2127_v56  ;;  %v3995_v61 = vmax.f32 %v2102_v23, %v2103_v37  ;;  %v2140_v41 = vsel %vm1285_vm0, %v5281_v10, -inf }
 0x130   : > { %v2133_v16 = vsel %vm1285_vm0, %v5278_v4, -inf  ;;  %v2110_v60 = vrot.slane %v2109_v15, 1  ;;  %v2122_v5 = vrot.slane %v2121_v43, 2  ;;  %v3993_v21 = vmax.f32 %v2095_v58, %v2096_v46  ;;  %v5284_v58 = vld [vmem:[#allocation27_spill] sm:$0xff] }
 0x131   : > { %5280 = vst [vmem:[#allocation85_spill] sm:$0xff] %v3995_v61  ;;  %v2134_v59 = vrot.slane %v2133_v16, 4  ;;  %v2117_v8 = vrot.slane %v2116_v52, 1  ;;  %v2129_v33 = vrot.slane %v2128_v40, 2  ;;  %v2141_v27 = vrot.slane %v2140_v41, 4 }
 0x132   : > { %5279 = vst [vmem:[#allocation84_spill] sm:$0xff] %v3993_v21  ;;  %v3999_v62 = vmax.f32 %v2109_v15, %v2110_v60  ;;  %v2123_v36 = vmax.f32 %v2121_v43, %v2122_v5  ;;  %v5283_v30 = vcombine.high %v5281_v10, %v5281_v10  ;;  %v2154_v37 = vsel %vm1285_vm0, %v5284_v58, -inf }
 0x133   : > { %v2135_v17 = vmax.f32 %v2133_v16, %v2134_v59  ;;  %v4007_v23 = vmax.f32 %v2116_v52, %v2117_v8  ;;  %v2130_v56 = vmax.f32 %v2128_v40, %v2129_v33  ;;  %v2142_v4 = vmax.f32 %v2140_v41, %v2141_v27  ;;  %v5287_v8 = vld [vmem:[#allocation28_spill] sm:$0xff] }
 0x134   : > { %5282 = vst [vmem:[#allocation26_spill] sm:$0xff] %v3999_v62  ;;  %v2147_v45 = vsel %vm1285_vm0, %v5283_v30, -inf  ;;  %v2124_v34 = vrot.slane %v2123_v36, 1  ;;  %v2155_v60 = vrot.slane %v2154_v37, 4  ;;  %v5286_v43 = vcombine.high %v5284_v58, %v5284_v58 }
 0x135   : > { %5285 = vst [vmem:[#allocation27_spill] sm:$0xff] %v4007_v23  ;;  %v2148_v46 = vrot.slane %v2147_v45, 4  ;;  %v2136_v15 = vrot.slane %v2135_v17, 2  ;;  %v2131_v59 = vrot.slane %v2130_v56, 1  ;;  %v2143_v61 = vrot.slane %v2142_v4, 2 }
 0x136   : > { %v2161_v16 = vsel %vm1285_vm0, %v5286_v43, -inf  ;;  %v4013_v5 = vmax.f32 %v2123_v36, %v2124_v34  ;;  %v2156_v52 = vmax.f32 %v2154_v37, %v2155_v60  ;;  %v2168_v40 = vsel %vm1285_vm0, %v5287_v8, -inf }
 0x137   : > { %v2149_v10 = vmax.f32 %v2147_v45, %v2148_v46  ;;  %v2162_v30 = vrot.slane %v2161_v16, 4  ;;  %v2137_v62 = vmax.f32 %v2135_v17, %v2136_v15  ;;  %v4017_v33 = vmax.f32 %v2130_v56, %v2131_v59 }
 0x138   : > { %v2169_v23 = vrot.slane %v2168_v40, 4  ;;  %v2144_v58 = vmax.f32 %v2142_v4, %v2143_v61  ;;  %v2157_v53 = vrot.slane %v2156_v52, 2  ;;  %v5288_v36 = vcombine.high %v5287_v8, %v5287_v8 }
 0x139   : > { %v2150_v27 = vrot.slane %v2149_v10, 2  ;;  %v2163_v41 = vmax.f32 %v2161_v16, %v2162_v30  ;;  %v2138_v21 = vrot.slane %v2137_v62, 1  ;;  %v4029_v8 = vsel %vm2182_vm1, %v3421_v25, -inf }
 0x13a   : > { %v2175_v45 = vsel %vm1285_vm0, %v5288_v36, -inf  ;;  %v2170_v46 = vmax.f32 %v2168_v40, %v2169_v23  ;;  %v2145_v60 = vrot.slane %v2144_v58, 1  ;;  %v2158_v56 = vmax.f32 %v2156_v52, %v2157_v53  ;;  %v5307_v36 = vld [vmem:[#allocation37_spill] sm:$0xff] }
 0x13b   : > { %v2151_v34 = vmax.f32 %v2149_v10, %v2150_v27  ;;  %v2164_v17 = vrot.slane %v2163_v41, 2  ;;  %v2176_v37 = vrot.slane %v2175_v45, 4  ;;  %v4023_v15 = vmax.f32 %v2137_v62, %v2138_v21  ;;  %v5310_v40 = vld [vmem:[#allocation41_spill] sm:$0xff] }
 0x13c   : > { %v2171_v59 = vrot.slane %v2170_v46, 2  ;;  %v4025_v61 = vmax.f32 %v2144_v58, %v2145_v60  ;;  %v2159_v4 = vrot.slane %v2158_v56, 1  ;;  %v4033_v23 = vsel %vm2182_vm1, %v3461_v19, -inf }
 0x13d   : > { %v2152_v43 = vrot.slane %v2151_v34, 1  ;;  %v2165_v16 = vmax.f32 %v2163_v41, %v2164_v17  ;;  %v2177_v30 = vmax.f32 %v2175_v45, %v2176_v37  ;;  %v4043_v27 = vsel %vm2182_vm1, %v3423_v32, -inf  ;;  %v5289_v32 = vld [vmem:[#allocation29_spill] sm:$0xff] }
 0x13e   : > { %v2172_v53 = vmax.f32 %v2170_v46, %v2171_v59  ;;  %v4037_v52 = vmax.f32 %v2158_v56, %v2159_v4  ;;  %v4047_v25 = vsel %vm2182_vm1, %v3463_v7, -inf  ;;  %v4055_v45 = vsel %vm2182_vm1, %v3425_v9, -inf  ;;  %v5290_v56 = vld [vmem:[#allocation30_spill] sm:$0xff] }
 0x13f   : > { %v4035_v21 = vmax.f32 %v2151_v34, %v2152_v43  ;;  %v2166_v62 = vrot.slane %v2165_v16, 1  ;;  %v2178_v10 = vrot.slane %v2177_v30, 2  ;;  %v4059_v34 = vsel %vm2182_vm1, %v3467_v18, -inf }
 0x140   : > { %v2173_v41 = vrot.slane %v2172_v53, 1  ;;  %v4063_v17 = vsel %vm2182_vm1, %v5289_v32, -inf  ;;  %v4067_v7 = vsel %vm2182_vm1, %v3473_v47, -inf  ;;  %v4077_v18 = vsel %vm2182_vm1, %v5290_v56, -inf }
 0x141   : > { %v4049_v19 = vmax.f32 %v2165_v16, %v2166_v62  ;;  %v2179_v58 = vmax.f32 %v2177_v30, %v2178_v10  ;;  %v4081_v43 = vsel %vm2182_vm1, %v3475_v55, -inf  ;;  %v5291_v16 = vld [vmem:[#allocation31_spill] sm:$0xff]  ;;  %v4089_v59 = vsel %vm2182_vm1, %v3477_v26, -inf  ;;  %v5298_v62 = vld [vmem:[#allocation38_spill] sm:$0xff] }
 0x142   : > { %v4069_v46 = vmax.f32 %v2172_v53, %v2173_v41  ;;  %v4085_v47 = vsel %vm2182_vm1, %v5291_v16, -inf  ;;  %v5292_v53 = vld [vmem:[#allocation32_spill] sm:$0xff]  ;;  %v4103_v10 = vsel %vm2182_vm1, %v3487_v57, -inf  ;;  %v5294_v41 = vld [vmem:[#allocation33_spill] sm:$0xff]  ;;  %v4123_v57 = vsel %vm2182_vm1, %v3541_v0, -inf }
 0x143   : > { %v2180_v37 = vrot.slane %v2179_v58, 1  ;;  %v4099_v55 = vsel %vm2182_vm1, %v5292_v53, -inf  ;;  %5293 = vst [vmem:[#allocation28_spill] sm:$0xff] %v4103_v10  ;;  %v4107_v26 = vsel %vm2182_vm1, %v5294_v41, -inf  ;;  %v4127_v53 = vsel %vm2182_vm1, %v3503_v51, -inf  ;;  %v5299_v51 = vld [vmem:[#allocation35_spill] sm:$0xff] }
 0x144   : > { %5295 = vst [vmem:[#allocation29_spill] sm:$0xff] %v4107_v26  ;;  %v4141_v16 = vsel %vm2182_vm1, %v3547_v1, -inf  ;;  %v4149_v56 = vsel %vm2182_vm1, %v3509_v20, -inf  ;;  %v4159_v1 = vsel %vm2182_vm1, %v3515_v12, -inf  ;;  %v4163_v4 = vsel %vm2182_vm1, %v5298_v62, -inf  ;;  %v5305_v12 = vld [vmem:[#allocation40_spill] sm:$0xff] }
 0x145   : > { %v4091_v30 = vmax.f32 %v2179_v58, %v2180_v37  ;;  %v5296_v58 = vld [vmem:[#allocation34_spill] sm:$0xff]  ;;  %v4115_v37 = vsel %vm2182_vm1, %v3501_v22, -inf  ;;  %v4133_v22 = vsel %vm2182_vm1, %v3543_v54, -inf  ;;  %v4153_v54 = vsel %vm2182_vm1, %v3553_v13, -inf  ;;  %v5301_v13 = vld [vmem:[#allocation39_spill] sm:$0xff]  ;;  %v5337_v10 = vld [vmem:[#allocation53_spill] sm:$0xff] }
 0x146   : > { %v4111_v32 = vsel %vm2182_vm1, %v5296_v58, -inf  ;;  %v4137_v58 = vsel %vm2182_vm1, %v3507_v29, -inf  ;;  %v4167_v9 = vsel %vm2182_vm1, %v5299_v51, -inf  ;;  %v4173_v0 = vsel %vm2182_vm1, %v5301_v13, -inf  ;;  %v5303_v29 = vld [vmem:[#allocation36_spill] sm:$0xff] }
 0x147   : > { %5297 = vst [vmem:[#allocation30_spill] sm:$0xff] %v4111_v32  ;;  %5300 = vst [vmem:[#allocation31_spill] sm:$0xff] %v4167_v9  ;;  %v4177_v41 = vsel %vm2182_vm1, %v5303_v29, -inf  ;;  %v4181_v60 = vsel %vm2182_vm1, %v5305_v12, -inf  ;;  %v4189_v20 = vsel %vm2182_vm1, %v5307_v36, -inf  ;;  %v4193_v13 = vsel %vm2182_vm1, %v3573_v38, -inf }
 0x148   : > { %5302 = vst [vmem:[#allocation32_spill] sm:$0xff] %v4173_v0  ;;  %5304 = vst [vmem:[#allocation33_spill] sm:$0xff] %v4177_v41  ;;  %v4199_v12 = vsel %vm2182_vm1, %v5310_v40, -inf  ;;  %v4203_v62 = vsel %vm2182_vm1, %v3617_v49, -inf  ;;  %v4207_v51 = vsel %vm2182_vm1, %v3583_v6, -inf  ;;  %v4213_v38 = vsel %vm2182_vm1, %v3623_v3, -inf }
 0x149   : > { %5306 = vst [vmem:[#allocation34_spill] sm:$0xff] %v4181_v60  ;;  %5308 = vst [vmem:[#allocation38_spill] sm:$0xff] %v4189_v20  ;;  %v4217_v29 = vsel %vm2182_vm1, %v3587_v11, -inf  ;;  %v4221_v40 = vsel %vm2182_vm1, %v3627_v31, -inf  ;;  %v4229_v36 = vsel %vm2182_vm1, %v3593_v39, -inf  ;;  %v4233_v3 = vsel %vm2182_vm1, %v3633_v28, -inf }
 0x14a   : > { %5309 = vst [vmem:[#allocation35_spill] sm:$0xff] %v4193_v13  ;;  %v5311_v13 = vld [vmem:[#allocation42_spill] sm:$0xff]  ;;  %v5313_v6 = vld [vmem:[#allocation43_spill] sm:$0xff]  ;;  %v5317_v11 = vld [vmem:[#allocation44_spill] sm:$0xff] }
 0x14b   : > { %v4239_v31 = vsel %vm2182_vm1, %v5311_v13, -inf  ;;  %v5312_v20 = vld [vmem:[#allocation46_spill] sm:$0xff]  ;;  %v4247_v60 = vsel %vm2182_vm1, %v5313_v6, -inf  ;;  %v5315_v28 = vld [vmem:[#allocation47_spill] sm:$0xff]  ;;  %v4257_v32 = vsel %vm2182_vm1, %v5317_v11, -inf  ;;  %v5319_v13 = vld [vmem:[#allocation48_spill] sm:$0xff] }
 0x14c   : > { %v4243_v49 = vsel %vm2182_vm1, %v5312_v20, -inf  ;;  %5314 = vst [vmem:[#allocation39_spill] sm:$0xff] %v4247_v60  ;;  %v4253_v41 = vsel %vm2182_vm1, %v5315_v28, -inf  ;;  %5318 = vst [vmem:[#allocation40_spill] sm:$0xff] %v4257_v32  ;;  %v4261_v26 = vsel %vm2182_vm1, %v5319_v13, -inf  ;;  %v5321_v0 = vld [vmem:[#allocation45_spill] sm:$0xff] }
 0x14d   : > { %5316 = vst [vmem:[#allocation36_spill] sm:$0xff] %v4253_v41  ;;  %5320 = vst [vmem:[#allocation37_spill] sm:$0xff] %v4261_v26  ;;  %v4269_v39 = vsel %vm2182_vm1, %v5321_v0, -inf  ;;  %v4273_v28 = vsel %vm2182_vm1, %v3653_v42, -inf  ;;  %v5324_v9 = vld [vmem:[#allocation49_spill] sm:$0xff]  ;;  %v4283_v20 = vsel %vm2182_vm1, %v3697_v63, -inf }
 0x14e   : > { %5322 = vst [vmem:[#allocation41_spill] sm:$0xff] %v4269_v39  ;;  %5323 = vst [vmem:[#allocation42_spill] sm:$0xff] %v4273_v28  ;;  %v4279_v13 = vsel %vm2182_vm1, %v5324_v9, -inf  ;;  %v4287_v6 = vsel %vm2182_vm1, %v3663_v14, -inf  ;;  %v4293_v42 = vsel %vm2182_vm1, %v3703_v48, -inf  ;;  %v4297_v11 = vsel %vm2182_vm1, %v3667_v50, -inf }
 0x14f   : > { %v4301_v9 = vsel %vm2182_vm1, %v3707_v2, -inf  ;;  %v4309_v0 = vsel %vm2182_vm1, %v3673_v44, -inf  ;;  %v4313_v48 = vsel %vm2182_vm1, %v3713_v24, -inf  ;;  %v5325_v28 = vld [vmem:[#allocation50_spill] sm:$0xff]  ;;  %v5329_v14 = vld [vmem:[#allocation51_spill] sm:$0xff]  ;;  %v5333_v50 = vld [vmem:[#allocation52_spill] sm:$0xff] }
 0x150   : > { %v4319_v2 = vsel %vm2182_vm1, %v5325_v28, -inf  ;;  %v5327_v39 = vld [vmem:[#allocation54_spill] sm:$0xff]  ;;  %v4327_v26 = vsel %vm2182_vm1, %v5329_v14, -inf  ;;  %v5331_v24 = vld [vmem:[#allocation55_spill] sm:$0xff]  ;;  %v4337_v41 = vsel %vm2182_vm1, %v5333_v50, -inf  ;;  %v5335_v28 = vld [vmem:[#allocation56_spill] sm:$0xff] }
 0x151   : > { %5326 = vst [vmem:[#allocation46_spill] sm:$0xff] %v4319_v2  ;;  %v4323_v63 = vsel %vm2182_vm1, %v5327_v39, -inf  ;;  %5330 = vst [vmem:[#allocation47_spill] sm:$0xff] %v4327_v26  ;;  %v4333_v32 = vsel %vm2182_vm1, %v5331_v24, -inf  ;;  %v4341_v60 = vsel %vm2182_vm1, %v5335_v28, -inf  ;;  %v4349_v44 = vsel %vm2182_vm1, %v5337_v10, -inf }
 0x152   : > { %5328 = vst [vmem:[#allocation43_spill] sm:$0xff] %v4323_v63  ;;  %5332 = vst [vmem:[#allocation44_spill] sm:$0xff] %v4333_v32  ;;  %v4353_v24 = vsel %vm2182_vm1, %v3733_v35, -inf  ;;  %v5340_v63 = vld [vmem:[#allocation57_spill] sm:$0xff]  ;;  %v5342_v2 = vld [vmem:[#allocation4_spill] sm:$0xff] }
 0x153   : > { %5334 = vst [vmem:[#allocation48_spill] sm:$0xff] %v4337_v41  ;;  %5336 = vst [vmem:[#allocation45_spill] sm:$0xff] %v4341_v60  ;;  %v4359_v28 = vsel %vm2182_vm1, %v5340_v63, -inf  ;;  %v4363_v39 = vsel %vm2182_vm1, %v5342_v2, -inf  ;;  %v5344_v14 = vld [vmem:[#allocation58_spill] sm:$0xff]  ;;  %v5346_v35 = vld [vmem:[#allocation63_spill] sm:$0xff] }
 0x154   : > { %5338 = vst [vmem:[#allocation49_spill] sm:$0xff] %v4349_v44  ;;  %5339 = vst [vmem:[#allocation50_spill] sm:$0xff] %v4353_v24  ;;  %v4367_v60 = vsel %vm2182_vm1, %v5344_v14, -inf  ;;  %v4373_v41 = vsel %vm2182_vm1, %v5346_v35, -inf  ;;  %v5348_v50 = vld [vmem:[#allocation59_spill] sm:$0xff]  ;;  %v5350_v63 = vld [vmem:[#allocation5_spill] sm:$0xff] }
 0x155   : > { %5341 = vst [vmem:[#allocation54_spill] sm:$0xff] %v4359_v28  ;;  %5343 = vst [vmem:[#allocation51_spill] sm:$0xff] %v4363_v39  ;;  %v4377_v24 = vsel %vm2182_vm1, %v5348_v50, -inf  ;;  %v4381_v44 = vsel %vm2182_vm1, %v5350_v63, -inf  ;;  %v5352_v32 = vld [vmem:[#allocation60_spill] sm:$0xff]  ;;  %v5356_v28 = vld [vmem:[#allocation61_spill] sm:$0xff] }
 0x156   : > { %5345 = vst [vmem:[#allocation55_spill] sm:$0xff] %v4367_v60  ;;  %5347 = vst [vmem:[#allocation52_spill] sm:$0xff] %v4373_v41  ;;  %v4389_v10 = vsel %vm2182_vm1, %v5352_v32, -inf  ;;  %v5354_v35 = vld [vmem:[#allocation64_spill] sm:$0xff]  ;;  %v4399_v63 = vsel %vm2182_vm1, %v5356_v28, -inf  ;;  %v5358_v26 = vld [vmem:[#allocation65_spill] sm:$0xff] }
 0x157   : > { %5349 = vst [vmem:[#allocation56_spill] sm:$0xff] %v4377_v24  ;;  %5351 = vst [vmem:[#allocation53_spill] sm:$0xff] %v4381_v44  ;;  %v4393_v39 = vsel %vm2182_vm1, %v5354_v35, -inf  ;;  %v4403_v2 = vsel %vm2182_vm1, %v5358_v26, -inf  ;;  %v5360_v14 = vld [vmem:[#allocation2_spill] sm:$0xff]  ;;  %v5364_v50 = vld [vmem:[#allocation3_spill] sm:$0xff] }
 0x158   : > { %5353 = vst [vmem:[#allocation57_spill] sm:$0xff] %v4389_v10  ;;  %5355 = vst [vmem:[#allocation4_spill] sm:$0xff] %v4393_v39  ;;  %v4407_v44 = vsel %vm2182_vm1, %v5360_v14, -inf  ;;  %v5362_v35 = vld [vmem:[#allocation6_spill] sm:$0xff]  ;;  %v4417_v39 = vsel %vm2182_vm1, %v5364_v50, -inf  ;;  %v5366_v28 = vld [vmem:[#allocation7_spill] sm:$0xff] }
 0x159   : > { %5357 = vst [vmem:[#allocation58_spill] sm:$0xff] %v4399_v63  ;;  %5359 = vst [vmem:[#allocation63_spill] sm:$0xff] %v4403_v2  ;;  %v4413_v24 = vsel %vm2182_vm1, %v5362_v35, -inf  ;;  %v4421_v10 = vsel %vm2182_vm1, %v5366_v28, -inf  ;;  %v5368_v41 = vld [vmem:[#allocation62_spill] sm:$0xff]  ;;  %v5372_v63 = vld [vmem:[#allocation8_spill] sm:$0xff] }
 0x15a   : > { %5361 = vst [vmem:[#allocation59_spill] sm:$0xff] %v4407_v44  ;;  %5363 = vst [vmem:[#allocation5_spill] sm:$0xff] %v4413_v24  ;;  %v4429_v32 = vsel %vm2182_vm1, %v5368_v41, -inf  ;;  %v5370_v35 = vld [vmem:[#allocation66_spill] sm:$0xff]  ;;  %v4439_v28 = vsel %vm2182_vm1, %v5372_v63, -inf  ;;  %v5374_v60 = vld [vmem:[#allocation12_spill] sm:$0xff] }
 0x15b   : > { %5365 = vst [vmem:[#allocation60_spill] sm:$0xff] %v4417_v39  ;;  %5367 = vst [vmem:[#allocation64_spill] sm:$0xff] %v4421_v10  ;;  %v4433_v2 = vsel %vm2182_vm1, %v5370_v35, -inf  ;;  %v4443_v26 = vsel %vm2182_vm1, %v5374_v60, -inf  ;;  %v5376_v14 = vld [vmem:[#allocation67_spill] sm:$0xff]  ;;  %v5380_v50 = vld [vmem:[#allocation9_spill] sm:$0xff] }
 0x15c   : > { %5369 = vst [vmem:[#allocation61_spill] sm:$0xff] %v4429_v32  ;;  %5371 = vst [vmem:[#allocation65_spill] sm:$0xff] %v4433_v2  ;;  %v4447_v10 = vsel %vm2182_vm1, %v5376_v14, -inf  ;;  %v5378_v35 = vld [vmem:[#allocation71_spill] sm:$0xff]  ;;  %v4457_v2 = vsel %vm2182_vm1, %v5380_v50, -inf  ;;  %v5382_v63 = vld [vmem:[#allocation13_spill] sm:$0xff] }
 0x15d   : > { %5373 = vst [vmem:[#allocation2_spill] sm:$0xff] %v4439_v28  ;;  %5375 = vst [vmem:[#allocation6_spill] sm:$0xff] %v4443_v26  ;;  %v4453_v39 = vsel %vm2182_vm1, %v5378_v35, -inf  ;;  %v4461_v32 = vsel %vm2182_vm1, %v5382_v63, -inf  ;;  %v5384_v24 = vld [vmem:[#allocation68_spill] sm:$0xff]  ;;  %v5388_v26 = vld [vmem:[#allocation69_spill] sm:$0xff] }
 0x15e   : > { %5377 = vst [vmem:[#allocation3_spill] sm:$0xff] %v4447_v10  ;;  %5379 = vst [vmem:[#allocation7_spill] sm:$0xff] %v4453_v39  ;;  %v4469_v41 = vsel %vm2182_vm1, %v5384_v24, -inf  ;;  %v5386_v35 = vld [vmem:[#allocation72_spill] sm:$0xff]  ;;  %v4479_v63 = vsel %vm2182_vm1, %v5388_v26, -inf  ;;  %v5390_v28 = vld [vmem:[#allocation73_spill] sm:$0xff] }
 0x15f   : > { %5381 = vst [vmem:[#allocation62_spill] sm:$0xff] %v4457_v2  ;;  %5383 = vst [vmem:[#allocation66_spill] sm:$0xff] %v4461_v32  ;;  %v4473_v44 = vsel %vm2182_vm1, %v5386_v35, -inf  ;;  %v4483_v60 = vsel %vm2182_vm1, %v5390_v28, -inf  ;;  %v5392_v14 = vld [vmem:[#allocation10_spill] sm:$0xff]  ;;  %v5396_v50 = vld [vmem:[#allocation11_spill] sm:$0xff] }
 0x160   : > { %5385 = vst [vmem:[#allocation8_spill] sm:$0xff] %v4469_v41  ;;  %5387 = vst [vmem:[#allocation12_spill] sm:$0xff] %v4473_v44  ;;  %v4487_v32 = vsel %vm2182_vm1, %v5392_v14, -inf  ;;  %v5394_v35 = vld [vmem:[#allocation14_spill] sm:$0xff]  ;;  %v4497_v44 = vsel %vm2182_vm1, %v5396_v50, -inf  ;;  %v5398_v26 = vld [vmem:[#allocation15_spill] sm:$0xff] }
 0x161   : > { %5389 = vst [vmem:[#allocation67_spill] sm:$0xff] %v4479_v63  ;;  %5391 = vst [vmem:[#allocation71_spill] sm:$0xff] %v4483_v60  ;;  %v4493_v2 = vsel %vm2182_vm1, %v5394_v35, -inf  ;;  %v4501_v41 = vsel %vm2182_vm1, %v5398_v26, -inf  ;;  %v5400_v39 = vld [vmem:[#allocation70_spill] sm:$0xff]  ;;  %v5404_v63 = vld [vmem:[#allocation16_spill] sm:$0xff] }
 0x162   : > { %5393 = vst [vmem:[#allocation9_spill] sm:$0xff] %v4487_v32  ;;  %5395 = vst [vmem:[#allocation13_spill] sm:$0xff] %v4493_v2  ;;  %v4509_v24 = vsel %vm2182_vm1, %v5400_v39, -inf  ;;  %v5402_v35 = vld [vmem:[#allocation74_spill] sm:$0xff]  ;;  %v4519_v26 = vsel %vm2182_vm1, %v5404_v63, -inf  ;;  %v5406_v10 = vld [vmem:[#allocation20_spill] sm:$0xff] }
 0x163   : > { %5397 = vst [vmem:[#allocation68_spill] sm:$0xff] %v4497_v44  ;;  %5399 = vst [vmem:[#allocation72_spill] sm:$0xff] %v4501_v41  ;;  %v4513_v60 = vsel %vm2182_vm1, %v5402_v35, -inf  ;;  %v4523_v28 = vsel %vm2182_vm1, %v5406_v10, -inf  ;;  %v5408_v14 = vld [vmem:[#allocation75_spill] sm:$0xff]  ;;  %v5411_v50 = vld [vmem:[#allocation17_spill] sm:$0xff] }
 0x164   : > { %5401 = vst [vmem:[#allocation69_spill] sm:$0xff] %v4509_v24  ;;  %5403 = vst [vmem:[#allocation73_spill] sm:$0xff] %v4513_v60  ;;  %v4527_v41 = vsel %vm2182_vm1, %v5408_v14, -inf  ;;  %v5409_v35 = vld [vmem:[#allocation79_spill] sm:$0xff]  ;;  %v4537_v60 = vsel %vm2182_vm1, %v5411_v50, -inf  ;;  %v5413_v63 = vld [vmem:[#allocation21_spill] sm:$0xff] }
 0x165   : > { %5405 = vst [vmem:[#allocation10_spill] sm:$0xff] %v4519_v26  ;;  %5407 = vst [vmem:[#allocation14_spill] sm:$0xff] %v4523_v28  ;;  %v4533_v44 = vsel %vm2182_vm1, %v5409_v35, -inf  ;;  %v4541_v24 = vsel %vm2182_vm1, %v5413_v63, -inf  ;;  %v5415_v2 = vld [vmem:[#allocation76_spill] sm:$0xff]  ;;  %v5419_v28 = vld [vmem:[#allocation77_spill] sm:$0xff] }
 0x166   : > { %5410 = vst [vmem:[#allocation11_spill] sm:$0xff] %v4533_v44  ;;  %5412 = vst [vmem:[#allocation15_spill] sm:$0xff] %v4537_v60  ;;  %v4549_v39 = vsel %vm2182_vm1, %v5415_v2, -inf  ;;  %v5417_v35 = vld [vmem:[#allocation80_spill] sm:$0xff]  ;;  %v4559_v63 = vsel %vm2182_vm1, %v5419_v28, -inf  ;;  %v5421_v26 = vld [vmem:[#allocation81_spill] sm:$0xff] }
 0x167   : > { %5414 = vst [vmem:[#allocation70_spill] sm:$0xff] %v4541_v24  ;;  %5416 = vst [vmem:[#allocation74_spill] sm:$0xff] %v4549_v39  ;;  %v4553_v32 = vsel %vm2182_vm1, %v5417_v35, -inf  ;;  %v4563_v10 = vsel %vm2182_vm1, %v5421_v26, -inf  ;;  %v5423_v14 = vld [vmem:[#allocation18_spill] sm:$0xff]  ;;  %v5427_v50 = vld [vmem:[#allocation19_spill] sm:$0xff] }
 0x168   : > { %5418 = vst [vmem:[#allocation16_spill] sm:$0xff] %v4553_v32  ;;  %5420 = vst [vmem:[#allocation20_spill] sm:$0xff] %v4559_v63  ;;  %v4567_v24 = vsel %vm2182_vm1, %v5423_v14, -inf  ;;  %v5425_v35 = vld [vmem:[#allocation22_spill] sm:$0xff]  ;;  %v4577_v32 = vsel %vm2182_vm1, %v5427_v50, -inf  ;;  %v5429_v28 = vld [vmem:[#allocation23_spill] sm:$0xff] }
 0x169   : > { %5422 = vst [vmem:[#allocation75_spill] sm:$0xff] %v4563_v10  ;;  %5424 = vst [vmem:[#allocation79_spill] sm:$0xff] %v4567_v24  ;;  %v4573_v60 = vsel %vm2182_vm1, %v5425_v35, -inf  ;;  %v4581_v39 = vsel %vm2182_vm1, %v5429_v28, -inf  ;;  %v5431_v44 = vld [vmem:[#allocation78_spill] sm:$0xff]  ;;  %v5435_v63 = vld [vmem:[#allocation24_spill] sm:$0xff]  ;;  %v5443_v24 = vmax.f32 %v4043_v27, %v4047_v25  ;;  %v5447_v27 = vmax.f32 %v4199_v12, %v4203_v62 }
 0x16a   : > { %5426 = vst [vmem:[#allocation17_spill] sm:$0xff] %v4573_v60  ;;  %5428 = vst [vmem:[#allocation21_spill] sm:$0xff] %v4577_v32  ;;  %v4589_v2 = vsel %vm2182_vm1, %v5431_v44, -inf  ;;  %v5433_v35 = vld [vmem:[#allocation82_spill] sm:$0xff]  ;;  %v4599_v28 = vsel %vm2182_vm1, %v5435_v63, -inf  ;;  %v4603_v26 = vsel %vm2182_vm1, %v4017_v33, -inf  ;;  %v5448_v25 = vmax.f32 %v4207_v51, %v4213_v38 }
 0x16b   : > { %5430 = vst [vmem:[#allocation76_spill] sm:$0xff] %v4581_v39  ;;  %5432 = vst [vmem:[#allocation80_spill] sm:$0xff] %v4589_v2  ;;  %v4593_v10 = vsel %vm2182_vm1, %v5433_v35, -inf  ;;  %v5436_v14 = vld [vmem:[#allocation83_spill] sm:$0xff]  ;;  %v4613_v35 = vsel %vm2182_vm1, %v4023_v15, -inf  ;;  %v5437_v50 = vld [vmem:[#allocation25_spill] sm:$0xff]  ;;  %v5452_v62 = vmax.f32 %v4279_v13, %v4283_v20  ;;  %v5453_v51 = vmax.f32 %v4287_v6, %v4293_v42 }
 0x16c   : > { %5434 = vst [vmem:[#allocation77_spill] sm:$0xff] %v4593_v10  ;;  %v4607_v39 = vsel %vm2182_vm1, %v5436_v14, -inf  ;;  %v4617_v10 = vsel %vm2182_vm1, %v5437_v50, -inf  ;;  %v4621_v63 = vsel %vm2182_vm1, %v4025_v61, -inf  ;;  %v5438_v2 = vld [vmem:[#allocation84_spill] sm:$0xff]  ;;  %v4633_v15 = vsel %vm2182_vm1, %v4035_v21, -inf }
 0x16d   : > { %v4629_v44 = vsel %vm2182_vm1, %v5438_v2, -inf  ;;  %v5439_v32 = vld [vmem:[#allocation85_spill] sm:$0xff]  ;;  %v4643_v33 = vsel %vm2182_vm1, %v4037_v52, -inf  ;;  %v5440_v14 = vld [vmem:[#allocation26_spill] sm:$0xff]  ;;  %v4653_v21 = vsel %vm2182_vm1, %v4049_v19, -inf  ;;  %v5441_v50 = vld [vmem:[#allocation27_spill] sm:$0xff]  ;;  %v5456_v12 = vmax.f32 %v4229_v36, %v4233_v3 }
 0x16e   : > { %v4639_v61 = vsel %vm2182_vm1, %v5439_v32, -inf  ;;  %v4647_v60 = vsel %vm2182_vm1, %v5440_v14, -inf  ;;  %v4657_v32 = vsel %vm2182_vm1, %v5441_v50, -inf  ;;  %v4661_v52 = vsel %vm2182_vm1, %v4069_v46, -inf  ;;  %v5464_v42 = vld [vmem:[#allocation31_spill] sm:$0xff] }
 0x16f   : > { %v4669_v2 = vsel %vm2182_vm1, %v4013_v5, -inf  ;;  %v4673_v19 = vsel %vm2182_vm1, %v4091_v30, -inf  ;;  %v5442_v46 = vmax.f32 %v4029_v8, %v4033_v23  ;;  %v5444_v5 = vmax.f32 %v4055_v45, %v4059_v34 }
 0x170   : > { %v5445_v50 = vmax.f32 %v4115_v37, %v4123_v57  ;;  %v5446_v8 = vmax.f32 %v4127_v53, %v4133_v22  ;;  %v5449_v45 = vmax.f32 %v4063_v17, %v4067_v7  ;;  %v5450_v37 = vmax.f32 %v4137_v58, %v4141_v16 }
 0x171   : > { %v2440_v14 = vsel %vm2439_vm2, %v5443_v24, %v5442_v46  ;;  %v2460_v24 = vsel %vm2439_vm2, %v5448_v25, %v5447_v27  ;;  %v5451_v53 = vmax.f32 %v4217_v29, %v4221_v40  ;;  %v2467_v17 = vsel %vm2439_vm2, %v5453_v51, %v5452_v62  ;;  %v5470_v46 = vld [vmem:[#allocation46_spill] sm:$0xff]  ;;  %v5476_v27 = vld [vmem:[#allocation33_spill] sm:$0xff]  ;;  %v5483_v62 = vld [vmem:[#allocation44_spill] sm:$0xff] }
 0x172   : > { %v2442_v30 = vsel %vm2441_vm3, %v5444_v5, %v2440_v14  ;;  %v2453_v23 = vsel %vm2439_vm2, %v5446_v8, %v5445_v50  ;;  %v5454_v7 = vmax.f32 %v4077_v18, %v4081_v43  ;;  %v5455_v58 = vmax.f32 %v4149_v56, %v4153_v54  ;;  %v5467_v14 = vld [vmem:[#allocation39_spill] sm:$0xff]  ;;  %v5468_v50 = vld [vmem:[#allocation36_spill] sm:$0xff]  ;;  %v5477_v25 = vld [vmem:[#allocation34_spill] sm:$0xff] }
 0x173   : > { %v2444_v34 = vsel %vm2443_vm4, %v5449_v45, %v2442_v30  ;;  %v2454_v57 = vsel %vm2441_vm3, %v5450_v37, %v2453_v23  ;;  %v2461_v22 = vsel %vm2441_vm3, %v5451_v53, %v2460_v24  ;;  %v5457_v40 = vmax.f32 %v4297_v11, %v4301_v9  ;;  %v5474_v30 = vld [vmem:[#allocation30_spill] sm:$0xff]  ;;  %v5480_v37 = vld [vmem:[#allocation37_spill] sm:$0xff] }
 0x174   : > { %v2446_v16 = vsel %vm2445_vm5, %v5454_v7, %v2444_v34  ;;  %v2455_v29 = vsel %vm2443_vm4, %v5455_v58, %v2454_v57  ;;  %v2462_v38 = vsel %vm2443_vm4, %v5456_v12, %v2461_v22  ;;  %v5458_v18 = vmax.f32 %v4085_v47, %v4089_v59  ;;  %v5462_v47 = vld [vmem:[#allocation28_spill] sm:$0xff]  ;;  %v5482_v22 = vld [vmem:[#allocation47_spill] sm:$0xff]  ;;  %v5485_v7 = vld [vmem:[#allocation38_spill] sm:$0xff] }
 0x175   : > { %v2468_v20 = vsel %vm2441_vm3, %v5457_v40, %v2467_v17  ;;  %v5459_v56 = vmax.f32 %v4159_v1, %v4163_v4  ;;  %v5460_v36 = vmax.f32 %v4239_v31, %v4243_v49  ;;  %v5461_v6 = vmax.f32 %v4309_v0, %v4313_v48  ;;  %v5465_v4 = vld [vmem:[#allocation32_spill] sm:$0xff]  ;;  %v5471_v0 = vld [vmem:[#allocation43_spill] sm:$0xff]  ;;  %v5488_v12 = vld [vmem:[#allocation41_spill] sm:$0xff] }
 0x176   : > { %v2448_v43 = vsel %vm2447_vm6, %v5458_v18, %v2446_v16  ;;  %v5463_v59 = vmax.f32 %v4099_v55, %v5462_v47  ;;  %v5466_v1 = vmax.f32 %v5464_v42, %v5465_v4  ;;  %v5469_v49 = vmax.f32 %v5467_v14, %v5468_v50  ;;  %v5473_v55 = vld [vmem:[#allocation29_spill] sm:$0xff]  ;;  %v5479_v34 = vld [vmem:[#allocation40_spill] sm:$0xff]  ;;  %v5486_v16 = vld [vmem:[#allocation35_spill] sm:$0xff] }
 0x177   : > { %v2456_v54 = vsel %vm2445_vm5, %v5459_v56, %v2455_v29  ;;  %v2463_v3 = vsel %vm2445_vm5, %v5460_v36, %v2462_v38  ;;  %v2469_v11 = vsel %vm2443_vm4, %v5461_v6, %v2468_v20  ;;  %v5472_v48 = vmax.f32 %v5470_v46, %v5471_v0  ;;  %v5489_v38 = vld [vmem:[#allocation42_spill] sm:$0xff]  ;;  %v5491_v18 = vld [vmem:[#allocation48_spill] sm:$0xff]  ;;  %v5500_v42 = vld [vmem:[#allocation49_spill] sm:$0xff] }
 0x178   : > { %v2450_v13 = vsel %vm2449_vm7, %v5463_v59, %v2448_v43  ;;  %v2457_v9 = vsel %vm2447_vm6, %v5466_v1, %v2456_v54  ;;  %v2464_v31 = vsel %vm2447_vm6, %v5469_v49, %v2463_v3  ;;  %v5475_v8 = vmax.f32 %v5473_v55, %v5474_v30  ;;  %v5492_v43 = vld [vmem:[#allocation45_spill] sm:$0xff]  ;;  %v5494_v36 = vld [vmem:[#allocation54_spill] sm:$0xff]  ;;  %v5495_v3 = vld [vmem:[#allocation51_spill] sm:$0xff] }
 0x179   : > { %v2470_v5 = vsel %vm2445_vm5, %v5472_v48, %v2469_v11  ;;  %v5478_v24 = vmax.f32 %v5476_v27, %v5477_v25  ;;  %v5481_v57 = vmax.f32 %v5479_v34, %v5480_v37  ;;  %v5484_v51 = vmax.f32 %v5482_v22, %v5483_v62  ;;  %v5497_v11 = vld [vmem:[#allocation55_spill] sm:$0xff]  ;;  %v5498_v47 = vld [vmem:[#allocation52_spill] sm:$0xff]  ;;  %v5501_v4 = vld [vmem:[#allocation50_spill] sm:$0xff] }
 0x17a   : > { %v2452_v23 = vsel %vm2451_vm8, %v5475_v8, %v2450_v13  ;;  %v5487_v58 = vmax.f32 %v5485_v7, %v5486_v16  ;;  %v5490_v40 = vmax.f32 %v5488_v12, %v5489_v38  ;;  %v5493_v56 = vmax.f32 %v5491_v18, %v5492_v43  ;;  %v5503_v14 = vld [vmem:[#allocation56_spill] sm:$0xff]  ;;  %v5504_v50 = vld [vmem:[#allocation53_spill] sm:$0xff]  ;;  %v5506_v46 = vld [vmem:[#allocation2_spill] sm:$0xff] }
 0x17b   : > { %v2458_v45 = vsel %vm2449_vm7, %v5478_v24, %v2457_v9  ;;  %v2465_v53 = vsel %vm2449_vm7, %v5481_v57, %v2464_v31  ;;  %v2471_v17 = vsel %vm2447_vm6, %v5484_v51, %v2470_v5  ;;  %v5496_v6 = vmax.f32 %v5494_v36, %v5495_v3  ;;  %2510 = vst.msk [vmem:[%s4741_s8] sm:$0xff] %vm2182_vm1, %v2452_v23  ;;  %v5507_v0 = vld [vmem:[#allocation6_spill] sm:$0xff]  ;;  %v5509_v5 = vld [vmem:[#allocation3_spill] sm:$0xff]  ;;  %v5517_v37 = vld [vmem:[#allocation57_spill] sm:$0xff] }
 0x17c   : > { %v2459_v29 = vsel %vm2451_vm8, %v5487_v58, %v2458_v45  ;;  %v2466_v20 = vsel %vm2451_vm8, %v5490_v40, %v2465_v53  ;;  %v2472_v54 = vsel %vm2449_vm7, %v5493_v56, %v2471_v17  ;;  %v5499_v59 = vmax.f32 %v5497_v11, %v5498_v47  ;;  %v5510_v55 = vld [vmem:[#allocation7_spill] sm:$0xff]  ;;  %v5512_v27 = vld [vmem:[#allocation10_spill] sm:$0xff]  ;;  %v5518_v57 = vld [vmem:[#allocation4_spill] sm:$0xff] }
 0x17d   : > { %v5502_v1 = vmax.f32 %v5500_v42, %v5501_v4  ;;  %v5505_v49 = vmax.f32 %v5503_v14, %v5504_v50  ;;  %v5508_v48 = vmax.f32 %v5506_v46, %v5507_v0  ;;  %v5511_v30 = vmax.f32 %v5509_v5, %v5510_v55  ;;  %v5513_v23 = vld [vmem:[#allocation14_spill] sm:$0xff]  ;;  %v5515_v24 = vld [vmem:[#allocation11_spill] sm:$0xff]  ;;  %2511 = vst.msk [vmem:[%s4741_s8 + $0x8] sm:$0xff] %vm2182_vm1, %v2459_v29  ;;  %v5532_v36 = vld [vmem:[#allocation12_spill] sm:$0xff] }
 0x17e   : > { %v2474_v13 = vsel %vm2439_vm2, %v5499_v59, %v5496_v6  ;;  %v5514_v25 = vmax.f32 %v5512_v27, %v5513_v23  ;;  %v5516_v45 = vmax.f32 %v4527_v41, %v5515_v24  ;;  %2512 = vst.msk [vmem:[%s4741_s8 + $0x10] sm:$0xff] %vm2182_vm1, %v2466_v20  ;;  %v5519_v53 = vmax.f32 %v5517_v37, %v5518_v57  ;;  %v5520_v62 = vld [vmem:[#allocation62_spill] sm:$0xff]  ;;  %v5523_v16 = vld [vmem:[#allocation15_spill] sm:$0xff]  ;;  %v5535_v47 = vld [vmem:[#allocation16_spill] sm:$0xff] }
 0x17f   : > { %v2473_v9 = vsel %vm2451_vm8, %v5502_v1, %v2472_v54  ;;  %v2475_v31 = vsel %vm2441_vm3, %v5505_v49, %v2474_v13  ;;  %v2481_v8 = vsel %vm2439_vm2, %v5511_v30, %v5508_v48  ;;  %v5521_v51 = vld [vmem:[#allocation66_spill] sm:$0xff]  ;;  %v5526_v29 = vmax.f32 %v4599_v28, %v4603_v26  ;;  %v5529_v18 = vld [vmem:[#allocation63_spill] sm:$0xff]  ;;  %v5531_v54 = vld [vmem:[#allocation8_spill] sm:$0xff] }
 0x180   : > { %v2488_v34 = vsel %vm2439_vm2, %v5516_v45, %v5514_v25  ;;  %v2476_v22 = vsel %vm2443_vm4, %v5519_v53, %v2475_v31  ;;  %v5522_v17 = vmax.f32 %v5520_v62, %v5521_v51  ;;  %v5524_v58 = vld [vmem:[#allocation70_spill] sm:$0xff]  ;;  %v5527_v38 = vmax.f32 %v4607_v39, %v4613_v35  ;;  %2513 = vst.msk [vmem:[%s4741_s8 + $0x18] sm:$0xff] %vm2182_vm1, %v2473_v9  ;;  %v5538_v59 = vld [vmem:[#allocation59_spill] sm:$0xff]  ;;  %v5539_v13 = vld [vmem:[#allocation5_spill] sm:$0xff] }
 0x181   : > { %v5525_v12 = vmax.f32 %v5523_v16, %v5524_v58  ;;  %v5528_v20 = vld [vmem:[#allocation58_spill] sm:$0xff]  ;;  %v5533_v3 = vmax.f32 %v5531_v54, %v5532_v36  ;;  %v5537_v39 = vmax.f32 %v4617_v10, %v4621_v63  ;;  %v5540_v42 = vmax.f32 %v5538_v59, %v5539_v13  ;;  %v5541_v1 = vld [vmem:[#allocation67_spill] sm:$0xff]  ;;  %v5544_v49 = vld [vmem:[#allocation20_spill] sm:$0xff] }
 0x182   : > { %v2482_v7 = vsel %vm2441_vm3, %v5522_v17, %v2481_v8  ;;  %v2495_v40 = vsel %vm2439_vm2, %v5527_v38, %v5526_v29  ;;  %v5530_v43 = vmax.f32 %v5528_v20, %v5529_v18  ;;  %v5534_v11 = vld [vmem:[#allocation74_spill] sm:$0xff]  ;;  %v5542_v9 = vld [vmem:[#allocation71_spill] sm:$0xff]  ;;  %v5547_v10 = vmax.f32 %v4629_v44, %v4633_v15  ;;  %v5548_v48 = vld [vmem:[#allocation60_spill] sm:$0xff] }
 0x183   : > { %v2489_v41 = vsel %vm2441_vm3, %v5525_v12, %v2488_v34  ;;  %v2483_v6 = vsel %vm2443_vm4, %v5533_v3, %v2482_v7  ;;  %v5536_v26 = vmax.f32 %v5534_v11, %v5535_v47  ;;  %v2496_v35 = vsel %vm2441_vm3, %v5537_v39, %v2495_v40  ;;  %v5545_v31 = vld [vmem:[#allocation75_spill] sm:$0xff]  ;;  %v5549_v5 = vld [vmem:[#allocation64_spill] sm:$0xff]  ;;  %v5551_v8 = vld [vmem:[#allocation9_spill] sm:$0xff] }
 0x184   : > { %v2477_v56 = vsel %vm2445_vm5, %v5530_v43, %v2476_v22  ;;  %v5543_v14 = vmax.f32 %v5541_v1, %v5542_v9  ;;  %v5546_v46 = vmax.f32 %v5544_v49, %v5545_v31  ;;  %v2497_v63 = vsel %vm2443_vm4, %v5547_v10, %v2496_v35  ;;  %v5552_v27 = vld [vmem:[#allocation13_spill] sm:$0xff]  ;;  %v5554_v24 = vld [vmem:[#allocation79_spill] sm:$0xff]  ;;  %v5561_v51 = vld [vmem:[#allocation68_spill] sm:$0xff] }
 0x185   : > { %v2490_v28 = vsel %vm2443_vm4, %v5536_v26, %v2489_v41  ;;  %v2478_v4 = vsel %vm2447_vm6, %v5540_v42, %v2477_v56  ;;  %v5550_v55 = vmax.f32 %v5548_v48, %v5549_v5  ;;  %v5553_v23 = vmax.f32 %v5551_v8, %v5552_v27  ;;  %v5555_v45 = vld [vmem:[#allocation17_spill] sm:$0xff]  ;;  %v5562_v17 = vld [vmem:[#allocation72_spill] sm:$0xff] }
 0x186   : > { %v2484_v50 = vsel %vm2445_vm5, %v5543_v14, %v2483_v6  ;;  %v2491_v0 = vsel %vm2445_vm5, %v5546_v46, %v2490_v28  ;;  %v5556_v34 = vmax.f32 %v5554_v24, %v5555_v45  ;;  %v5557_v44 = vmax.f32 %v4639_v61, %v4643_v33  ;;  %v5558_v57 = vld [vmem:[#allocation61_spill] sm:$0xff]  ;;  %v5565_v12 = vld [vmem:[#allocation76_spill] sm:$0xff] }
 0x187   : > { %v2479_v30 = vsel %vm2449_vm7, %v5550_v55, %v2478_v4  ;;  %v2485_v25 = vsel %vm2447_vm6, %v5553_v23, %v2484_v50  ;;  %v5559_v53 = vld [vmem:[#allocation65_spill] sm:$0xff]  ;;  %v5563_v7 = vmax.f32 %v5561_v51, %v5562_v17  ;;  %v5567_v33 = vmax.f32 %v4647_v60, %v4653_v21  ;;  %v5571_v43 = vld [vmem:[#allocation80_spill] sm:$0xff] }
 0x188   : > { %v2492_v37 = vsel %vm2447_vm6, %v5556_v34, %v2491_v0  ;;  %v2498_v15 = vsel %vm2445_vm5, %v5557_v44, %v2497_v63  ;;  %v5560_v22 = vmax.f32 %v5558_v57, %v5559_v53  ;;  %v5564_v58 = vld [vmem:[#allocation21_spill] sm:$0xff]  ;;  %v5574_v3 = vmax.f32 %v4657_v32, %v4661_v52 }
 0x189   : > { %v2486_v16 = vsel %vm2449_vm7, %v5563_v7, %v2485_v25  ;;  %v5566_v41 = vmax.f32 %v5564_v58, %v5565_v12  ;;  %v2499_v61 = vsel %vm2447_vm6, %v5567_v33, %v2498_v15  ;;  %v5568_v38 = vld [vmem:[#allocation69_spill] sm:$0xff]  ;;  %v5575_v60 = vmax.f32 %v4669_v2, %v4673_v19 }
 0x18a   : > { %v2480_v62 = vsel %vm2451_vm8, %v5560_v22, %v2479_v30  ;;  %v5569_v40 = vld [vmem:[#allocation73_spill] sm:$0xff]  ;;  %v2500_v6 = vsel %vm2449_vm7, %v5574_v3, %v2499_v61 }
 0x18b   : > { %v2493_v29 = vsel %vm2449_vm7, %v5566_v41, %v2492_v37  ;;  %v5570_v20 = vmax.f32 %v5568_v38, %v5569_v40  ;;  %v5572_v56 = vld [vmem:[#allocation77_spill] sm:$0xff]  ;;  %2514 = vst.msk [vmem:[%s4741_s8 + $0x20] sm:$0xff] %vm2182_vm1, %v2480_v62  ;;  %v2501_v21 = vsel %vm2451_vm8, %v5575_v60, %v2500_v6 }
 0x18c   : > { %v5573_v54 = vmax.f32 %v5571_v43, %v5572_v56  ;;  %2517 = vst.msk [vmem:[%s4741_s8 + $0x38] sm:$0xff] %vm2182_vm1, %v2501_v21 }
 0x18d   : > { %v2487_v18 = vsel %vm2451_vm8, %v5570_v20, %v2486_v16 }
 0x18e   : > { %v2494_v36 = vsel %vm2451_vm8, %v5573_v54, %v2493_v29  ;;  %2515 = vst.msk [vmem:[%s4741_s8 + $0x28] sm:$0xff] %vm2182_vm1, %v2487_v18 }
 0x18f   : > { %2516 = vst.msk [vmem:[%s4741_s8 + $0x30] sm:$0xff] %vm2182_vm1, %v2494_v36 }
 0x190 PF: > { %s18_s26 = sadd.s32 1, %s2829_s26   ;;  %s5576_s24 = smov %s2825_s25 }
 0x191   : > { %p15_p5 = scmp.ge.s32.totalorder %s18_s26, 4   ;;  %s5577_s25 = smov %s5579_s27 }
 0x193   :  { %17 = sbr.rel (!%p15_p5) target bundleno = 2 (0x2), region = 89 }

</bundles_post_ra>
